<compile_context>
chip_gen: v7x
topology: tpu7x:2x2x1
jax: 0.10.0
libtpu: 0.0.40
codegen_flags: <defaults>
</compile_context>

<pallas_src>
import jax
import jax.numpy as jnp
from jax.experimental import pallas as pl
from jax.experimental.pallas import tpu as pltpu

_BN_EPS = 1e-5
_ACT_DTYPE = jnp.bfloat16          # activation / weight dtype fed to the MXU
_ACC_BUDGET = 128 * 1024           # f32 accumulator bytes kept ~within the vreg file


# ----------------------------------------------------------------------------
# Hardware-aware knobs
# ----------------------------------------------------------------------------
def _vmem_limit_bytes() -> int:
    """Generation-aware scoped-VMEM limit: ~3/4 of the part's VMEM
    (96 MiB on 128 MiB v5e/v6e, 48 MiB on 64 MiB v7x)."""
    try:
        cap = int(pltpu.get_tpu_info().vmem_capacity_bytes)
    except Exception:
        cap = 64 * 1024 * 1024
    return min((cap * 3) // 4, 100 * 1024 * 1024)


def _pick_tile_n(cout: int) -> int:
    if cout % 256 == 0:
        return 256
    if cout % 128 == 0:
        return 128
    return cout    # lane-sparse only for tiny (demo-size) channel counts < 128


def _pick_tile_h(ho: int, wo: int, tn: int) -> int:
    """Largest divisor of Ho whose f32 accumulator (th*Wo*tn*4) fits ~vregs."""
    max_rows = max(1, _ACC_BUDGET // (wo * tn * 4))
    th = 1
    for d in range(1, ho + 1):
        if ho % d == 0 and d <= max_rows:
            th = d
    return th


# ----------------------------------------------------------------------------
# Conv kernel (3x3, stride 1) + folded-BN bias + LeakyReLU, im2col-free in HBM
# ----------------------------------------------------------------------------
def _make_conv_kernel(*, padding: int, apply_gate: bool, emit_pool: bool,
                      cin: int, merge_taps: bool):
    """Refs per grid point (b, n, h):
      x_ref : (1, Hi, Wi, Cin)  un-padded slab of batch b (bf16), VMEM-resident
                                across all (n, h) steps of that batch.
      w_ref : (9*Cin, tn)       conv weights, BN scale pre-folded (bf16),
                                resident across all h strips of a (b, n).
      b_ref : (1, tn)           folded BN bias (f32).
      s_ref : (1, 9*Cin, 1)     optional SE gate, pre-tiled to the weight rows.
      o_ref : (1, th, Wo, tn)   output tile (bf16).
      pool_ref : (1, 1, tn)     optional global-sum accumulator (f32).
      pad_ref  : (Hi+2p, Wi+2p, Cin) VMEM scratch for in-kernel zero padding.
    """

    def kernel(*refs):
        it = iter(refs)
        x_ref = next(it)
        w_ref = next(it)
        b_ref = next(it)
        s_ref = next(it) if apply_gate else None
        o_ref = next(it)
        pool_ref = next(it) if emit_pool else None
        pad_ref = next(it) if padding else None

        _, th, wo, tn = o_ref.shape
        h = pl.program_id(2)
        row0 = h * th

        # SE gate folded into the (small) weight tile rather than rescaling the
        # whole activation strip (and re-doing it for every Cout tile).
        w_full = w_ref[...]
        if apply_gate:
            w_full = (w_full.astype(jnp.float32) * s_ref[0]).astype(w_full.dtype)

        if padding:
            # Zero-pad the resident slab into VMEM scratch once per (b, n):
            # replaces the XLA jnp.pad pass (a full HBM activation round trip).
            @pl.when(h == 0)
            def _():
                hi, wi = x_ref.shape[1], x_ref.shape[2]
                pad_ref[...] = jnp.zeros_like(pad_ref)
                pad_ref[pl.ds(padding, hi), pl.ds(padding, wi), :] = x_ref[0]

            xs = pad_ref[pl.ds(row0, th + 2), :, :]       # (th+2, Wp, Cin)
        else:
            xs = x_ref[0, pl.ds(row0, th + 2), :, :]      # (th+2, Wi, Cin)

        if merge_taps:
            # Small Cin: merge all 9 taps along K -> one MXU GEMM (K = 9*Cin)
            # instead of 9 underfilled GEMMs + 8 full accumulator VPU passes.
            wins = [xs[kh:kh + th, kw:kw + wo, :]
                    for kh in range(3) for kw in range(3)]
            patches = jnp.concatenate(wins, axis=-1).reshape(th * wo, 9 * cin)
            acc = jnp.dot(patches, w_full, preferred_element_type=jnp.float32)
        else:
            # Large Cin: K=Cin already feeds the MXU; seed acc from tap 0.
            acc = None
            for t in range(9):
                kh, kw = divmod(t, 3)
                win = xs[kh:kh + th, kw:kw + wo, :].reshape(th * wo, cin)
                part = jnp.dot(win, w_full[t * cin:(t + 1) * cin, :],
                               preferred_element_type=jnp.float32)
                acc = part if acc is None else acc + part

        y = acc + b_ref[...]                 # folded BN bias (f32)
        y = jnp.maximum(y, 0.1 * y)          # LeakyReLU(0.1)
        o_ref[...] = y.reshape(o_ref.shape).astype(o_ref.dtype)

        if emit_pool:
            # Fused SE global-average-pool: accumulate strip sums over h.
            @pl.when(h == 0)
            def _():
                pool_ref[...] = jnp.zeros_like(pool_ref)

            pool_ref[...] += jnp.sum(y, axis=0, keepdims=True
                                     ).reshape(pool_ref.shape)

    return kernel


def conv_bn_lrelu(x_nhwc, p, *, padding, gate=None, emit_pool=False):
    """ConvBlock: 3x3 conv (stride 1, no bias) + folded BN + LeakyReLU(0.1).

    gate:      optional (B, 9*Cin, 1) f32 SE gate (folded into the weights).
    emit_pool: also return the (B, 1, Cout) global activation sum (fused SE
               average pool, so the activation is never re-read from HBM).
    """
    x_nhwc = x_nhwc.astype(_ACT_DTYPE)
    B, Hi, Wi, Cin = x_nhwc.shape
    Ho = Hi + 2 * padding - 2
    Wo = Wi + 2 * padding - 2
    Cout = p["w"].shape[-1]

    tn = _pick_tile_n(Cout)
    th = _pick_tile_h(Ho, Wo, tn)
    n_tiles = Cout // tn
    # Cout-tiles before H-strips so the weight/bias blocks (index depends only
    # on n) stay resident across every H strip.
    grid = (B, n_tiles, Ho // th)

    in_specs = [
        # Whole un-padded spatial slab of batch b stays resident in VMEM.
        # TODO(synk): for large YOLO shapes on v7x (64 MiB VMEM) switch this to
        # memory_space=pl.ANY + manual halo-strip double buffering.
        pl.BlockSpec((1, Hi, Wi, Cin), lambda b, n, h: (b, 0, 0, 0)),
        pl.BlockSpec((9 * Cin, tn), lambda b, n, h: (0, n)),
        pl.BlockSpec((1, tn), lambda b, n, h: (0, n)),
    ]
    args = [x_nhwc, p["w"], p["bias"]]
    if gate is not None:
        in_specs.append(pl.BlockSpec((1, 9 * Cin, 1), lambda b, n, h: (b, 0, 0)))
        args.append(gate)

    y_shape = jax.ShapeDtypeStruct((B, Ho, Wo, Cout), _ACT_DTYPE)
    y_spec = pl.BlockSpec((1, th, Wo, tn), lambda b, n, h: (b, h, 0, n))

    scratch = []
    if padding:
        scratch.append(
            pltpu.VMEM((Hi + 2 * padding, Wi + 2 * padding, Cin), _ACT_DTYPE))

    flops = 2 * B * Ho * Wo * 9 * Cin * Cout
    bytes_accessed = (B * Hi * Wi * Cin * 2          # x: once per batch
                      + B * 9 * Cin * Cout * 2       # w: once per (b, n)
                      + B * n_tiles * tn * 4         # bias
                      + B * Ho * Wo * Cout * 2       # y write-back
                      + (B * Cout * 4 if emit_pool else 0))

    kernel = _make_conv_kernel(padding=padding, apply_gate=gate is not None,
                               emit_pool=emit_pool, cin=Cin,
                               merge_taps=Cin < 128)
    # h must be "arbitrary" whenever it carries state (pool accumulator /
    # pad-scratch fill); b and Cout-tiles stay "parallel" for the megacore.
    h_sem = "arbitrary" if (emit_pool or padding) else "parallel"
    cparams = pltpu.CompilerParams(
        dimension_semantics=("parallel", "parallel", h_sem),
        vmem_limit_bytes=_vmem_limit_bytes())
    cost = pl.CostEstimate(flops=flops, transcendentals=0,
                           bytes_accessed=bytes_accessed)

    if emit_pool:
        pool_shape = jax.ShapeDtypeStruct((B, 1, Cout), jnp.float32)
        pool_spec = pl.BlockSpec((1, 1, tn), lambda b, n, h: (b, 0, n))
        y, pool = pl.pallas_call(
            kernel, grid=grid, in_specs=in_specs,
            out_specs=(y_spec, pool_spec), out_shape=(y_shape, pool_shape),
            scratch_shapes=scratch, compiler_params=cparams,
            cost_estimate=cost,
        )(*args)
        return y, pool

    y = pl.pallas_call(
        kernel, grid=grid, in_specs=in_specs,
        out_specs=y_spec, out_shape=y_shape,
        scratch_shapes=scratch, compiler_params=cparams, cost_estimate=cost,
    )(*args)
    return y


# ----------------------------------------------------------------------------
# SE excitation MLP on the fused-pool output (tiny; deliberately plain JAX)
# ----------------------------------------------------------------------------
def _se_gate(pool_sum, hw, p_se):
    """fc1 -> ReLU -> fc2 -> sigmoid on the (B, C) pooled vector.  Returned
    pre-tiled to (B, 9*C, 1) so the conv kernel folds it straight into its
    (9*Cin, tn) weight tile (row order = tap-major, channel-minor)."""
    pooled = pool_sum[:, 0, :] / jnp.float32(hw)          # (B, C)
    hidden = jnp.maximum(pooled @ p_se["w1"], 0.0)        # (B, C // r)
    g = jax.nn.sigmoid(hidden @ p_se["w2"])               # (B, C)
    return jnp.tile(g, (1, 9))[:, :, None].astype(jnp.float32)


# ----------------------------------------------------------------------------
# Parameter init (deterministic synthetic weights; eval-mode BN folded)
# ----------------------------------------------------------------------------
def _init_conv_bn(key, cin, cout):
    kw, kg, kb, km, kv = jax.random.split(key, 5)
    w_oihw = 0.1 * jax.random.normal(kw, (cout, cin, 3, 3), jnp.float32)
    gamma = 1.0 + 0.1 * jax.random.normal(kg, (cout,), jnp.float32)
    beta = 0.1 * jax.random.normal(kb, (cout,), jnp.float32)
    running_mean = 0.1 * jax.random.normal(km, (cout,), jnp.float32)
    running_var = jax.random.uniform(kv, (cout,), jnp.float32,
                                     minval=0.5, maxval=1.5)
    scale = gamma / jnp.sqrt(running_var + _BN_EPS)
    bias = beta - running_mean * scale
    # OIHW -> HWIO, fold BN scale, flatten to the (9*Cin, Cout) GEMM layout.
    w_hwio = jnp.transpose(w_oihw, (2, 3, 1, 0)) * scale[None, None, None, :]
    return {"w": w_hwio.reshape(9 * cin, cout).astype(_ACT_DTYPE),
            "bias": bias.reshape(1, cout)}


def _init_se(key, channels, reduction_ratio):
    cr = channels // reduction_ratio
    k1, k2 = jax.random.split(key)
    w1_oi = 0.1 * jax.random.normal(k1, (cr, channels), jnp.float32)  # (out,in)
    w2_oi = 0.1 * jax.random.normal(k2, (channels, cr), jnp.float32)
    return {"w1": jnp.transpose(w1_oi), "w2": jnp.transpose(w2_oi)}


def init_residual_block_params(key, channels, use_SE, num_repeats):
    params = []
    for _ in range(num_repeats):
        key, k1, k2, k3 = jax.random.split(key, 4)
        rep = {"conv1": _init_conv_bn(k1, channels, channels // 2),
               "conv2": _init_conv_bn(k2, channels // 2, channels)}
        if use_SE:
            rep["se"] = _init_se(k3, channels // 2, 4)
        params.append(rep)
    return params


# ----------------------------------------------------------------------------
# ResidualBlock forward (public API: NCHW in / NCHW out, like PyTorch)
# ----------------------------------------------------------------------------
def residual_block_forward(x_nchw, params, use_residual, use_SE):
    x = jnp.transpose(x_nchw, (0, 2, 3, 1)).astype(_ACT_DTYPE)   # NCHW -> NHWC
    for rep in params:
        residual = x
        if use_SE:
            y, pool = conv_bn_lrelu(x, rep["conv1"], padding=0, emit_pool=True)
            gate = _se_gate(pool, y.shape[1] * y.shape[2], rep["se"])
            y = conv_bn_lrelu(y, rep["conv2"], padding=1, gate=gate)
        else:
            y = conv_bn_lrelu(x, rep["conv1"], padding=0)
            y = conv_bn_lrelu(y, rep["conv2"], padding=1)
        if use_residual:
            # TODO(synk): as in the PyTorch reference, ConvBlock(k=3, pad=0)
            # shrinks H/W by 2, so this add is shape-mismatched there too;
            # kept for semantic fidelity, not exercised in the demo.
            y = y + residual
        x = y
    return jnp.transpose(x, (0, 3, 1, 2)).astype(x_nchw.dtype)   # NHWC -> NCHW


# ----------------------------------------------------------------------------
# Pure-JAX reference (for numeric verification)
# ----------------------------------------------------------------------------
def _conv_ref(x, p, padding):
    cin, cout = x.shape[-1], p["w"].shape[-1]
    w = p["w"].astype(jnp.float32).reshape(3, 3, cin, cout)
    y = jax.lax.conv_general_dilated(
        x, w, window_strides=(1, 1),
        padding=[(padding, padding), (padding, padding)],
        dimension_numbers=("NHWC", "HWIO", "NHWC"),
        precision=jax.lax.Precision.HIGHEST)
    y = y + p["bias"].reshape(1, 1, 1, cout)
    return jnp.maximum(y, 0.1 * y)


def residual_block_ref(x_nchw, params, use_residual, use_SE):
    x = jnp.transpose(x_nchw, (0, 2, 3, 1)).astype(_ACT_DTYPE).astype(jnp.float32)
    for rep in params:
        residual = x
        y1 = _conv_ref(x, rep["conv1"], 0)
        y1b = y1.astype(_ACT_DTYPE).astype(jnp.float32)
        if use_SE:
            pooled = jnp.mean(y1, axis=(1, 2))
            hidden = jnp.maximum(pooled @ rep["se"]["w1"], 0.0)
            g = jax.nn.sigmoid(hidden @ rep["se"]["w2"])
            y = _conv_ref(y1b * g[:, None, None, :], rep["conv2"], 1)
        else:
            y = _conv_ref(y1b, rep["conv2"], 1)
        y = y.astype(_ACT_DTYPE).astype(jnp.float32)
        if use_residual:
            y = y + residual
        x = y
    return jnp.transpose(x, (0, 3, 1, 2))


# ----------------------------------------------------------------------------
if __name__ == "__main__":
    key = jax.random.PRNGKey(0)
    kx, kp1, kp2 = jax.random.split(key, 3)

    B, C, H, W = 2, 16, 16, 16
    x = jax.random.normal(kx, (B, C, H, W), jnp.float32)

    fwd = jax.jit(residual_block_forward, static_argnums=(2, 3))

    # Config 1: plain path (ConvBlock -> ConvBlock), 1 repeat.
    # NOTE: with kernel_size=3 / padding=0 in the first conv, the residual add
    # is shape-invalid (also in PyTorch), so use_residual=False here.
    p1 = init_residual_block_params(kp1, C, use_SE=False, num_repeats=1)
    y1 = jax.block_until_ready(fwd(x, p1, False, False))
    assert y1.shape == (B, C, H - 2, W - 2)
    r1 = residual_block_ref(x, p1, False, False)
    err1 = float(jnp.max(jnp.abs(y1.astype(jnp.float32) - r1)))
    assert err1 < 0.1, f"config1 max abs err {err1}"

    # Config 2: SE path (ConvBlock -> SEBlock -> ConvBlock), 2 repeats.
    p2 = init_residual_block_params(kp2, C, use_SE=True, num_repeats=2)
    y2 = jax.block_until_ready(fwd(x, p2, False, True))
    assert y2.shape == (B, C, H - 4, W - 4)
    r2 = residual_block_ref(x, p2, False, True)
    err2 = float(jnp.max(jnp.abs(y2.astype(jnp.float32) - r2)))
    assert err2 < 0.1, f"config2 max abs err {err2}"

    print("KERNEL_OK")
</pallas_src>

<mosaic_0001>
module attributes {stable_mosaic.version = 11 : i64} {
  func.func @kernel(%arg0: i32, %arg1: i32, %arg2: i32, %arg3: memref<1x16x16x16xbf16, #tpu.memory_space<vmem>>, %arg4: memref<144x8xbf16, #tpu.memory_space<vmem>>, %arg5: memref<1x8xf32, #tpu.memory_space<vmem>>, %arg6: memref<1x14x14x8xbf16, #tpu.memory_space<vmem>>) attributes {dimension_semantics = [#tpu.dimension_semantics<parallel>, #tpu.dimension_semantics<parallel>, #tpu.dimension_semantics<parallel>], iteration_bounds = array<i64: 2, 1, 1>, scalar_prefetch = 0 : i64, scratch_operands = 0 : i64, tpu.core_type = #tpu.core_type<tc>, window_params = [{transform_indices = @transform_0, window_bounds = array<i64: 1, 16, 16, 16>}, {transform_indices = @transform_1, window_bounds = array<i64: 144, 8>}, {transform_indices = @transform_2, window_bounds = array<i64: 1, 8>}, {transform_indices = @transform_3, window_bounds = array<i64: 1, 14, 14, 8>}]} {
    %c14_i32 = arith.constant 14 : i32
    %0 = arith.muli %arg2, %c14_i32 : i32
    %c0 = arith.constant 0 : index
    %c0_0 = arith.constant 0 : index
    %1 = vector.load %arg4[%c0, %c0_0] : memref<144x8xbf16, #tpu.memory_space<vmem>>, vector<144x8xbf16>
    %c0_1 = arith.constant 0 : index
    %2 = arith.index_cast %0 : i32 to index
    %c0_2 = arith.constant 0 : index
    %c0_3 = arith.constant 0 : index
    %3 = vector.load %arg3[%c0_1, %2, %c0_2, %c0_3] : memref<1x16x16x16xbf16, #tpu.memory_space<vmem>>, vector<1x16x16x16xbf16>
    %4 = vector.shape_cast %3 : vector<1x16x16x16xbf16> to vector<16x16x16xbf16>
    %5 = vector.extract_strided_slice %4 {offsets = [0, 0, 0], sizes = [14, 14, 16], strides = [1, 1, 1]} : vector<16x16x16xbf16> to vector<14x14x16xbf16>
    %6 = vector.extract_strided_slice %4 {offsets = [0, 1, 0], sizes = [14, 14, 16], strides = [1, 1, 1]} : vector<16x16x16xbf16> to vector<14x14x16xbf16>
    %7 = vector.extract_strided_slice %4 {offsets = [0, 2, 0], sizes = [14, 14, 16], strides = [1, 1, 1]} : vector<16x16x16xbf16> to vector<14x14x16xbf16>
    %8 = vector.extract_strided_slice %4 {offsets = [1, 0, 0], sizes = [14, 14, 16], strides = [1, 1, 1]} : vector<16x16x16xbf16> to vector<14x14x16xbf16>
    %9 = vector.extract_strided_slice %4 {offsets = [1, 1, 0], sizes = [14, 14, 16], strides = [1, 1, 1]} : vector<16x16x16xbf16> to vector<14x14x16xbf16>
    %10 = vector.extract_strided_slice %4 {offsets = [1, 2, 0], sizes = [14, 14, 16], strides = [1, 1, 1]} : vector<16x16x16xbf16> to vector<14x14x16xbf16>
    %11 = vector.extract_strided_slice %4 {offsets = [2, 0, 0], sizes = [14, 14, 16], strides = [1, 1, 1]} : vector<16x16x16xbf16> to vector<14x14x16xbf16>
    %12 = vector.extract_strided_slice %4 {offsets = [2, 1, 0], sizes = [14, 14, 16], strides = [1, 1, 1]} : vector<16x16x16xbf16> to vector<14x14x16xbf16>
    %13 = vector.extract_strided_slice %4 {offsets = [2, 2, 0], sizes = [14, 14, 16], strides = [1, 1, 1]} : vector<16x16x16xbf16> to vector<14x14x16xbf16>
    %14 = tpu.concatenate %5, %6, %7, %8, %9, %10, %11, %12, %13 in 2 : vector<14x14x16xbf16>, vector<14x14x16xbf16>, vector<14x14x16xbf16>, vector<14x14x16xbf16>, vector<14x14x16xbf16>, vector<14x14x16xbf16>, vector<14x14x16xbf16>, vector<14x14x16xbf16>, vector<14x14x16xbf16> -> vector<14x14x144xbf16>
    %15 = vector.shape_cast %14 : vector<14x14x144xbf16> to vector<196x144xbf16>
    %cst = arith.constant dense<0.000000e+00> : vector<196x8xf32>
    %16 = tpu.matmul %15, %1, %cst {dimension_numbers = #tpu.dot_dimension_numbers<[1], [0], [0], [1], [0, 0, 1, 1], [], []>} : vector<196x144xbf16>, vector<144x8xbf16>, vector<196x8xf32> -> vector<196x8xf32>
    %c0_4 = arith.constant 0 : index
    %c0_5 = arith.constant 0 : index
    %17 = vector.load %arg5[%c0_4, %c0_5] : memref<1x8xf32, #tpu.memory_space<vmem>>, vector<1x8xf32>
    %18 = vector.broadcast %17 : vector<1x8xf32> to vector<196x8xf32>
    %19 = arith.addf %16, %18 : vector<196x8xf32>
    %cst_6 = arith.constant 1.000000e-01 : f32
    %20 = vector.broadcast %cst_6 : f32 to vector<196x8xf32>
    %21 = arith.mulf %20, %19 : vector<196x8xf32>
    %22 = arith.maximumf %19, %21 : vector<196x8xf32>
    %23 = vector.shape_cast %22 : vector<196x8xf32> to vector<1x14x14x8xf32>
    %24 = arith.truncf %23 : vector<1x14x14x8xf32> to vector<1x14x14x8xbf16>
    %c0_7 = arith.constant 0 : index
    %c0_8 = arith.constant 0 : index
    %c0_9 = arith.constant 0 : index
    %c0_10 = arith.constant 0 : index
    %25 = vector.load %arg6[%c0_7, %c0_8, %c0_9, %c0_10] : memref<1x14x14x8xbf16, #tpu.memory_space<vmem>>, vector<1x14x14x8xbf16>
    tpu.vector_store %arg6[%c0_7, %c0_8, %c0_9, %c0_10], %24 {strides = array<i32>} : memref<1x14x14x8xbf16, #tpu.memory_space<vmem>>, vector<1x14x14x8xbf16>,
    return
  }
  func.func @transform_0(%arg0: i32, %arg1: i32, %arg2: i32) -> (i32, i32, i32, i32) {
    %c0_i32 = arith.constant 0 : i32
    %c0_i32_0 = arith.constant 0 : i32
    %c0_i32_1 = arith.constant 0 : i32
    %c0_i32_2 = arith.constant 0 : i32
    return %arg0, %c0_i32, %c0_i32_0, %c0_i32_1 : i32, i32, i32, i32
  }
  func.func @transform_1(%arg0: i32, %arg1: i32, %arg2: i32) -> (i32, i32) {
    %c0_i32 = arith.constant 0 : i32
    %c0_i32_0 = arith.constant 0 : i32
    return %c0_i32, %arg1 : i32, i32
  }
  func.func @transform_2(%arg0: i32, %arg1: i32, %arg2: i32) -> (i32, i32) {
    %c0_i32 = arith.constant 0 : i32
    %c0_i32_0 = arith.constant 0 : i32
    return %c0_i32, %arg1 : i32, i32
  }
  func.func @transform_3(%arg0: i32, %arg1: i32, %arg2: i32) -> (i32, i32, i32, i32) {
    %c0_i32 = arith.constant 0 : i32
    %c0_i32_0 = arith.constant 0 : i32
    return %arg0, %arg2, %c0_i32, %arg1 : i32, i32, i32, i32
  }
}

module attributes {stable_mosaic.version = 11 : i64} {
  func.func @kernel(%arg0: i32, %arg1: i32, %arg2: i32, %arg3: memref<1x14x14x8xbf16, #tpu.memory_space<vmem>>, %arg4: memref<72x16xbf16, #tpu.memory_space<vmem>>, %arg5: memref<1x16xf32, #tpu.memory_space<vmem>>, %arg6: memref<1x14x14x16xbf16, #tpu.memory_space<vmem>>, %arg7: memref<16x16x8xbf16, #tpu.memory_space<vmem>>) attributes {dimension_semantics = [#tpu.dimension_semantics<parallel>, #tpu.dimension_semantics<parallel>, #tpu.dimension_semantics<arbitrary>], iteration_bounds = array<i64: 2, 1, 1>, scalar_prefetch = 0 : i64, scratch_operands = 1 : i64, tpu.core_type = #tpu.core_type<tc>, window_params = [{transform_indices = @transform_0, window_bounds = array<i64: 1, 14, 14, 8>}, {transform_indices = @transform_1, window_bounds = array<i64: 72, 16>}, {transform_indices = @transform_2, window_bounds = array<i64: 1, 16>}, {transform_indices = @transform_3, window_bounds = array<i64: 1, 14, 14, 16>}]} {
    %c14_i32 = arith.constant 14 : i32
    %0 = arith.muli %arg2, %c14_i32 : i32
    %c0 = arith.constant 0 : index
    %c0_0 = arith.constant 0 : index
    %1 = vector.load %arg4[%c0, %c0_0] : memref<72x16xbf16, #tpu.memory_space<vmem>>, vector<72x16xbf16>
    %c0_i32 = arith.constant 0 : i32
    %2 = arith.cmpi eq, %arg2, %c0_i32 : i32
    %3 = arith.extui %2 : i1 to i32
    %c0_i32_1 = arith.constant 0 : i32
    %4 = arith.cmpi ne, %3, %c0_i32_1 : i32
    scf.if %4 {
      %cst_11 = arith.constant 0.000000e+00 : bf16
      %28 = vector.broadcast %cst_11 : bf16 to vector<16x16x8xbf16>
      %c0_12 = arith.constant 0 : index
      %c0_13 = arith.constant 0 : index
      %c0_14 = arith.constant 0 : index
      %29 = vector.load %arg7[%c0_12, %c0_13, %c0_14] : memref<16x16x8xbf16, #tpu.memory_space<vmem>>, vector<16x16x8xbf16>
      tpu.vector_store %arg7[%c0_12, %c0_13, %c0_14], %28 {strides = array<i32>} : memref<16x16x8xbf16, #tpu.memory_space<vmem>>, vector<16x16x8xbf16>,
      %c0_15 = arith.constant 0 : index
      %c0_16 = arith.constant 0 : index
      %c0_17 = arith.constant 0 : index
      %c0_18 = arith.constant 0 : index
      %30 = vector.load %arg3[%c0_15, %c0_16, %c0_17, %c0_18] : memref<1x14x14x8xbf16, #tpu.memory_space<vmem>>, vector<1x14x14x8xbf16>
      %31 = vector.shape_cast %30 : vector<1x14x14x8xbf16> to vector<14x14x8xbf16>
      %c1 = arith.constant 1 : index
      %c1_19 = arith.constant 1 : index
      %c0_20 = arith.constant 0 : index
      %32 = vector.load %arg7[%c1, %c1_19, %c0_20] : memref<16x16x8xbf16, #tpu.memory_space<vmem>>, vector<14x14x8xbf16>
      tpu.vector_store %arg7[%c1, %c1_19, %c0_20], %31 {strides = array<i32>} : memref<16x16x8xbf16, #tpu.memory_space<vmem>>, vector<14x14x8xbf16>,
    } else {
    }
    %5 = arith.index_cast %0 : i32 to index
    %c0_2 = arith.constant 0 : index
    %c0_3 = arith.constant 0 : index
    %6 = vector.load %arg7[%5, %c0_2, %c0_3] : memref<16x16x8xbf16, #tpu.memory_space<vmem>>, vector<16x16x8xbf16>
    %7 = vector.extract_strided_slice %6 {offsets = [0, 0, 0], sizes = [14, 14, 8], strides = [1, 1, 1]} : vector<16x16x8xbf16> to vector<14x14x8xbf16>
    %8 = vector.extract_strided_slice %6 {offsets = [0, 1, 0], sizes = [14, 14, 8], strides = [1, 1, 1]} : vector<16x16x8xbf16> to vector<14x14x8xbf16>
    %9 = vector.extract_strided_slice %6 {offsets = [0, 2, 0], sizes = [14, 14, 8], strides = [1, 1, 1]} : vector<16x16x8xbf16> to vector<14x14x8xbf16>
    %10 = vector.extract_strided_slice %6 {offsets = [1, 0, 0], sizes = [14, 14, 8], strides = [1, 1, 1]} : vector<16x16x8xbf16> to vector<14x14x8xbf16>
    %11 = vector.extract_strided_slice %6 {offsets = [1, 1, 0], sizes = [14, 14, 8], strides = [1, 1, 1]} : vector<16x16x8xbf16> to vector<14x14x8xbf16>
    %12 = vector.extract_strided_slice %6 {offsets = [1, 2, 0], sizes = [14, 14, 8], strides = [1, 1, 1]} : vector<16x16x8xbf16> to vector<14x14x8xbf16>
    %13 = vector.extract_strided_slice %6 {offsets = [2, 0, 0], sizes = [14, 14, 8], strides = [1, 1, 1]} : vector<16x16x8xbf16> to vector<14x14x8xbf16>
    %14 = vector.extract_strided_slice %6 {offsets = [2, 1, 0], sizes = [14, 14, 8], strides = [1, 1, 1]} : vector<16x16x8xbf16> to vector<14x14x8xbf16>
    %15 = vector.extract_strided_slice %6 {offsets = [2, 2, 0], sizes = [14, 14, 8], strides = [1, 1, 1]} : vector<16x16x8xbf16> to vector<14x14x8xbf16>
    %16 = tpu.concatenate %7, %8, %9, %10, %11, %12, %13, %14, %15 in 2 : vector<14x14x8xbf16>, vector<14x14x8xbf16>, vector<14x14x8xbf16>, vector<14x14x8xbf16>, vector<14x14x8xbf16>, vector<14x14x8xbf16>, vector<14x14x8xbf16>, vector<14x14x8xbf16>, vector<14x14x8xbf16> -> vector<14x14x72xbf16>
    %17 = vector.shape_cast %16 : vector<14x14x72xbf16> to vector<196x72xbf16>
    %cst = arith.constant dense<0.000000e+00> : vector<196x16xf32>
    %18 = tpu.matmul %17, %1, %cst {dimension_numbers = #tpu.dot_dimension_numbers<[1], [0], [0], [1], [0, 0, 1, 1], [], []>} : vector<196x72xbf16>, vector<72x16xbf16>, vector<196x16xf32> -> vector<196x16xf32>
    %c0_4 = arith.constant 0 : index
    %c0_5 = arith.constant 0 : index
    %19 = vector.load %arg5[%c0_4, %c0_5] : memref<1x16xf32, #tpu.memory_space<vmem>>, vector<1x16xf32>
    %20 = vector.broadcast %19 : vector<1x16xf32> to vector<196x16xf32>
    %21 = arith.addf %18, %20 : vector<196x16xf32>
    %cst_6 = arith.constant 1.000000e-01 : f32
    %22 = vector.broadcast %cst_6 : f32 to vector<196x16xf32>
    %23 = arith.mulf %22, %21 : vector<196x16xf32>
    %24 = arith.maximumf %21, %23 : vector<196x16xf32>
    %25 = vector.shape_cast %24 : vector<196x16xf32> to vector<1x14x14x16xf32>
    %26 = arith.truncf %25 : vector<1x14x14x16xf32> to vector<1x14x14x16xbf16>
    %c0_7 = arith.constant 0 : index
    %c0_8 = arith.constant 0 : index
    %c0_9 = arith.constant 0 : index
    %c0_10 = arith.constant 0 : index
    %27 = vector.load %arg6[%c0_7, %c0_8, %c0_9, %c0_10] : memref<1x14x14x16xbf16, #tpu.memory_space<vmem>>, vector<1x14x14x16xbf16>
    tpu.vector_store %arg6[%c0_7, %c0_8, %c0_9, %c0_10], %26 {strides = array<i32>} : memref<1x14x14x16xbf16, #tpu.memory_space<vmem>>, vector<1x14x14x16xbf16>,
    return
  }
  func.func @transform_0(%arg0: i32, %arg1: i32, %arg2: i32) -> (i32, i32, i32, i32) {
    %c0_i32 = arith.constant 0 : i32
    %c0_i32_0 = arith.constant 0 : i32
    %c0_i32_1 = arith.constant 0 : i32
    %c0_i32_2 = arith.constant 0 : i32
    return %arg0, %c0_i32, %c0_i32_0, %c0_i32_1 : i32, i32, i32, i32
  }
  func.func @transform_1(%arg0: i32, %arg1: i32, %arg2: i32) -> (i32, i32) {
    %c0_i32 = arith.constant 0 : i32
    %c0_i32_0 = arith.constant 0 : i32
    return %c0_i32, %arg1 : i32, i32
  }
  func.func @transform_2(%arg0: i32, %arg1: i32, %arg2: i32) -> (i32, i32) {
    %c0_i32 = arith.constant 0 : i32
    %c0_i32_0 = arith.constant 0 : i32
    return %c0_i32, %arg1 : i32, i32
  }
  func.func @transform_3(%arg0: i32, %arg1: i32, %arg2: i32) -> (i32, i32, i32, i32) {
    %c0_i32 = arith.constant 0 : i32
    %c0_i32_0 = arith.constant 0 : i32
    return %arg0, %arg2, %c0_i32, %arg1 : i32, i32, i32, i32
  }
}

</mosaic_0001>

<bundles_post_ra>
// kernel: residual_block_forward.2
= control target key start
LH: loop header
LB: loop body
LE: loop exit
PB: predicated region body
PF: predicated region fallthrough
CT: control target
= control target key end

     0   :  { %s4170_s12 = smov 0   ;;  %s4172_s13 = smov 0   ;;  %s5182_s0 = inlined_call_operand.vmem [shape: bf16[2,16,16,16], index: 0, kind: input, shape index: {}]   ;;  %s5183_s1 = inlined_call_operand.vmem [shape: bf16[144,8], index: 1, kind: input, shape index: {}]   ;;  %s5184_s2 = inlined_call_operand.vmem [shape: f32[1,8], index: 2, kind: input, shape index: {}]   ;;  %s5185_s3 = inlined_call_operand.vmem [shape: bf16[2,14,14,8], index: 3, kind: output, shape index: {}]  }
   0x1   :  { %s4174_s14 = smov 0  }
   0x2 LB: > { %s32_s15 = sadd.s32 1, %s4134_s13  ;;  %p3926_p0 = scmp.ge.s32.totalorder %s4138_s14, 1  ;;  %s4138_s14 = sphi %s4174_s14, %s13_s14   ;;  %s4134_s13 = sphi %s4172_s13, %s5187_s13   ;;  %s4130_s12 = sphi %s4170_s12, %s5186_s12  }
   0x3   : > { %p34_p1 = scmp.ge.s32.totalorder %s32_s15, 2  ;;  %p177_p2 = scmp.lt.s32.totalorder %s4138_s14, 3 }
   0x5   : > { %s5189_s15 = smov (%p34_p1, %s32_s15), 0  ;;  %p178_p3 = pnand %p3926_p0, %p177_p2 }
   0x6   : > { %p216_p4 = scmp.lt.s32.totalorder (!%p178_p3), %s4130_s12, 1  ;;  %s4140_s20 = smov (!%p178_p3), 48   ;;  %v4141_v5 = vmov (!%p178_p3), 0   ;;  %v4100_v19 = vld [vmem:[%s5183_s1] sm:$0xff] (!%p178_p3)   ;;  %v4102_v20 = vld [vmem:[%s5183_s1 + $0x8] sm:$0xff] (!%p178_p3)   ;;  %v4103_v24 = vld [vmem:[%s5183_s1 + $0x10] sm:$0xff] (!%p178_p3)  }
   0x7   : > { %181 = sbr.rel (%p178_p3) target bundleno = 584 (0x248), region = 32  ;;  %2532 = vmatprep.subr.bf16.mxu0 (!%p178_p3), %v4141_v5  ;;  %4035 = vmatprep.subr.bf16.mxu1 (!%p178_p3), %v4141_v5  ;;  %s4142_s21 = smov (!%p178_p3), 32   ;;  %v4105_v27 = vld [vmem:[%s5183_s1 + $0x18] sm:$0xff] (!%p178_p3)   ;;  %v4106_v30 = vld [vmem:[%s5183_s1 + $0x20] sm:$0xff] (!%p178_p3)   ;;  %v4107_v35 = vld [vmem:[%s5183_s1 + $0x28] sm:$0xff] (!%p178_p3)   ;;  %vm701_vm0 = vcmask (!%p178_p3), 130048  }
   0x8   : > { %s4143_s22 = smov (!%p178_p3), 80   ;;  %s4144_s23 = smov (!%p178_p3), 16   ;;  %2533 = vmatpush1.bf16.msra.mxu0 (!%p178_p3), %v4100_v19  ;;  %4044 = vmatpush1.bf16.msra.mxu1 (!%p178_p3), %v4100_v19  ;;  %v4108_v39 = vld [vmem:[%s5183_s1 + $0x30] sm:$0xff] (!%p178_p3)   ;;  %v4110_v44 = vld [vmem:[%s5183_s1 + $0x38] sm:$0xff] (!%p178_p3)   ;;  %v4111_v50 = vld [vmem:[%s5183_s1 + $0x40] sm:$0xff] (!%p178_p3)   ;;  %vm730_vm1 = vcmask (!%p178_p3), 261120  }
   0x9   : > { %s4145_s24 = smov (!%p178_p3), 64   ;;  %s4146_s27 = smov (!%p178_p3), 96   ;;  %2534 = vmatprep.subr.bf16.mxu0 (!%p178_p3), %v4141_v5  ;;  %4036 = vmatprep.subr.bf16.mxu1 (!%p178_p3), %v4141_v5  ;;  %vm759_vm2 = vcmask (!%p178_p3), 392192   ;;  %vm788_vm3 = vcmask (!%p178_p3), 523264   ;;  %vm817_vm4 = vcmask (!%p178_p3), 654336   ;;  %vm846_vm5 = vcmask (!%p178_p3), 785408  }
   0xa   : > { %s4147_s30 = smov (!%p178_p3), 112   ;;  %vm875_vm6 = vcmask (!%p178_p3), 916480   ;;  %vm3761_vm7 = vcmask (!%p178_p3), 60416   ;;  %vm3763_vm8 = vcmask (!%p178_p3), 59392  }
   0xc   : > { %2535 = vmatpush1.bf16.msra.mxu0 (!%p178_p3), %v4102_v20  ;;  %4045 = vmatpush1.bf16.msra.mxu1 (!%p178_p3), %v4102_v20 }
   0xd   : > { %2536 = vmatprep.subr.bf16.mxu0 (!%p178_p3), %v4141_v5  ;;  %4037 = vmatprep.subr.bf16.mxu1 (!%p178_p3), %v4141_v5 }
   0xe   : > { %s5191_s12 = smov (!%p216_p4, %s4130_s12), 1 }
   0xf   : > { %s4006_s16 = sshll.u32 %s5191_s12, 7 }
  0x10   : > { %s4194_s19 = scalar_lea.vmem %s5182_s0, %s4006_s16  ;;  %2537 = vmatpush1.bf16.msra.mxu0 %v4103_v24  ;;  %4046 = vmatpush1.bf16.msra.mxu1 %v4103_v24 }
  0x11   : > { %v4197_v0 = vld [vmem:[%s4194_s19 + $0x8] sm:$0xff]   ;;  %v4200_v1 = vld [vmem:[%s4194_s19] sm:$0xff]   ;;  %v4214_v10 = vld [vmem:[%s4194_s19 + $0x10] sm:$0xff]   ;;  %2538 = vmatprep.subr.bf16.mxu0 %v4141_v5  ;;  %4038 = vmatprep.subr.bf16.mxu1 %v4141_v5 }
  0x12   : > { %540 = vrot.lane.b32.xlu1 %v4197_v0, %s4140_s20  ;;  %v494_v2 = vrot.slane %v4197_v0, 1  ;;  %v375_v3 = vshrl.u32 %v4197_v0, 16  ;;  %v377_v4 = vshll.u32 %v4197_v0, 16  ;;  %v493_v6 = vrot.slane %v4200_v1, 1  ;;  %v4226_v18 = vld [vmem:[%s4194_s19 + $0x18] sm:$0xff]   ;;  %v4253_v26 = vld [vmem:[%s4194_s19 + $0x40] sm:$0xff]  }
  0x13   : > { %v370_v8 = vshll.u32 %v4200_v1, 16  ;;  %v368_v11 = vshrl.u32 %v4200_v1, 16  ;;  %v384_v13 = vshll.u32 %v4214_v10, 16  ;;  %v382_v15 = vshrl.u32 %v4214_v10, 16  ;;  %v4274_v33 = vld [vmem:[%s4194_s19 + $0x48] sm:$0xff]   ;;  %v4293_v38 = vld [vmem:[%s4194_s19 + $0x20] sm:$0xff]  }
  0x14   : > { %v379_v7 = vrot.slane %v377_v4, 1  ;;  %507 = vrot.lane.b32.xlu0 %v493_v6, %s4142_s21  ;;  %v4240_v21 = vrot.slane %v4214_v10, 1  ;;  %v391_v22 = vshll.u32 %v4226_v18, 16  ;;  %v389_v23 = vshrl.u32 %v4226_v18, 16  ;;  %2539 = vmatpush1.bf16.msra.mxu0 %v4105_v27  ;;  %v4325_v49 = vld [vmem:[%s4194_s19 + $0x50] sm:$0xff]   ;;  %v4358_v57 = vld [vmem:[%s4194_s19 + $0x58] sm:$0xff]  }
  0x15   : > { %v372_v12 = vrot.slane %v370_v8, 1  ;;  %v386_v16 = vrot.slane %v384_v13, 1  ;;  %v426_v29 = vshll.u32 %v4253_v26, 16  ;;  %4047 = vmatpush1.bf16.msra.mxu1 %v4105_v27  ;;  %2540 = vmatprep.subr.bf16.mxu0 %v4141_v5  ;;  %v424_v31 = vshrl.u32 %v4253_v26, 16  ;;  %v4371_v62 = vld [vmem:[%s4194_s19 + $0x28] sm:$0xff]   ;;  %v4099_v13 = vld [vmem:[%s4194_s19 + $0x30] sm:$0xff]  }
  0x16   : > { %604 = vrot.lane.b32.xlu1 %v494_v2, %s4143_s22  ;;  %v380_v9 = vor.u32 %v379_v7, %v375_v3  ;;  %v393_v25 = vrot.slane %v391_v22, 1  ;;  %4039 = vmatprep.subr.bf16.mxu1 %v4141_v5  ;;  %v4278_v34 = vrot.slane %v4226_v18, 1  ;;  %v433_v37 = vshll.u32 %v4274_v33, 16  ;;  %v4425_v22 = vld [vmem:[%s4194_s19 + $0x68] sm:$0xff]  }
  0x17   : > { %v373_v14 = vor.u32 %v372_v12, %v368_v11  ;;  %v387_v17 = vor.u32 %v386_v16, %v382_v15  ;;  %v428_v32 = vrot.slane %v426_v29, 1  ;;  %v4303_v40 = vrot.slane %v4253_v26, 1 }
  0x18   : > { %509 = vrot.lane.b32.xlu0 %v494_v2, %s4142_s21  ;;  %v394_v28 = vor.u32 %v393_v25, %v389_v23  ;;  %2541 = vmatpush1.bf16.msra.mxu0 %v4106_v30  ;;  %v431_v41 = vshrl.u32 %v4274_v33, 16  ;;  %v435_v42 = vrot.slane %v433_v37, 1  ;;  %v398_v43 = vshll.u32 %v4293_v38, 16 }
  0x19   : > { %4048 = vmatpush1.bf16.msra.mxu1 %v4106_v30  ;;  %2542 = vmatprep.subr.bf16.mxu0 %v4141_v5  ;;  %v4287_v36 = vor.u32 %v428_v32, %v424_v31  ;;  %v396_v46 = vshrl.u32 %v4293_v38, 16  ;;  %v4322_v48 = vrot.slane %v4274_v33, 1  ;;  %v440_v52 = vshll.u32 %v4325_v49, 16 }
  0x1a   : > { %467 = vrot.lane.b32.xlu1 %v380_v9, %s4144_s23  ;;  %4040 = vmatprep.subr.bf16.mxu1 %v4141_v5  ;;  %v4316_v45 = vor.u32 %v435_v42, %v431_v41  ;;  %v400_v47 = vrot.slane %v398_v43, 1  ;;  %v438_v53 = vshrl.u32 %v4325_v49, 16  ;;  %v4354_v56 = vrot.slane %v4325_v49, 1  ;;  %v4442_v42 = vld [vmem:[%s4194_s19 + $0x38] sm:$0xff]  }
  0x1b   : > { %v442_v54 = vrot.slane %v440_v52, 1  ;;  %v447_v58 = vshll.u32 %v4358_v57, 16  ;;  %v4366_v59 = vrot.slane %v4293_v38, 1  ;;  %v445_v60 = vshrl.u32 %v4358_v57, 16 }
  0x1c   : > { %542 = vrot.lane.b32.xlu0 %v4214_v10, %s4140_s20  ;;  %2543 = vmatpush1.bf16.msra.mxu0 %v4107_v35  ;;  %v401_v51 = vor.u32 %v400_v47, %v396_v46  ;;  %v405_v2 = vshll.u32 %v4371_v62, 16  ;;  %v403_v3 = vshrl.u32 %v4371_v62, 16  ;;  %v4390_v7 = vrot.slane %v4358_v57, 1 }
  0x1d   : > { %4049 = vmatpush1.bf16.msra.mxu1 %v4107_v35  ;;  %2544 = vmatprep.subr.bf16.mxu0 %v4141_v5  ;;  %v443_v55 = vor.u32 %v442_v54, %v438_v53  ;;  %v449_v61 = vrot.slane %v447_v58, 1  ;;  %v4412_v15 = vrot.slane %v4371_v62, 1  ;;  %v410_v16 = vshrl.u32 %v4099_v13, 16 }
  0x1e   : > { %575 = vrot.lane.b32.xlu1 %v380_v9, %s4145_s24  ;;  %4041 = vmatprep.subr.bf16.mxu1 %v4141_v5  ;;  %v407_v4 = vrot.slane %v405_v2, 1  ;;  %v461_v27 = vshll.u32 %v4425_v22, 16  ;;  %v459_v30 = vshrl.u32 %v4425_v22, 16  ;;  %v923_v37 = vlaneseq }
  0x1f   : > { %v450_v63 = vor.u32 %v449_v61, %v445_v60  ;;  %v4455_v53 = vrot.slane %v4099_v13, 1  ;;  %v419_v54 = vshll.u32 %v4442_v42, 16 }
  0x20   : > { %465 = vrot.lane.b32.xlu0 %v373_v14, %s4144_s23  ;;  %2545 = vmatpush1.bf16.msra.mxu0 %v4108_v39  ;;  %v408_v6 = vor.u32 %v407_v4, %v403_v3  ;;  %v412_v14 = vshll.u32 %v4099_v13, 16  ;;  %v463_v31 = vrot.slane %v461_v27, 1  ;;  %v417_v3 = vshrl.u32 %v4442_v42, 16 }
  0x21   : > { %4050 = vmatpush1.bf16.msra.mxu1 %v4108_v39  ;;  %2546 = vmatprep.subr.bf16.mxu0 %v4141_v5  ;;  %v4148_v39 = vmov 1966171168   ;;  %v421_v4 = vrot.slane %v419_v54, 1  ;;  %v4508_v54 = vld [vmem:[%s4194_s19 + $0x70] sm:$0xff]  }
  0x22   : > { %637 = vrot.lane.b32.xlu1 %v4214_v10, %s4146_s27  ;;  %4042 = vmatprep.subr.bf16.mxu1 %v4141_v5  ;;  %v921_v41 = vunpack.c.l.s4 %v4148_v39  ;;  %v4446_v43 = vor.u32 %v463_v31, %v459_v30  ;;  %v4495_v31 = vrot.slane %v4425_v22, 1 }
  0x24   : > { %577 = vrot.lane.b32.xlu0 %v387_v17, %s4145_s24  ;;  %2547 = vmatpush1.bf16.msra.mxu0 %v4110_v44  ;;  %v922_v52 = vunpack.c.0.s8 %v921_v41 }
  0x25   : > { %4051 = vmatpush1.bf16.msra.mxu1 %v4110_v44  ;;  %2548 = vmatprep.subr.bf16.mxu0 %v4141_v5 }
  0x26   : > { %672 = vrot.lane.b32.xlu1 %v387_v17, %s4147_s30  ;;  %4043 = vmatprep.subr.bf16.mxu1 %v4141_v5  ;;  %v4384_v5 = vld [vmem:[%s4194_s19 + $0x60] sm:$0xff]  }
  0x27   : > { %v454_v8 = vshll.u32 %v4384_v5, 16  ;;  %v452_v9 = vshrl.u32 %v4384_v5, 16  ;;  %v4432_v25 = vrot.slane %v4384_v5, 1 }
  0x28   : > { %606 = vrot.lane.b32.xlu0 %v4240_v21, %s4143_s22  ;;  %2549 = vmatpush1.bf16.msra.mxu0 %v4111_v50 }
  0x29   : > { %4052 = vmatpush1.bf16.msra.mxu1 %v4111_v50  ;;  %v456_v11 = vrot.slane %v454_v8, 1  ;;  %v4450_v50 = vshrl.u32 %v923_v37, 7 }
  0x2a   : > { %469 = vrot.lane.b32.xlu1 %v387_v17, %s4144_s23  ;;  %v414_v17 = vrot.slane %v412_v14, 1 }
  0x2b   : > { %v4400_v12 = vor.u32 %v456_v11, %v452_v9  ;;  %v4465_v2 = vsub.s32 %v922_v52, %v4450_v50 }
  0x2c   : > { %639 = vrot.lane.b32.xlu0 %v4226_v18, %s4146_s27  ;;  %v4419_v19 = vor.u32 %v414_v17, %v410_v16 }
  0x2e   : > { %511 = vrot.lane.b32.xlu1 %v4240_v21, %s4142_s21 }
  0x30   : > { %674 = vrot.lane.b32.xlu0 %v394_v28, %s4147_s30 }
  0x32   : > { %579 = vrot.lane.b32.xlu1 %v394_v28, %s4145_s24 }
  0x34   : > { %544 = vrot.lane.b32.xlu0 %v4226_v18, %s4140_s20 }
  0x36   : > { %608 = vrot.lane.b32.xlu1 %v4278_v34, %s4143_s22 }
  0x38   : > { %481 = vrot.lane.b32.xlu0 %v4287_v36, %s4144_s23 }
  0x3a   : > { %641 = vrot.lane.b32.xlu1 %v4293_v38, %s4146_s27 }
  0x3c   : > { %523 = vrot.lane.b32.xlu0 %v4303_v40, %s4142_s21 }
  0x3e   : > { %556 = vrot.lane.b32.xlu1 %v4274_v33, %s4140_s20 }
  0x40   : > { %483 = vrot.lane.b32.xlu0 %v4316_v45, %s4144_s23 }
  0x42   : > { %525 = vrot.lane.b32.xlu1 %v4322_v48, %s4142_s21 }
  0x44   : > { %676 = vrot.lane.b32.xlu0 %v401_v51, %s4147_s30 }
  0x46   : > { %471 = vrot.lane.b32.xlu1 %v394_v28, %s4144_s23 }
  0x48   : > { %591 = vrot.lane.b32.xlu0 %v4316_v45, %s4145_s24 }
  0x4a   : > { %620 = vrot.lane.b32.xlu1 %v4322_v48, %s4143_s22 }
  0x4c   : > { %558 = vrot.lane.b32.xlu0 %v4325_v49, %s4140_s20 }
  0x4e   : > { %593 = vrot.lane.b32.xlu1 %v443_v55, %s4145_s24 }
  0x50   : > { %513 = vrot.lane.b32.xlu0 %v4278_v34, %s4142_s21 }
  0x52   : > { %546 = vrot.lane.b32.xlu1 %v4293_v38, %s4140_s20 }
  0x54   : > { %653 = vrot.lane.b32.xlu0 %v4325_v49, %s4146_s27 }
  0x56   : > { %688 = vrot.lane.b32.xlu1 %v443_v55, %s4147_s30 }
  0x58   : > { %622 = vrot.lane.b32.xlu0 %v4354_v56, %s4143_s22 }
  0x5a   : > { %655 = vrot.lane.b32.xlu1 %v4358_v57, %s4146_s27 }
  0x5c   : > { %581 = vrot.lane.b32.xlu0 %v401_v51, %s4145_s24 }
  0x5e   : > { %610 = vrot.lane.b32.xlu1 %v4366_v59, %s4143_s22 }
  0x60   : > { %485 = vrot.lane.b32.xlu0 %v443_v55, %s4144_s23 }
  0x62   : > { %527 = vrot.lane.b32.xlu1 %v4354_v56, %s4142_s21 }
  0x64   : > { %690 = vrot.lane.b32.xlu0 %v450_v63, %s4147_s30 }
  0x66   : > { %560 = vrot.lane.b32.xlu1 %v4358_v57, %s4140_s20 }
  0x68   : > { %643 = vrot.lane.b32.xlu0 %v4371_v62, %s4146_s27 }
  0x6a   : > { %595 = vrot.lane.b32.xlu1 %v450_v63, %s4145_s24 }
  0x6c   : > { %678 = vrot.lane.b32.xlu0 %v408_v6, %s4147_s30 }
  0x6e   : > { %624 = vrot.lane.b32.xlu1 %v4390_v7, %s4143_s22 }
  0x70   : > { %473 = vrot.lane.b32.xlu0 %v401_v51, %s4144_s23 }
  0x72   : > { %657 = vrot.lane.b32.xlu1 %v4384_v5, %s4146_s27 }
  0x74   : > { %515 = vrot.lane.b32.xlu0 %v4366_v59, %s4142_s21 }
  0x76   : > { %692 = vrot.lane.b32.xlu1 %v4400_v12, %s4147_s30 }
  0x78   : > { %548 = vrot.lane.b32.xlu0 %v4371_v62, %s4140_s20 }
  0x7a   : > { %487 = vrot.lane.b32.xlu1 %v450_v63, %s4144_s23 }
  0x7c   : > { %583 = vrot.lane.b32.xlu0 %v408_v6, %s4145_s24 }
  0x7e   : > { %529 = vrot.lane.b32.xlu1 %v4390_v7, %s4142_s21 }
  0x80   : > { %612 = vrot.lane.b32.xlu0 %v4412_v15, %s4143_s22 }
  0x82   : > { %475 = vrot.lane.b32.xlu1 %v408_v6, %s4144_s23 }
  0x84   : > { %v541_v20 = vpop.permute.xlu1 %540  ;;  %645 = vrot.lane.b32.xlu0 %v4099_v13, %s4146_s27 }
  0x86   : > { %680 = vrot.lane.b32.xlu1 %v4419_v19, %s4147_s30  ;;  %v508_v23 = vpop.permute.xlu0 %507 }
  0x88   : > { %v605_v24 = vpop.permute.xlu1 %604  ;;  %562 = vrot.lane.b32.xlu0 %v4384_v5, %s4140_s20 }
  0x8a   : > { %597 = vrot.lane.b32.xlu1 %v4400_v12, %s4145_s24  ;;  %v510_v28 = vpop.permute.xlu0 %509 }
  0x8c   : > { %v468_v29 = vpop.permute.xlu1 %467  ;;  %517 = vrot.lane.b32.xlu0 %v4412_v15, %s4142_s21 }
  0x8d   : > { %v705_v6 = vsel %vm701_vm0, %v4197_v0, %v468_v29 }
  0x8e   : > { %626 = vrot.lane.b32.xlu1 %v4432_v25, %s4143_s22  ;;  %v543_v32 = vpop.permute.xlu0 %542  ;;  %v734_v16 = vsel %vm730_vm1, %v705_v6, %v510_v28 }
  0x90   : > { %v576_v35 = vpop.permute.xlu1 %575  ;;  %550 = vrot.lane.b32.xlu0 %v4099_v13, %s4140_s20 }
  0x92   : > { %659 = vrot.lane.b32.xlu1 %v4425_v22, %s4146_s27  ;;  %v466_v44 = vpop.permute.xlu0 %465 }
  0x93   : > { %v703_v46 = vsel %vm701_vm0, %v4200_v1, %v466_v44 }
  0x94   : > { %v638_v47 = vpop.permute.xlu1 %637  ;;  %v732_v51 = vsel %vm730_vm1, %v703_v46, %v508_v23  ;;  %585 = vrot.lane.b32.xlu0 %v4419_v19, %s4145_s24 }
  0x95   : > { %v761_v55 = vsel %vm759_vm2, %v732_v51, %v541_v20  ;;  %v4481_v20 = vor.u32 %v421_v4, %v417_v3 }
  0x96   : > { %694 = vrot.lane.b32.xlu1 %v4446_v43, %s4147_s30  ;;  %v790_v1 = vsel %vm788_vm3, %v761_v55, %v576_v35  ;;  %v578_v58 = vpop.permute.xlu0 %577 }
  0x97   : > { %v819_v60 = vsel %vm817_vm4, %v790_v1, %v605_v24 }
  0x98   : > { %v673_v61 = vpop.permute.xlu1 %672  ;;  %v848_v63 = vsel %vm846_vm5, %v819_v60, %v638_v47  ;;  %614 = vrot.lane.b32.xlu0 %v4455_v53, %s4143_s22 }
  0x99   : > { %v877_v8 = vsel %vm875_vm6, %v848_v63, %v673_v61 }
  0x9a   : > { %489 = vrot.lane.b32.xlu1 %v4400_v12, %s4144_s23  ;;  %v918_v9 = vcombine.low %v877_v8, %v4240_v21  ;;  %v919_v11 = vcombine.high %v877_v8, %v4240_v21  ;;  %v607_v13 = vpop.permute.xlu0 %606  ;;  %v763_v21 = vsel %vm759_vm2, %v734_v16, %v543_v32 }
  0x9b   : > { %v792_v27 = vsel %vm788_vm3, %v763_v21, %v578_v58 }
  0x9c   : > { %v470_v14 = vpop.permute.xlu1 %469  ;;  %v926_v17 = vrot.slane %v918_v9, %v4465_v2  ;;  %647 = vrot.lane.b32.xlu0 %v4442_v42, %s4146_s27  ;;  %v933_v0 = vrot.slane %v919_v11, %v4465_v2  ;;  %v821_v30 = vsel %vm817_vm4, %v792_v27, %v607_v13 }
  0x9d   : > { %v707_v8 = vsel %vm701_vm0, %v4214_v10, %v470_v14 }
  0x9e   : > { %531 = vrot.lane.b32.xlu1 %v4432_v25, %s4142_s21  ;;  %v934_v12 = vcombine.high %v926_v17, %v926_v17  ;;  %v640_v23 = vpop.permute.xlu0 %639  ;;  %v935_v29 = vcombine.high %v933_v0, %v933_v0  ;;  %v942_v32 = vrot.slane %v926_v17, %v4465_v2  ;;  %v949_v51 = vrot.slane %v933_v0, %v4465_v2 }
  0x9f   : > { %v850_v35 = vsel %vm846_vm5, %v821_v30, %v640_v23 }
  0xa0   : > { %v512_v24 = vpop.permute.xlu1 %511  ;;  %v956_v28 = vrot.slane %v934_v12, %v4465_v2  ;;  %682 = vrot.lane.b32.xlu0 %v4481_v20, %s4147_s30  ;;  %v963_v52 = vrot.slane %v935_v29, %v4465_v2  ;;  %v965_v3 = vcombine.high %v949_v51, %v949_v51 }
  0xa1   : > { %v736_v10 = vsel %vm730_vm1, %v707_v8, %v512_v24 }
  0xa2   : > { %599 = vrot.lane.b32.xlu1 %v4446_v43, %s4145_s24  ;;  %v675_v37 = vpop.permute.xlu0 %674  ;;  %v1611_v44 = vcombine.low %v942_v32, %v956_v28  ;;  %v3947_v46 = vcombine.high %v942_v32, %v956_v28  ;;  %v1613_v4 = vcombine.low %v949_v51, %v963_v52 }
  0xa3   : > { %v879_v39 = vsel %vm875_vm6, %v850_v35, %v675_v37 }
  0xa4   : > { %v580_v41 = vpop.permute.xlu1 %579  ;;  %v967_v47 = vcombine.low %v879_v39, %v4278_v34  ;;  %564 = vrot.lane.b32.xlu0 %v4425_v22, %s4140_s20  ;;  %v571_v22 = vshll.u32 %v4508_v54, 16  ;;  %v1621_v61 = vrot.slane %v1611_v44, %v4465_v2  ;;  %v1628_v63 = vrot.slane %v3947_v46, %v4465_v2 }
  0xa5   : > { %v1635_v0 = vrot.slane %v1613_v4, %v4465_v2  ;;  %v968_v14 = vcombine.high %v879_v39, %v4278_v34 }
  0xa6   : > { %628 = vrot.lane.b32.xlu1 %v4495_v31, %s4143_s22  ;;  %v975_v55 = vrot.slane %v967_v47, %v4465_v2  ;;  %v545_v1 = vpop.permute.xlu0 %544  ;;  %v573_v13 = vrot.slane %v571_v22, 1  ;;  %v1644_v16 = vcombine.high %v1621_v61, %v1628_v63  ;;  %v1643_v23 = vcombine.low %v1621_v61, %v1628_v63 }
  0xa7   : > { %v765_v27 = vsel %vm759_vm2, %v736_v10, %v545_v1  ;;  %v982_v44 = vrot.slane %v968_v14, %v4465_v2 }
  0xa8   : > { %v609_v58 = vpop.permute.xlu1 %608  ;;  %v4512_v60 = vrot.slane %v975_v55, %v4465_v2  ;;  %477 = vrot.lane.b32.xlu0 %v4419_v19, %s4144_s23  ;;  %v569_v19 = vshrl.u32 %v4508_v54, 16  ;;  %v983_v17 = vcombine.high %v975_v55, %v975_v55  ;;  %v1660_v35 = vrot.slane %v1644_v16, %v4465_v2 }
  0xa9   : > { %v1653_v24 = vrot.slane %v1643_v23, %v4465_v2  ;;  %v794_v46 = vsel %vm788_vm3, %v765_v27, %v580_v41  ;;  %v984_v22 = vcombine.high %v982_v44, %v982_v44  ;;  %v998_v41 = vrot.slane %v982_v44, %v4465_v2 }
  0xaa   : > { %661 = vrot.lane.b32.xlu1 %v4508_v54, %s4146_s27  ;;  %v4521_v6 = vpop.permute.xlu0 %481  ;;  %v1614_v9 = vcombine.low %v965_v3, %v4512_v60  ;;  %v574_v32 = vor.u32 %v573_v13, %v569_v19  ;;  %v1005_v37 = vrot.slane %v983_v17, %v4465_v2  ;;  %v823_v1 = vsel %vm817_vm4, %v794_v46, %v609_v58  ;;  %v4576_v19 = vld [vmem:[%s4194_s19 + $0x78] sm:$0xff]  }
  0xab   : > { %v1013_v3 = vcombine.high %v4512_v60, %v4512_v60  ;;  %v1012_v60 = vrot.slane %v984_v22, %v4465_v2  ;;  %v1014_v13 = vcombine.high %v998_v41, %v998_v41  ;;  %v668_v10 = vshll.u32 %v4576_v19, 16 }
  0xac   : > { %v642_v11 = vpop.permute.xlu1 %641  ;;  %519 = vrot.lane.b32.xlu0 %v4455_v53, %s4142_s21  ;;  %v1642_v12 = vrot.slane %v1614_v9, %v4465_v2  ;;  %v1015_v55 = vcombine.high %v1005_v37, %v1005_v37  ;;  %v4572_v9 = vrot.slane %v4442_v42, 1  ;;  %v719_v27 = vsel %vm701_vm0, %v4253_v26, %v4521_v6 }
  0xad   : > { %v852_v61 = vsel %vm846_vm5, %v823_v1, %v642_v11  ;;  %v1679_v14 = vcombine.low %v1012_v60, %v1014_v13  ;;  %v4602_v6 = vrot.slane %v4508_v54, 1 }
  0xae   : > { %552 = vrot.lane.b32.xlu1 %v4442_v42, %s4140_s20  ;;  %v524_v21 = vpop.permute.xlu0 %523  ;;  %v1646_v29 = vcombine.high %v1635_v0, %v1642_v12  ;;  %v1645_v30 = vcombine.low %v1635_v0, %v1642_v12  ;;  %v1678_v11 = vcombine.low %v1015_v55, %v998_v41  ;;  %v1677_v0 = vcombine.low %v1005_v37, %v1013_v3 }
  0xaf   : > { %v748_v37 = vsel %vm730_vm1, %v719_v27, %v524_v21  ;;  %v1701_v46 = vrot.slane %v1679_v14, %v4465_v2 }
  0xb0   : > { %v4536_v28 = vpop.permute.xlu1 %556  ;;  %491 = vrot.lane.b32.xlu0 %v4446_v43, %s4144_s23  ;;  %v1674_v34 = vrot.slane %v1646_v29, %v4465_v2  ;;  %v1667_v39 = vrot.slane %v1645_v30, %v4465_v2  ;;  %v1694_v42 = vrot.slane %v1678_v11, %v4465_v2 }
  0xb1   : > { %v777_v21 = vsel %vm759_vm2, %v748_v37, %v4536_v28 }
  0xb2   : > { %533 = vrot.lane.b32.xlu1 %v4495_v31, %s4142_s21  ;;  %v4549_v47 = vpop.permute.xlu0 %483  ;;  %v1676_v51 = vcombine.low %v1660_v35, %v1674_v34  ;;  %v1675_v52 = vcombine.low %v1653_v24, %v1667_v39  ;;  %v1687_v35 = vrot.slane %v1677_v0, %v4465_v2  ;;  %v666_v24 = vshrl.u32 %v4576_v19, 16 }
  0xb3   : > { %v670_v39 = vrot.slane %v668_v10, 1  ;;  %v721_v10 = vsel %vm701_vm0, %v4274_v33, %v4549_v47 }
  0xb4   : > { %v4551_v43 = vpop.permute.xlu1 %525  ;;  %696 = vrot.lane.b32.xlu0 %v574_v32, %s4147_s30  ;;  %3963 = vmatprep.mubr.msk.bf16.mxu0 %vm701_vm0, %v1676_v51  ;;  %v1710_v44 = vcombine.high %v1687_v35, %v1694_v42  ;;  %v1709_v55 = vcombine.low %v1687_v35, %v1694_v42 }
  0xb5   : > { %2565 = vmatmul.mubr.bf16.vlgmr.msra.gmra.mrb[0].mxu0 %v1675_v52  ;;  %v750_v37 = vsel %vm730_vm1, %v721_v10, %v4551_v43 }
  0xb6   : > { %566 = vrot.lane.b32.xlu1 %v4508_v54, %s4140_s20  ;;  %v677_v63 = vpop.permute.xlu0 %676  ;;  %v1719_v11 = vrot.slane %v1709_v55, %v4465_v2 }
  0xb7   : > { %v4563_v4 = vsel %vm875_vm6, %v852_v61, %v677_v63  ;;  %v671_v61 = vor.u32 %v670_v39, %v666_v24  ;;  %v1726_v63 = vrot.slane %v1710_v44, %v4465_v2 }
  0xb8   : > { %v4565_v58 = vpop.permute.xlu1 %471  ;;  %v1016_v8 = vcombine.low %v4563_v4, %v4366_v59  ;;  %587 = vrot.lane.b32.xlu0 %v4481_v20, %s4145_s24 }
  0xba   : > { %601 = vrot.lane.b32.xlu1 %v574_v32, %s4145_s24  ;;  %v1024_v16 = vrot.slane %v1016_v8, %v4465_v2  ;;  %v592_v17 = vpop.permute.xlu0 %591 }
  0xbb   : > { %v806_v1 = vsel %vm788_vm3, %v777_v21, %v592_v17 }
  0xbc   : > { %v621_v12 = vpop.permute.xlu1 %620  ;;  %v1032_v23 = vcombine.high %v1024_v16, %v1024_v16  ;;  %616 = vrot.lane.b32.xlu0 %v4572_v9, %s4143_s22  ;;  %v4590_v29 = vrot.slane %v1024_v16, %v4465_v2 }
  0xbd   : > { %v835_v28 = vsel %vm817_vm4, %v806_v1, %v621_v12 }
  0xbe   : > { %479 = vrot.lane.b32.xlu1 %v4481_v20, %s4144_s23  ;;  %v4593_v30 = vrot.slane %v1032_v23, %v4465_v2  ;;  %v559_v32 = vpop.permute.xlu0 %558 }
  0xbf   : > { %v779_v47 = vsel %vm759_vm2, %v750_v37, %v559_v32 }
  0xc0   : > { %v594_v34 = vpop.permute.xlu1 %593  ;;  %v1680_v20 = vcombine.low %v4590_v29, %v4593_v30  ;;  %649 = vrot.lane.b32.xlu0 %v4253_v26, %s4146_s27  ;;  %v3948_v10 = vcombine.high %v4590_v29, %v4593_v30 }
  0xc1   : > { %v808_v43 = vsel %vm788_vm3, %v779_v47, %v594_v34 }
  0xc2   : > { %684 = vrot.lane.b32.xlu1 %v4287_v36, %s4147_s30  ;;  %v1708_v51 = vrot.slane %v1680_v20, %v4465_v2  ;;  %v514_v52 = vpop.permute.xlu0 %513  ;;  %v1017_v20 = vcombine.high %v4563_v4, %v4366_v59 }
  0xc4   : > { %v547_v54 = vpop.permute.xlu1 %546  ;;  %630 = vrot.lane.b32.xlu0 %v4602_v6, %s4143_s22  ;;  %v1712_v22 = vcombine.high %v1701_v46, %v1708_v51  ;;  %v1711_v41 = vcombine.low %v1701_v46, %v1708_v51 }
  0xc6   : > { %663 = vrot.lane.b32.xlu1 %v4576_v19, %s4146_s27  ;;  %v654_v3 = vpop.permute.xlu0 %653  ;;  %v1740_v8 = vrot.slane %v1712_v22, %v4465_v2  ;;  %v1733_v60 = vrot.slane %v1711_v41, %v4465_v2 }
  0xc7   : > { %v864_v13 = vsel %vm846_vm5, %v835_v28, %v654_v3 }
  0xc8   : > { %v689_v16 = vpop.permute.xlu1 %688  ;;  %521 = vrot.lane.b32.xlu0 %v4572_v9, %s4142_s21  ;;  %v1742_v0 = vcombine.low %v1726_v63, %v1740_v8  ;;  %v1741_v23 = vcombine.low %v1719_v11, %v1733_v60  ;;  %s4053_s21 = smul.u32 112, %s5191_s12 }
  0xc9   : > { %v893_v17 = vsel %vm875_vm6, %v864_v13, %v689_v16 }
  0xca   : > { %v1310_v42 = vcombine.low %v893_v17, %v4354_v56  ;;  %698 = vrot.lane.b32.xlu1 %v671_v61, %s4147_s30  ;;  %3964 = vmatprep.mubr.msk.bf16.mxu0 %vm701_vm0, %v1742_v0  ;;  %v623_v12 = vpop.permute.xlu0 %622  ;;  %v1311_v35 = vcombine.high %v893_v17, %v4354_v56  ;;  %v1031_v56 = vrot.slane %v1017_v20, %v4465_v2 }
  0xcb   : > { %2573 = vmatmul.mubr.bf16.gmra.mrb[4].mxu0 %v1741_v23  ;;  %v837_v4 = vsel %vm817_vm4, %v808_v43, %v623_v12 }
  0xcc   : > { %v1318_v14 = vrot.slane %v1310_v42, %v4465_v2  ;;  %v656_v27 = vpop.permute.xlu1 %655  ;;  %554 = vrot.lane.b32.xlu0 %v4253_v26, %s4140_s20  ;;  %v1325_v26 = vrot.slane %v1311_v35, %v4465_v2  ;;  %v1033_v51 = vcombine.high %v1031_v56, %v1031_v56  ;;  %v1047_v17 = vrot.slane %v1031_v56, %v4465_v2 }
  0xcd   : > { %v866_v34 = vsel %vm846_vm5, %v837_v4, %v656_v27 }
  0xce   : > { %618 = vrot.lane.b32.xlu1 %v4303_v40, %s4143_s22  ;;  %v582_v24 = vpop.permute.xlu0 %581  ;;  %v1326_v39 = vcombine.high %v1318_v14, %v1318_v14  ;;  %v1327_v21 = vcombine.high %v1325_v26, %v1325_v26  ;;  %v1061_v3 = vrot.slane %v1033_v51, %v4465_v2  ;;  %v1063_v30 = vcombine.high %v1047_v17, %v1047_v17 }
  0xd0   : > { %v611_v44 = vpop.permute.xlu1 %610  ;;  %589 = vrot.lane.b32.xlu0 %v4287_v36, %s4145_s24  ;;  %v1348_v59 = vrot.slane %v1326_v39, %v4465_v2  ;;  %v709_v36 = vsel %vm701_vm0, %v4226_v18, %v4565_v58  ;;  %v1341_v18 = vrot.slane %v1325_v26, %v4465_v2  ;;  %v1355_v58 = vrot.slane %v1327_v21, %v4465_v2  ;;  %s4990_s24 = scalar_lea.vmem %s5185_s3, %s4053_s21 }
  0xd1   : > { %v738_v55 = vsel %vm730_vm1, %v709_v36, %v514_v52 }
  0xd2   : > { %686 = vrot.lane.b32.xlu1 %v4316_v45, %s4147_s30  ;;  %v486_v46 = vpop.permute.xlu0 %485  ;;  %v1334_v45 = vrot.slane %v1318_v14, %v4465_v2  ;;  %v767_v28 = vsel %vm759_vm2, %v738_v55, %v547_v54  ;;  %v1357_v0 = vcombine.high %v1341_v18, %v1341_v18  ;;  %v2075_v23 = vcombine.low %v1341_v18, %v1355_v58 }
  0xd3   : > { %v796_v52 = vsel %vm788_vm3, %v767_v28, %v582_v24  ;;  %v1744_v14 = vcombine.low %v1047_v17, %v1061_v3  ;;  %v723_v27 = vsel %vm701_vm0, %v4325_v49, %v486_v46 }
  0xd4   : > { %v528_v32 = vpop.permute.xlu1 %527  ;;  %651 = vrot.lane.b32.xlu0 %v4274_v33, %s4146_s27  ;;  %v2073_v22 = vcombine.low %v1334_v45, %v1348_v59  ;;  %v3951_v41 = vcombine.high %v1334_v45, %v1348_v59  ;;  %v825_v42 = vsel %vm817_vm4, %v796_v52, %v611_v44  ;;  %v2097_v49 = vrot.slane %v2075_v23, %v4465_v2 }
  0xd5   : > { %v1760_v46 = vrot.slane %v1744_v14, %v4465_v2  ;;  %v752_v59 = vsel %vm730_vm1, %v723_v27, %v528_v32 }
  0xd6   : > { %v691_v1 = vpop.permute.xlu0 %690  ;;  %v2083_v13 = vrot.slane %v2073_v22, %v4465_v2  ;;  %v2090_v16 = vrot.slane %v3951_v41, %v4465_v2 }
  0xd7   : > { %v895_v61 = vsel %vm875_vm6, %v866_v34, %v691_v1 }
  0xd8   : > { %v561_v63 = vpop.permute.xlu1 %560  ;;  %v1359_v33 = vcombine.low %v895_v61, %v4390_v7  ;;  %v1360_v20 = vcombine.high %v895_v61, %v4390_v7  ;;  %v2106_v44 = vcombine.high %v2083_v13, %v2090_v16  ;;  %v2105_v29 = vcombine.low %v2083_v13, %v2090_v16 }
  0xd9   : > { %v1753_v7 = vrot.slane %v3948_v10, %v4465_v2  ;;  %v781_v1 = vsel %vm759_vm2, %v752_v59, %v561_v63 }
  0xda   : > { %v1367_v8 = vrot.slane %v1359_v33, %v4465_v2  ;;  %v644_v11 = vpop.permute.xlu0 %643  ;;  %v1374_v21 = vrot.slane %v1360_v20, %v4465_v2  ;;  %v2122_v55 = vrot.slane %v2106_v44, %v4465_v2  ;;  %v2115_v61 = vrot.slane %v2105_v29, %v4465_v2 }
  0xdb   : > { %v854_v35 = vsel %vm846_vm5, %v825_v42, %v644_v11  ;;  %v1776_v14 = vcombine.high %v1753_v7, %v1760_v46 }
  0xdc   : > { %v596_v60 = vpop.permute.xlu1 %595  ;;  %v4671_v54 = vrot.slane %v1367_v8, %v4465_v2  ;;  %v1375_v12 = vcombine.high %v1367_v8, %v1367_v8  ;;  %v1376_v11 = vcombine.high %v1374_v21, %v1374_v21  ;;  %v1390_v13 = vrot.slane %v1374_v21, %v4465_v2 }
  0xdd   : > { %v810_v32 = vsel %vm788_vm3, %v781_v1, %v596_v60 }
  0xde   : > { %v679_v37 = vpop.permute.xlu0 %678  ;;  %v2076_v24 = vcombine.low %v1357_v0, %v4671_v54  ;;  %v1397_v56 = vrot.slane %v1375_v12, %v4465_v2  ;;  %v1405_v60 = vcombine.high %v4671_v54, %v4671_v54  ;;  %v1404_v54 = vrot.slane %v1376_v11, %v4465_v2 }
  0xdf   : > { %v4682_v47 = vsel %vm875_vm6, %v854_v35, %v679_v37 }
  0xe0   : > { %v625_v39 = vpop.permute.xlu1 %624  ;;  %v1065_v26 = vcombine.low %v4682_v47, %v4412_v15  ;;  %v2104_v43 = vrot.slane %v2076_v24, %v4465_v2  ;;  %v1407_v33 = vcombine.high %v1397_v56, %v1397_v56  ;;  %v1775_v24 = vcombine.low %v1753_v7, %v1760_v46 }
  0xe1   : > { %v839_v8 = vsel %vm817_vm4, %v810_v32, %v625_v39  ;;  %v1406_v39 = vcombine.high %v1390_v13, %v1390_v13  ;;  %v2139_v29 = vcombine.low %v1397_v56, %v1405_v60 }
  0xe2   : > { %v1073_v4 = vrot.slane %v1065_v26, %v4465_v2  ;;  %v474_v36 = vpop.permute.xlu0 %473  ;;  %v2108_v51 = vcombine.high %v2097_v49, %v2104_v43  ;;  %v2107_v34 = vcombine.low %v2097_v49, %v2104_v43  ;;  %v2140_v27 = vcombine.low %v1407_v33, %v1390_v13 }
  0xe3   : > { %v711_v33 = vsel %vm701_vm0, %v4293_v38, %v474_v36 }
  0xe4   : > { %v658_v45 = vpop.permute.xlu1 %657  ;;  %v1081_v22 = vcombine.high %v1073_v4, %v1073_v4  ;;  %v1089_v41 = vrot.slane %v1073_v4, %v4465_v2  ;;  %v2136_v28 = vrot.slane %v2108_v51, %v4465_v2  ;;  %v2129_v18 = vrot.slane %v2107_v34, %v4465_v2 }
  0xe5   : > { %v868_v16 = vsel %vm846_vm5, %v839_v8, %v658_v45  ;;  %v1792_v4 = vrot.slane %v1776_v14, %v4465_v2  ;;  %v2156_v21 = vrot.slane %v2140_v27, %v4465_v2  ;;  %v1785_v45 = vrot.slane %v1775_v24, %v4465_v2 }
  0xe6   : > { %v4702_v58 = vrot.slane %v1081_v22, %v4465_v2  ;;  %v1111_v3 = vcombine.high %v1089_v41, %v1089_v41  ;;  %v1745_v52 = vcombine.low %v1063_v30, %v1089_v41  ;;  %v516_v63 = vpop.permute.xlu0 %515  ;;  %v2138_v0 = vcombine.low %v2122_v55, %v2136_v28 }
  0xe7   : > { %v2137_v10 = vcombine.low %v2115_v61, %v2129_v18  ;;  %v1066_v30 = vcombine.high %v4682_v47, %v4412_v15  ;;  %v2141_v55 = vcombine.low %v1404_v54, %v1406_v39  ;;  %v2149_v34 = vrot.slane %v2139_v29, %v4465_v2 }
  0xe8   : > { %v693_v17 = vpop.permute.xlu1 %692  ;;  %v1746_v23 = vcombine.low %v4702_v58, %v1111_v3  ;;  %3970 = vmatprep.mubr.msk.bf16.mxu1 %vm701_vm0, %v2138_v0  ;;  %v1767_v35 = vrot.slane %v1745_v52, %v4465_v2  ;;  %v740_v3 = vsel %vm730_vm1, %v711_v33, %v516_v63  ;;  %v1113_v60 = vcombine.high %v4702_v58, %v4702_v58 }
  0xe9   : > { %v4711_v42 = vsel %vm875_vm6, %v868_v16, %v693_v17  ;;  %2621 = vmatmul.mubr.bf16.vlgmr.msra.gmra.mrb[0].mxu1 %v2137_v10  ;;  %v1080_v1 = vrot.slane %v1066_v30, %v4465_v2  ;;  %v2172_v28 = vcombine.high %v2149_v34, %v2156_v21  ;;  %v2163_v18 = vrot.slane %v2141_v55, %v4465_v2 }
  0xea   : > { %v1408_v12 = vcombine.low %v4711_v42, %v4432_v25  ;;  %v1774_v37 = vrot.slane %v1746_v23, %v4465_v2  ;;  %v549_v20 = vpop.permute.xlu0 %548  ;;  %v2171_v11 = vcombine.low %v2149_v34, %v2156_v21  ;;  %v1409_v30 = vcombine.high %v4711_v42, %v4432_v25 }
  0xeb   : > { %v1082_v13 = vcombine.high %v1080_v1, %v1080_v1  ;;  %v1096_v16 = vrot.slane %v1080_v1, %v4465_v2  ;;  %v769_v17 = vsel %vm759_vm2, %v740_v3, %v549_v20 }
  0xec   : > { %v1416_v44 = vrot.slane %v1408_v12, %v4465_v2  ;;  %v4720_v26 = vpop.permute.xlu1 %487  ;;  %v1778_v49 = vcombine.high %v1767_v35, %v1774_v37  ;;  %v1777_v43 = vcombine.low %v1767_v35, %v1774_v37  ;;  %v2188_v12 = vrot.slane %v2172_v28, %v4465_v2 }
  0xed   : > { %v2181_v35 = vrot.slane %v2171_v11, %v4465_v2  ;;  %v1110_v20 = vrot.slane %v1082_v13, %v4465_v2  ;;  %v1112_v24 = vcombine.high %v1096_v16, %v1096_v16  ;;  %v1809_v29 = vcombine.low %v1113_v60, %v1096_v16 }
  0xee   : > { %v1424_v59 = vcombine.high %v1416_v44, %v1416_v44  ;;  %v584_v7 = vpop.permute.xlu0 %583  ;;  %v1806_v46 = vrot.slane %v1778_v49, %v4465_v2  ;;  %v1799_v51 = vrot.slane %v1777_v43, %v4465_v2  ;;  %v4730_v56 = vrot.slane %v1416_v44, %v4465_v2 }
  0xef   : > { %v798_v38 = vsel %vm788_vm3, %v769_v17, %v584_v7  ;;  %v1819_v7 = vrot.slane %v1809_v29, %v4465_v2 }
  0xf0   : > { %v4733_v15 = vrot.slane %v1424_v59, %v4465_v2  ;;  %v530_v47 = vpop.permute.xlu1 %529  ;;  %v1808_v22 = vcombine.low %v1792_v4, %v1806_v46  ;;  %v1807_v41 = vcombine.low %v1785_v45, %v1799_v51  ;;  %v1810_v4 = vcombine.low %v1110_v20, %v1112_v24 }
  0xf1   : > { %v1423_v46 = vrot.slane %v1409_v30, %v4465_v2  ;;  %v725_v45 = vsel %vm701_vm0, %v4358_v57, %v4720_v26 }
  0xf2   : > { %v2142_v61 = vcombine.low %v4730_v56, %v4733_v15  ;;  %3965 = vmatprep.mubr.msk.bf16.mxu0 %vm701_vm0, %v1808_v22  ;;  %v613_v32 = vpop.permute.xlu0 %612  ;;  %v1826_v34 = vrot.slane %v1810_v4, %v4465_v2  ;;  %v754_v1 = vsel %vm730_vm1, %v725_v45, %v530_v47 }
  0xf3   : > { %2581 = vmatmul.mubr.bf16.gmra.mrb[8].mxu0 %v1807_v41  ;;  %v827_v63 = vsel %vm817_vm4, %v798_v38, %v613_v32 }
  0xf4   : > { %v2170_v52 = vrot.slane %v2142_v61, %v4465_v2  ;;  %v4745_v8 = vpop.permute.xlu1 %475  ;;  %v1425_v61 = vcombine.high %v1423_v46, %v1423_v46  ;;  %v1842_v28 = vcombine.high %v1819_v7, %v1826_v34  ;;  %v1841_v3 = vcombine.low %v1819_v7, %v1826_v34 }
  0xf5   : > { %v713_v30 = vsel %vm701_vm0, %v4371_v62, %v4745_v8 }
  0xf6   : > { %v2174_v36 = vcombine.high %v2163_v18, %v2170_v52  ;;  %v2173_v0 = vcombine.low %v2163_v18, %v2170_v52  ;;  %v646_v23 = vpop.permute.xlu0 %645  ;;  %v1453_v16 = vrot.slane %v1425_v61, %v4465_v2  ;;  %v1858_v38 = vrot.slane %v1842_v28, %v4465_v2 }
  0xf7   : > { %v856_v10 = vsel %vm846_vm5, %v827_v63, %v646_v23  ;;  %v1851_v63 = vrot.slane %v1841_v3, %v4465_v2 }
  0xf8   : > { %v681_v14 = vpop.permute.xlu1 %680  ;;  %v2202_v27 = vrot.slane %v2174_v36, %v4465_v2  ;;  %v2195_v37 = vrot.slane %v2173_v0, %v4465_v2 }
  0xf9   : > { %v4760_v54 = vsel %vm875_vm6, %v856_v10, %v681_v14 }
  0xfa   : > { %v1114_v58 = vcombine.low %v4760_v54, %v4455_v53  ;;  %v2204_v39 = vcombine.low %v2188_v12, %v2202_v27  ;;  %v2203_v44 = vcombine.low %v2181_v35, %v2195_v37  ;;  %v563_v49 = vpop.permute.xlu0 %562  ;;  %v1439_v12 = vrot.slane %v1423_v46, %v4465_v2 }
  0xfb   : > { %v783_v33 = vsel %vm759_vm2, %v754_v1, %v563_v49  ;;  %v3952_v37 = vcombine.high %v4730_v56, %v4733_v15  ;;  %v1115_v24 = vcombine.high %v4760_v54, %v4455_v53 }
  0xfc   : > { %v1122_v43 = vrot.slane %v1114_v58, %v4465_v2  ;;  %v598_v59 = vpop.permute.xlu1 %597  ;;  %3971 = vmatprep.mubr.msk.bf16.mxu1 %vm701_vm0, %v2204_v39  ;;  %v2206_v20 = vcombine.low %v1439_v12, %v1453_v16  ;;  %v1455_v29 = vcombine.high %v1439_v12, %v1439_v12 }
  0xfd   : > { %2629 = vmatmul.mubr.bf16.gmra.mrb[4].mxu1 %v2203_v44  ;;  %v812_v52 = vsel %vm788_vm3, %v783_v33, %v598_v59  ;;  %v2215_v56 = vrot.slane %v3952_v37, %v4465_v2  ;;  %v1129_v53 = vrot.slane %v1115_v24, %v4465_v2 }
  0xfe   : > { %v1130_v21 = vcombine.high %v1122_v43, %v1122_v43  ;;  %v518_v51 = vpop.permute.xlu0 %517  ;;  %v1138_v25 = vrot.slane %v1122_v43, %v4465_v2  ;;  %v2222_v15 = vrot.slane %v2206_v20, %v4465_v2 }
  0xff   : > { %v742_v54 = vsel %vm730_vm1, %v713_v30, %v518_v51 }
 0x100   : > { %v1152_v42 = vrot.slane %v1130_v21, %v4465_v2  ;;  %v627_v55 = vpop.permute.xlu1 %626  ;;  %v2238_v51 = vcombine.high %v2215_v56, %v2222_v15  ;;  %v2237_v33 = vcombine.low %v2215_v56, %v2222_v15 }
 0x101   : > { %v841_v47 = vsel %vm817_vm4, %v812_v52, %v627_v55 }
 0x102   : > { %v1811_v22 = vcombine.low %v1138_v25, %v1152_v42  ;;  %v3949_v41 = vcombine.high %v1138_v25, %v1152_v42  ;;  %v551_v32 = vpop.permute.xlu0 %550  ;;  %v1131_v42 = vcombine.high %v1129_v53, %v1129_v53  ;;  %v2254_v16 = vrot.slane %v2238_v51, %v4465_v2 }
 0x103   : > { %v771_v4 = vsel %vm759_vm2, %v742_v54, %v551_v32 }
 0x104   : > { %v1833_v18 = vrot.slane %v1811_v22, %v4465_v2  ;;  %v1840_v57 = vrot.slane %v3949_v41, %v4465_v2  ;;  %v660_v26 = vpop.permute.xlu1 %659  ;;  %v1159_v3 = vrot.slane %v1131_v42, %v4465_v2 }
 0x105   : > { %v870_v36 = vsel %vm846_vm5, %v841_v47, %v660_v26 }
 0x106   : > { %v1844_v11 = vcombine.high %v1833_v18, %v1840_v57  ;;  %v1843_v13 = vcombine.low %v1833_v18, %v1840_v57  ;;  %v586_v17 = vpop.permute.xlu0 %585  ;;  %v1145_v18 = vrot.slane %v1129_v53, %v4465_v2 }
 0x107   : > { %v800_v62 = vsel %vm788_vm3, %v771_v4, %v586_v17  ;;  %v2247_v17 = vrot.slane %v2237_v33, %v4465_v2 }
 0x108   : > { %v695_v0 = vpop.permute.xlu1 %694  ;;  %v1872_v60 = vrot.slane %v1844_v11, %v4465_v2  ;;  %v1865_v23 = vrot.slane %v1843_v13, %v4465_v2 }
 0x109   : > { %v4790_v10 = vsel %vm875_vm6, %v870_v36, %v695_v0 }
 0x10a   : > { %v1457_v14 = vcombine.low %v4790_v10, %v4495_v31  ;;  %v1874_v27 = vcombine.low %v1858_v38, %v1872_v60  ;;  %v1873_v35 = vcombine.low %v1851_v63, %v1865_v23  ;;  %v615_v58 = vpop.permute.xlu0 %614  ;;  %v1161_v60 = vcombine.high %v1145_v18, %v1145_v18 }
 0x10b   : > { %v829_v25 = vsel %vm817_vm4, %v800_v62, %v615_v58  ;;  %v1458_v63 = vcombine.high %v4790_v10, %v4495_v31 }
 0x10c   : > { %v1465_v39 = vrot.slane %v1457_v14, %v4465_v2  ;;  %v490_v44 = vpop.permute.xlu1 %489  ;;  %3966 = vmatprep.mubr.msk.bf16.mxu0 %vm701_vm0, %v1874_v27  ;;  %v1875_v14 = vcombine.low %v1145_v18, %v1159_v3 }
 0x10d   : > { %2589 = vmatmul.mubr.bf16.gmra.mrb[12].mxu0 %v1873_v35  ;;  %v727_v20 = vsel %vm701_vm0, %v4384_v5, %v490_v44  ;;  %v1472_v10 = vrot.slane %v1458_v63, %v4465_v2 }
 0x10e   : > { %v1473_v49 = vcombine.high %v1465_v39, %v1465_v39  ;;  %v1481_v43 = vrot.slane %v1465_v39, %v4465_v2  ;;  %v648_v59 = vpop.permute.xlu0 %647 }
 0x10f   : > { %v858_v55 = vsel %vm846_vm5, %v829_v25, %v648_v59  ;;  %v1488_v62 = vrot.slane %v1472_v10, %v4465_v2 }
 0x110   : > { %v4810_v21 = vrot.slane %v1473_v49, %v4465_v2  ;;  %v1503_v7 = vcombine.high %v1481_v43, %v1481_v43  ;;  %v532_v46 = vpop.permute.xlu1 %531  ;;  %v2207_v8 = vcombine.low %v1455_v29, %v1481_v43  ;;  %v1885_v49 = vrot.slane %v1875_v14, %v4465_v2 }
 0x111   : > { %v756_v43 = vsel %vm730_vm1, %v727_v20, %v532_v46  ;;  %v1504_v33 = vcombine.high %v1488_v62, %v1488_v62 }
 0x112   : > { %v2208_v45 = vcombine.low %v4810_v21, %v1503_v7  ;;  %v683_v34 = vpop.permute.xlu0 %682  ;;  %v2229_v1 = vrot.slane %v2207_v8, %v4465_v2  ;;  %v1474_v7 = vcombine.high %v1472_v10, %v1472_v10  ;;  %v1505_v42 = vcombine.high %v4810_v21, %v4810_v21 }
 0x113   : > { %v887_v41 = vsel %vm875_vm6, %v858_v55, %v683_v34 }
 0x114   : > { %v2236_v22 = vrot.slane %v2208_v45, %v4465_v2  ;;  %v600_v61 = vpop.permute.xlu1 %599  ;;  %v1163_v32 = vcombine.low %v887_v41, %v4572_v9  ;;  %v1164_v28 = vcombine.high %v887_v41, %v4572_v9  ;;  %v1502_v41 = vrot.slane %v1474_v7, %v4465_v2 }
 0x116   : > { %v2240_v57 = vcombine.high %v2229_v1, %v2236_v22  ;;  %v2239_v26 = vcombine.low %v2229_v1, %v2236_v22  ;;  %v1171_v52 = vrot.slane %v1163_v32, %v4465_v2  ;;  %v565_v11 = vpop.permute.xlu0 %564  ;;  %v4829_v9 = vrot.slane %v1164_v28, %v4465_v2 }
 0x117   : > { %v785_v56 = vsel %vm759_vm2, %v756_v43, %v565_v11  ;;  %v2272_v11 = vcombine.low %v1502_v41, %v1504_v33 }
 0x118   : > { %v629_v13 = vpop.permute.xlu1 %628  ;;  %v2268_v47 = vrot.slane %v2240_v57, %v4465_v2  ;;  %v2261_v38 = vrot.slane %v2239_v26, %v4465_v2  ;;  %v1179_v36 = vcombine.high %v1171_v52, %v1171_v52  ;;  %v1187_v0 = vrot.slane %v1171_v52, %v4465_v2 }
 0x119   : > { %v4840_v39 = vrot.slane %v4829_v9, %v4465_v2  ;;  %v814_v8 = vsel %vm788_vm3, %v785_v56, %v600_v61  ;;  %v2271_v57 = vcombine.low %v1505_v42, %v1488_v62  ;;  %v2288_v63 = vrot.slane %v2272_v11, %v4465_v2 }
 0x11a   : > { %v2270_v23 = vcombine.low %v2254_v16, %v2268_v47  ;;  %v2269_v12 = vcombine.low %v2247_v17, %v2261_v38  ;;  %v1201_v27 = vrot.slane %v1179_v36, %v4465_v2  ;;  %v1209_v35 = vcombine.high %v1187_v0, %v1187_v0  ;;  %v478_v37 = vpop.permute.xlu0 %477  ;;  %v4113_v17 = vld [vmem:[%s4194_s19 + $0x30] sm:$0xff]  }
 0x11b   : > { %v1876_v24 = vcombine.low %v1161_v60, %v1187_v0  ;;  %v843_v61 = vsel %vm817_vm4, %v814_v8, %v629_v13  ;;  %v2281_v13 = vrot.slane %v2271_v57, %v4465_v2  ;;  %v715_v38 = vsel %vm701_vm0, %v4113_v17, %v478_v37 }
 0x11c   : > { %v662_v58 = vpop.permute.xlu1 %661  ;;  %3972 = vmatprep.mubr.msk.bf16.mxu1 %vm701_vm0, %v2270_v23  ;;  %v1211_v29 = vcombine.high %v1201_v27, %v1201_v27  ;;  %v1877_v31 = vcombine.low %v1201_v27, %v1209_v35  ;;  %v1180_v27 = vcombine.high %v4829_v9, %v4829_v9  ;;  %v1210_v8 = vcombine.high %v4840_v39, %v4840_v39 }
 0x11d   : > { %2637 = vmatmul.mubr.bf16.gmra.mrb[8].mxu1 %v2269_v12  ;;  %v1892_v30 = vrot.slane %v1876_v24, %v4465_v2  ;;  %v872_v32 = vsel %vm846_vm5, %v843_v61, %v662_v58  ;;  %v2304_v24 = vcombine.high %v2281_v13, %v2288_v63  ;;  %v4114_v58 = vld [vmem:[%s4194_s19 + $0x68] sm:$0xff]  }
 0x11e   : > { %v1878_v5 = vcombine.low %v1211_v29, %v4840_v39  ;;  %v520_v44 = vpop.permute.xlu0 %519  ;;  %v1899_v53 = vrot.slane %v1877_v31, %v4465_v2  ;;  %v1208_v56 = vrot.slane %v1180_v27, %v4465_v2 }
 0x11f   : > { %v1908_v59 = vcombine.high %v1885_v49, %v1892_v30  ;;  %v1907_v4 = vcombine.low %v1885_v49, %v1892_v30  ;;  %v744_v0 = vsel %vm730_vm1, %v715_v38, %v520_v44  ;;  %v2303_v44 = vcombine.low %v2281_v13, %v2288_v63  ;;  %v4115_v38 = vld [vmem:[%s4194_s19 + $0x38] sm:$0xff]  }
 0x120   : > { %v553_v15 = vpop.permute.xlu1 %552  ;;  %v1906_v54 = vrot.slane %v1878_v5, %v4465_v2  ;;  %v1941_v57 = vcombine.low %v1208_v56, %v1210_v8 }
 0x121   : > { %v1924_v34 = vrot.slane %v1908_v59, %v4465_v2  ;;  %v1917_v1 = vrot.slane %v1907_v4, %v4465_v2  ;;  %v773_v35 = vsel %vm759_vm2, %v744_v0, %v553_v15 }
 0x122   : > { %v492_v45 = vpop.permute.xlu0 %491  ;;  %v1910_v25 = vcombine.high %v1899_v53, %v1906_v54  ;;  %v1909_v46 = vcombine.low %v1899_v53, %v1906_v54 }
 0x123   : > { %v729_v37 = vsel %vm701_vm0, %v4114_v58, %v492_v45 }
 0x124   : > { %v534_v55 = vpop.permute.xlu1 %533  ;;  %v1938_v51 = vrot.slane %v1910_v25, %v4465_v2  ;;  %v1931_v22 = vrot.slane %v1909_v46, %v4465_v2 }
 0x125   : > { %v758_v15 = vsel %vm730_vm1, %v729_v37, %v534_v55 }
 0x126   : > { %v697_v28 = vpop.permute.xlu0 %696  ;;  %v1940_v18 = vcombine.low %v1924_v34, %v1938_v51  ;;  %v1939_v21 = vcombine.low %v1917_v1, %v1931_v22  ;;  %v2313_v51 = vrot.slane %v2303_v44, %v4465_v2 }
 0x127   : > { %v901_v26 = vsel %vm875_vm6, %v872_v32, %v697_v28 }
 0x128   : > { %v567_v3 = vpop.permute.xlu1 %566  ;;  %v1506_v52 = vcombine.low %v901_v26, %v4602_v6  ;;  %3967 = vmatprep.mubr.msk.bf16.mxu0 %vm701_vm0, %v1940_v18  ;;  %v1507_v29 = vcombine.high %v901_v26, %v4602_v6  ;;  %v2320_v6 = vrot.slane %v2304_v24, %v4465_v2 }
 0x129   : > { %2597 = vmatmul.mubr.bf16.gmra.mrb[16].mxu0 %v1939_v21  ;;  %v787_v45 = vsel %vm759_vm2, %v758_v15, %v567_v3  ;;  %v700_v21 = vrot.slane %v4576_v19, 1 }
 0x12a   : > { %v1514_v16 = vrot.slane %v1506_v52, %v4465_v2  ;;  %v588_v47 = vpop.permute.xlu0 %587  ;;  %v1521_v59 = vrot.slane %v1507_v29, %v4465_v2 }
 0x12b   : > { %v802_v30 = vsel %vm788_vm3, %v773_v35, %v588_v47 }
 0x12c   : > { %v602_v36 = vpop.permute.xlu1 %601  ;;  %v1522_v60 = vcombine.high %v1514_v16, %v1514_v16  ;;  %v1530_v23 = vrot.slane %v1514_v16, %v4465_v2  ;;  %v1523_v61 = vcombine.high %v1521_v59, %v1521_v59  ;;  %v1537_v17 = vrot.slane %v1521_v59, %v4465_v2 }
 0x12d   : > { %v816_v42 = vsel %vm788_vm3, %v787_v45, %v602_v36 }
 0x12e   : > { %v1544_v12 = vrot.slane %v1522_v60, %v4465_v2  ;;  %v617_v14 = vpop.permute.xlu0 %616  ;;  %v1551_v19 = vrot.slane %v1523_v61, %v4465_v2 }
 0x12f   : > { %v831_v5 = vsel %vm817_vm4, %v802_v30, %v617_v14  ;;  %v1951_v14 = vrot.slane %v1941_v57, %v4465_v2 }
 0x130   : > { %v480_v20 = vpop.permute.xlu1 %479  ;;  %v2273_v31 = vcombine.low %v1530_v23, %v1544_v12  ;;  %v3953_v10 = vcombine.high %v1530_v23, %v1544_v12  ;;  %v2337_v30 = vcombine.low %v1537_v17, %v1551_v19 }
 0x131   : > { %v717_v36 = vsel %vm701_vm0, %v4115_v38, %v480_v20 }
 0x132   : > { %v2295_v49 = vrot.slane %v2273_v31, %v4465_v2  ;;  %v2302_v43 = vrot.slane %v3953_v10, %v4465_v2  ;;  %v650_v9 = vpop.permute.xlu0 %649  ;;  %v1553_v10 = vcombine.high %v1537_v17, %v1537_v17  ;;  %v2347_v45 = vrot.slane %v2337_v30, %v4465_v2 }
 0x133   : > { %v860_v53 = vsel %vm846_vm5, %v831_v5, %v650_v9 }
 0x134   : > { %v685_v54 = vpop.permute.xlu1 %684  ;;  %v2306_v7 = vcombine.high %v2295_v49, %v2302_v43  ;;  %v2305_v62 = vcombine.low %v2295_v49, %v2302_v43 }
 0x135   : > { %v889_v4 = vsel %vm875_vm6, %v860_v53, %v685_v54 }
 0x136   : > { %v1212_v25 = vcombine.low %v889_v4, %v4303_v40  ;;  %v1213_v46 = vcombine.high %v889_v4, %v4303_v40  ;;  %v631_v55 = vpop.permute.xlu0 %630  ;;  %v2334_v34 = vrot.slane %v2306_v7, %v4465_v2  ;;  %v2327_v1 = vrot.slane %v2305_v62, %v4465_v2 }
 0x137   : > { %v845_v39 = vsel %vm817_vm4, %v816_v42, %v631_v55 }
 0x138   : > { %v1220_v22 = vrot.slane %v1212_v25, %v4465_v2  ;;  %v1227_v41 = vrot.slane %v1213_v46, %v4465_v2  ;;  %v664_v33 = vpop.permute.xlu1 %663  ;;  %v2336_v32 = vcombine.low %v2320_v6, %v2334_v34  ;;  %v2335_v28 = vcombine.low %v2313_v51, %v2327_v1 }
 0x139   : > { %v874_v26 = vsel %vm846_vm5, %v845_v39, %v664_v33 }
 0x13a   : > { %v1228_v40 = vcombine.high %v1220_v22, %v1220_v22  ;;  %v1229_v18 = vcombine.high %v1227_v41, %v1227_v41  ;;  %3973 = vmatprep.mubr.msk.bf16.mxu1 %vm701_vm0, %v2336_v32  ;;  %v522_v3 = vpop.permute.xlu0 %521  ;;  %v1236_v52 = vrot.slane %v1220_v22, %v4465_v2  ;;  %v4905_v11 = vrot.slane %v1227_v41, %v4465_v2 }
 0x13b   : > { %2645 = vmatmul.mubr.bf16.gmra.mrb[12].mxu1 %v2335_v28  ;;  %v746_v27 = vsel %vm730_vm1, %v717_v36, %v522_v3 }
 0x13c   : > { %v1250_v16 = vrot.slane %v1228_v40, %v4465_v2  ;;  %v1257_v47 = vrot.slane %v1229_v18, %v4465_v2  ;;  %v699_v13 = vpop.permute.xlu1 %698 }
 0x13d   : > { %v903_v0 = vsel %vm875_vm6, %v874_v26, %v699_v13 }
 0x13e   : > { %v1942_v60 = vcombine.low %v1236_v52, %v1250_v16  ;;  %v3950_v63 = vcombine.high %v1236_v52, %v1250_v16  ;;  %v1944_v23 = vcombine.low %v4905_v11, %v1257_v47  ;;  %v1555_v12 = vcombine.low %v903_v0, %v700_v21  ;;  %v555_v24 = vpop.permute.xlu0 %554 }
 0x13f   : > { %v1556_v35 = vcombine.high %v903_v0, %v700_v21  ;;  %v775_v43 = vsel %vm759_vm2, %v746_v27, %v555_v24 }
 0x140   : > { %v1958_v58 = vrot.slane %v1942_v60, %v4465_v2  ;;  %v1965_v37 = vrot.slane %v3950_v63, %v4465_v2  ;;  %v1972_v29 = vrot.slane %v1944_v23, %v4465_v2  ;;  %v1563_v20 = vrot.slane %v1555_v12, %v4465_v2  ;;  %v619_v31 = vpop.permute.xlu1 %618 }
 0x141   : > { %v1570_v49 = vrot.slane %v1556_v35, %v4465_v2  ;;  %v1259_v60 = vcombine.high %v4905_v11, %v4905_v11 }
 0x142   : > { %v1571_v5 = vcombine.high %v1563_v20, %v1563_v20  ;;  %v1579_v9 = vrot.slane %v1563_v20, %v4465_v2  ;;  %v1974_v44 = vcombine.high %v1951_v14, %v1958_v58  ;;  %v1976_v56 = vcombine.high %v1965_v37, %v1972_v29  ;;  %v590_v54 = vpop.permute.xlu0 %589 }
 0x143   : > { %v1572_v15 = vcombine.high %v1570_v49, %v1570_v49  ;;  %v1586_v53 = vrot.slane %v1570_v49, %v4465_v2  ;;  %v1973_v6 = vcombine.low %v1951_v14, %v1958_v58  ;;  %v1975_v59 = vcombine.low %v1965_v37, %v1972_v29 }
 0x144   : > { %v1593_v4 = vrot.slane %v1571_v5, %v4465_v2  ;;  %v1601_v7 = vcombine.high %v1579_v9, %v1579_v9  ;;  %v2338_v62 = vcombine.low %v1553_v10, %v1579_v9  ;;  %v804_v8 = vsel %vm788_vm3, %v775_v43, %v590_v54  ;;  %v687_v1 = vpop.permute.xlu1 %686 }
 0x145   : > { %v1600_v25 = vrot.slane %v1572_v15, %v4465_v2  ;;  %v1602_v46 = vcombine.high %v1586_v53, %v1586_v53  ;;  %v1990_v42 = vrot.slane %v1974_v44, %v4465_v2  ;;  %v2004_v22 = vrot.slane %v1976_v56, %v4465_v2 }
 0x146   : > { %v1603_v55 = vcombine.high %v1593_v4, %v1593_v4  ;;  %v2339_v34 = vcombine.low %v1593_v4, %v1601_v7  ;;  %v2354_v51 = vrot.slane %v2338_v62, %v4465_v2  ;;  %v833_v39 = vsel %vm817_vm4, %v804_v8, %v619_v31  ;;  %v652_v33 = vpop.permute.xlu0 %651 }
 0x147   : > { %v2403_v41 = vcombine.low %v1600_v25, %v1602_v46  ;;  %v1983_v61 = vrot.slane %v1973_v6, %v4465_v2  ;;  %v1997_v32 = vrot.slane %v1975_v59, %v4465_v2  ;;  %v862_v40 = vsel %vm846_vm5, %v833_v39, %v652_v33 }
 0x148   : > { %v2340_v28 = vcombine.low %v1603_v55, %v1586_v53  ;;  %v2006_v18 = vcombine.low %v1990_v42, %v2004_v22  ;;  %v891_v21 = vsel %vm875_vm6, %v862_v40, %v687_v1  ;;  %v2370_v26 = vcombine.high %v2347_v45, %v2354_v51  ;;  %v4971_v1 = vld [vmem:[%s5184_s2] ss:$0 sm:$0xff] }
 0x149   : > { %v2005_v57 = vcombine.low %v1983_v61, %v1997_v32  ;;  %v2361_v3 = vrot.slane %v2339_v34, %v4465_v2  ;;  %v1261_v16 = vcombine.low %v891_v21, %v4322_v48  ;;  %v1262_v47 = vcombine.high %v891_v21, %v4322_v48 }
 0x14a   : > { %v2368_v52 = vrot.slane %v2340_v28, %v4465_v2  ;;  %3968 = vmatprep.mubr.msk.bf16.mxu0 %vm701_vm0, %v2006_v18  ;;  %v2369_v13 = vcombine.low %v2347_v45, %v2354_v51  ;;  %v2410_v17 = vrot.slane %v2403_v41, %v4465_v2  ;;  %v2386_v63 = vrot.slane %v2370_v26, %v4465_v2 }
 0x14b   : > { %2605 = vmatmul.mubr.bf16.gmra.mrb[20].mxu0 %v2005_v57  ;;  %v1269_v19 = vrot.slane %v1261_v16, %v4465_v2  ;;  %v1276_v38 = vrot.slane %v1262_v47, %v4465_v2  ;;  %v4149_v34 = vmov 1983009808  }
 0x14c   : > { %v2372_v36 = vcombine.high %v2361_v3, %v2368_v52  ;;  %v2371_v0 = vcombine.low %v2361_v3, %v2368_v52  ;;  %v2379_v35 = vrot.slane %v2369_v13, %v4465_v2  ;;  %v2411_v58 = vcombine.high %v2410_v17, %v2410_v17 }
 0x14d   : > { %v1277_v23 = vcombine.high %v1269_v19, %v1269_v19  ;;  %v1278_v12 = vcombine.high %v1276_v38, %v1276_v38  ;;  %v1285_v48 = vrot.slane %v1269_v19, %v4465_v2  ;;  %v1292_v14 = vrot.slane %v1276_v38, %v4465_v2 }
 0x14e   : > { %v2400_v27 = vrot.slane %v2372_v36, %v4465_v2  ;;  %v2393_v24 = vrot.slane %v2371_v0, %v4465_v2  ;;  %v2425_v9 = vrot.slane %v2411_v58, %v4465_v2  ;;  %v2418_v62 = vrot.slane %v2410_v17, %v4465_v2 }
 0x14f   : > { %v1299_v37 = vrot.slane %v1277_v23, %v4465_v2  ;;  %v1306_v29 = vrot.slane %v1278_v12, %v4465_v2  ;;  %v1307_v11 = vcombine.high %v1285_v48, %v1285_v48  ;;  %v1308_v20 = vcombine.high %v1292_v14, %v1292_v14 }
 0x150   : > { %v2007_v31 = vcombine.low %v1259_v60, %v1285_v48  ;;  %v2402_v10 = vcombine.low %v2386_v63, %v2400_v27  ;;  %v2401_v30 = vcombine.low %v2379_v35, %v2393_v24  ;;  %v2745_v51 = vunpack.c.l.s4 %v4149_v34 }
 0x151   : > { %v1309_v49 = vcombine.high %v1299_v37, %v1299_v37  ;;  %v2008_v43 = vcombine.low %v1299_v37, %v1307_v11  ;;  %v2010_v5 = vcombine.low %v1306_v29, %v1308_v20 }
 0x152   : > { %3974 = vmatprep.mubr.msk.bf16.mxu1 %vm701_vm0, %v2402_v10  ;;  %v2017_v56 = vrot.slane %v2007_v31, %v4465_v2  ;;  %v2746_v22 = vunpack.c.0.s8 %v2745_v51 }
 0x153   : > { %v2009_v44 = vcombine.low %v1309_v49, %v1292_v14  ;;  %v2024_v15 = vrot.slane %v2008_v43, %v4465_v2  ;;  %2653 = vmatmul.mubr.bf16.gmra.mrb[16].mxu1 %v2401_v30  ;;  %v2038_v54 = vrot.slane %v2010_v5, %v4465_v2 }
 0x154   : > { %3975 = vmatprep.mubr.msk.bf16.mxu1 %vm701_vm0, %v2425_v9  ;;  %v4975_v32 = vsub.s32 %v2746_v22, %v4450_v50 }
 0x155   : > { %v2031_v53 = vrot.slane %v2009_v44, %v4465_v2  ;;  %v2040_v6 = vcombine.high %v2017_v56, %v2024_v15  ;;  %v2039_v59 = vcombine.low %v2017_v56, %v2024_v15 }
 0x157   : > { %v2042_v4 = vcombine.high %v2031_v53, %v2038_v54  ;;  %v2041_v7 = vcombine.low %v2031_v53, %v2038_v54  ;;  %v2056_v8 = vrot.slane %v2040_v6, %v4465_v2  ;;  %v2049_v25 = vrot.slane %v2039_v59, %v4465_v2 }
 0x159   : > { %v2070_v45 = vrot.slane %v2042_v4, %v4465_v2  ;;  %v2063_v46 = vrot.slane %v2041_v7, %v4465_v2 }
 0x15b   : > { %2661 = vmatmul.mubr.bf16.gmra.mrb[20].mxu1 %v2418_v62  ;;  %v2072_v42 = vcombine.low %v2056_v8, %v2070_v45  ;;  %v2071_v55 = vcombine.low %v2049_v25, %v2063_v46 }
 0x15d   : > { %3969 = vmatprep.mubr.msk.bf16.mxu0 %vm701_vm0, %v2072_v42 }
 0x15e   : > { %2613 = vmatmul.mubr.bf16.gmra.mrb[24].mxu0 %v2071_v55 }
 0x188   : > { %v2566_v41 = vpop.f32.mrb[0].mxu0 }
 0x189   : > { %v2567_v39 = vadd.f32 %v4971_v1, %v2566_v41  ;;  %v2568_v33 = vpop.f32.mrb[1].mxu0 }
 0x18a   : > { %v2569_v61 = vpop.f32.mrb[2].mxu0 }
 0x18b   : > { %v2668_v2 = vmul.f32 0.1, %v2567_v39  ;;  %v2570_v28 = vadd.f32 %v4971_v1, %v2569_v61  ;;  %v2571_v40 = vpop.f32.mrb[3].mxu0 }
 0x18d   : > { %v2693_v18 = vmax.f32 %v2567_v39, %v2668_v2  ;;  %v2669_v21 = vmul.f32 0.1, %v2570_v28 }
 0x18f   : > { %v2743_v57 = vcombine.high %v2693_v18, %v2693_v18  ;;  %v2750_v26 = vrot.slane %v2693_v18, %v4975_v32  ;;  %v2694_v3 = vmax.f32 %v2570_v28, %v2669_v21 }
 0x191   : > { %v2757_v52 = vrot.slane %v2743_v57, %v4975_v32  ;;  %v2758_v16 = vcombine.high %v2750_v26, %v2750_v26  ;;  %v2760_v47 = vcombine.high %v2694_v3, %v2694_v3  ;;  %v2767_v13 = vrot.slane %v2694_v3, %v4975_v32 }
 0x193   : > { %v2759_v17 = vcombine.high %v2757_v52, %v2757_v52  ;;  %v3159_v19 = vcombine.low %v2750_v26, %v2758_v16  ;;  %v2774_v50 = vrot.slane %v2760_v47, %v4975_v32  ;;  %v2775_v38 = vcombine.high %v2767_v13, %v2767_v13 }
 0x195   : > { %v3160_v36 = vcombine.low %v2757_v52, %v2759_v17  ;;  %v3176_v0 = vcombine.low %v2767_v13, %v2775_v38  ;;  %v3167_v60 = vrot.slane %v3159_v19, %v4975_v32  ;;  %v3190_v12 = vrot.slane %v2774_v50, %v4975_v32 }
 0x196   : > { %v2776_v49 = vcombine.high %v2774_v50, %v2774_v50 }
 0x197   : > { %v3174_v63 = vrot.slane %v3160_v36, %v4975_v32  ;;  %v3183_v23 = vrot.slane %v3176_v0, %v4975_v32 }
 0x199   : > { %v3175_v48 = vcombine.low %v3167_v60, %v3174_v63  ;;  %v3191_v14 = vcombine.low %v3183_v23, %v3190_v12 }
 0x19b   : > { %v4007_v27 = vpack.c.bf16 %v3175_v48, %v3175_v48  ;;  %v4008_v35 = vpack.c.bf16 %v3191_v14, %v3191_v14 }
 0x19d   : > { %3762 = vst.msk [vmem:[%s4990_s24] sm:$0xf] %vm3761_vm7, %v4007_v27 }
 0x19e   : > { %3764 = vst.msk [vmem:[%s4990_s24 + $0x4] sm:$0x7] %vm3763_vm8, %v4008_v35  ;;  %v2574_v24 = vpop.f32.mrb[4].mxu0 }
 0x19f   : > { %v2575_v58 = vadd.f32 %v4971_v1, %v2574_v24  ;;  %v2576_v37 = vpop.f32.mrb[5].mxu0 }
 0x1a0   : > { %v2577_v29 = vpop.f32.mrb[6].mxu0 }
 0x1a1   : > { %v2670_v11 = vmul.f32 0.1, %v2575_v58  ;;  %v2578_v20 = vadd.f32 %v4971_v1, %v2577_v29  ;;  %v2579_v31 = vpop.f32.mrb[7].mxu0 }
 0x1a3   : > { %v2695_v10 = vmax.f32 %v2575_v58, %v2670_v11  ;;  %v2671_v30 = vmul.f32 0.1, %v2578_v20 }
 0x1a5   : > { %v2777_v43 = vcombine.high %v2695_v10, %v2695_v10  ;;  %v2784_v5 = vrot.slane %v2695_v10, %v4975_v32  ;;  %v2696_v9 = vmax.f32 %v2578_v20, %v2671_v30 }
 0x1a7   : > { %v2791_v44 = vrot.slane %v2777_v43, %v4975_v32  ;;  %v2792_v56 = vcombine.high %v2784_v5, %v2784_v5  ;;  %v3192_v15 = vcombine.low %v2776_v49, %v2784_v5  ;;  %v2801_v53 = vrot.slane %v2696_v9, %v4975_v32 }
 0x1a8   : > { %v2794_v40 = vcombine.high %v2696_v9, %v2696_v9 }
 0x1a9   : > { %v3193_v54 = vcombine.low %v2792_v56, %v2791_v44  ;;  %v2793_v6 = vcombine.high %v2791_v44, %v2791_v44  ;;  %v2809_v59 = vcombine.high %v2801_v53, %v2801_v53  ;;  %v3200_v4 = vrot.slane %v3192_v15, %v4975_v32 }
 0x1aa   : > { %v2808_v17 = vrot.slane %v2794_v40, %v4975_v32 }
 0x1ab   : > { %v3207_v7 = vrot.slane %v3193_v54, %v4975_v32  ;;  %v3209_v62 = vcombine.low %v2793_v6, %v2801_v53  ;;  %v3223_v25 = vrot.slane %v2809_v59, %v4975_v32 }
 0x1ac   : > { %v2810_v27 = vcombine.high %v2808_v17, %v2808_v17 }
 0x1ad   : > { %v3208_v8 = vcombine.low %v3200_v4, %v3207_v7  ;;  %v3216_v45 = vrot.slane %v3209_v62, %v4975_v32 }
 0x1ae   : > { %v3225_v5 = vcombine.low %v2808_v17, %v2810_v27 }
 0x1af   : > { %v4009_v46 = vpack.c.bf16 %v3208_v8, %v3208_v8  ;;  %v3224_v42 = vcombine.low %v3216_v45, %v3223_v25 }
 0x1b0   : > { %v3233_v25 = vrot.slane %v3225_v5, %v4975_v32 }
 0x1b1   : > { %3765 = vst.msk [vmem:[%s4990_s24 + $0x8] sm:$0xf] %vm3761_vm7, %v4009_v46  ;;  %v4010_v55 = vpack.c.bf16 %v3224_v42, %v3224_v42 }
 0x1b3   : > { %3766 = vst.msk [vmem:[%s4990_s24 + $0xc] sm:$0x7] %vm3763_vm8, %v4010_v55 }
 0x1bc   : > { %v2622_v34 = vpop.f32.mrb[0].mxu1 }
 0x1bd   : > { %v2623_v51 = vadd.f32 %v4971_v1, %v2622_v34  ;;  %v2624_v22 = vpop.f32.mrb[1].mxu1 }
 0x1be   : > { %v2625_v41 = vpop.f32.mrb[2].mxu1 }
 0x1bf   : > { %v2682_v39 = vmul.f32 0.1, %v2623_v51  ;;  %v2626_v33 = vadd.f32 %v4971_v1, %v2625_v41  ;;  %v2627_v61 = vpop.f32.mrb[3].mxu1 }
 0x1c1   : > { %v2707_v2 = vmax.f32 %v2623_v51, %v2682_v39  ;;  %v2683_v28 = vmul.f32 0.1, %v2626_v33 }
 0x1c3   : > { %v2981_v18 = vcombine.high %v2707_v2, %v2707_v2  ;;  %v2988_v21 = vrot.slane %v2707_v2, %v4975_v32  ;;  %v2708_v57 = vmax.f32 %v2626_v33, %v2683_v28 }
 0x1c5   : > { %v2995_v3 = vrot.slane %v2981_v18, %v4975_v32  ;;  %v2996_v52 = vcombine.high %v2988_v21, %v2988_v21  ;;  %v2998_v16 = vcombine.high %v2708_v57, %v2708_v57  ;;  %v3005_v47 = vrot.slane %v2708_v57, %v4975_v32 }
 0x1c6   : > { %v2582_v26 = vpop.f32.mrb[8].mxu0 }
 0x1c7   : > { %v2584_v13 = vpop.f32.mrb[9].mxu0  ;;  %v2583_v19 = vadd.f32 %v4971_v1, %v2582_v26  ;;  %v2997_v38 = vcombine.high %v2995_v3, %v2995_v3  ;;  %v3423_v36 = vcombine.low %v2988_v21, %v2996_v52  ;;  %v3012_v0 = vrot.slane %v2998_v16, %v4975_v32 }
 0x1c8   : > { %v2585_v50 = vpop.f32.mrb[10].mxu0  ;;  %v3013_v60 = vcombine.high %v3005_v47, %v3005_v47 }
 0x1c9   : > { %v2587_v63 = vpop.f32.mrb[11].mxu0  ;;  %v2672_v23 = vmul.f32 0.1, %v2583_v19  ;;  %v2586_v12 = vadd.f32 %v4971_v1, %v2585_v50  ;;  %v3424_v48 = vcombine.low %v2995_v3, %v2997_v38  ;;  %v3431_v58 = vrot.slane %v3423_v36, %v4975_v32 }
 0x1ca   : > { %v3440_v14 = vcombine.low %v3005_v47, %v3013_v60  ;;  %v3454_v11 = vrot.slane %v3012_v0, %v4975_v32  ;;  %v3014_v39 = vcombine.high %v3012_v0, %v3012_v0 }
 0x1cb   : > { %v2697_v35 = vmax.f32 %v2583_v19, %v2672_v23  ;;  %v2673_v24 = vmul.f32 0.1, %v2586_v12  ;;  %v3438_v37 = vrot.slane %v3424_v48, %v4975_v32 }
 0x1cc   : > { %v3447_v29 = vrot.slane %v3440_v14, %v4975_v32 }
 0x1cd   : > { %v2811_v20 = vcombine.high %v2697_v35, %v2697_v35  ;;  %v2818_v31 = vrot.slane %v2697_v35, %v4975_v32  ;;  %v2698_v10 = vmax.f32 %v2586_v12, %v2673_v24  ;;  %v3439_v30 = vcombine.low %v3431_v58, %v3438_v37 }
 0x1ce   : > { %v3455_v49 = vcombine.low %v3447_v29, %v3454_v11 }
 0x1cf   : > { %v2825_v9 = vrot.slane %v2811_v20, %v4975_v32  ;;  %v2826_v44 = vcombine.high %v2818_v31, %v2818_v31  ;;  %v4023_v15 = vpack.c.bf16 %v3439_v30, %v3439_v30  ;;  %v2835_v7 = vrot.slane %v2698_v10, %v4975_v32 }
 0x1d0   : > { %v2630_v43 = vpop.f32.mrb[4].mxu1  ;;  %v4024_v53 = vpack.c.bf16 %v3455_v49, %v3455_v49  ;;  %v2828_v13 = vcombine.high %v2698_v10, %v2698_v10 }
 0x1d1   : > { %v2632_v56 = vpop.f32.mrb[5].mxu1  ;;  %v2631_v54 = vadd.f32 %v4971_v1, %v2630_v43  ;;  %v2827_v59 = vcombine.high %v2825_v9, %v2825_v9  ;;  %v3226_v4 = vcombine.low %v2818_v31, %v2826_v44  ;;  %3779 = vst.msk [vmem:[%s4990_s24 + $0x40] sm:$0xf] %vm3761_vm7, %v4023_v15  ;;  %v3256_v41 = vrot.slane %v2835_v7, %v4975_v32 }
 0x1d2   : > { %v2633_v6 = vpop.f32.mrb[6].mxu1  ;;  %3780 = vst.msk [vmem:[%s4990_s24 + $0x44] sm:$0x7] %vm3763_vm8, %v4024_v53  ;;  %v2842_v12 = vrot.slane %v2828_v13, %v4975_v32  ;;  %v2843_v48 = vcombine.high %v2835_v7, %v2835_v7 }
 0x1d3   : > { %v2635_v62 = vpop.f32.mrb[7].mxu1  ;;  %v2684_v8 = vmul.f32 0.1, %v2631_v54  ;;  %v2634_v45 = vadd.f32 %v4971_v1, %v2633_v6  ;;  %v3240_v46 = vrot.slane %v3226_v4, %v4975_v32  ;;  %v3242_v42 = vcombine.low %v2825_v9, %v2827_v59 }
 0x1d4   : > { %v3258_v31 = vcombine.low %v2843_v48, %v2842_v12  ;;  %v2844_v10 = vcombine.high %v2842_v12, %v2842_v12 }
 0x1d5   : > { %v2709_v55 = vmax.f32 %v2631_v54, %v2684_v8  ;;  %v2685_v34 = vmul.f32 0.1, %v2634_v45  ;;  %v3241_v51 = vcombine.low %v3233_v25, %v3240_v46  ;;  %v3249_v22 = vrot.slane %v3242_v42, %v4975_v32 }
 0x1d6   : > { %v3266_v15 = vrot.slane %v3258_v31, %v4975_v32 }
 0x1d7   : > { %v3015_v33 = vcombine.high %v2709_v55, %v2709_v55  ;;  %v3022_v61 = vrot.slane %v2709_v55, %v4975_v32  ;;  %v2710_v2 = vmax.f32 %v2634_v45, %v2685_v34  ;;  %v4011_v28 = vpack.c.bf16 %v3241_v51, %v3241_v51 }
 0x1d8   : > { %v3257_v40 = vcombine.low %v3249_v22, %v3256_v41 }
 0x1d9   : > { %v3029_v18 = vrot.slane %v3015_v33, %v4975_v32  ;;  %v3030_v21 = vcombine.high %v3022_v61, %v3022_v61  ;;  %v3456_v57 = vcombine.low %v3014_v39, %v3022_v61  ;;  %3767 = vst.msk [vmem:[%s4990_s24 + $0x10] sm:$0xf] %vm3761_vm7, %v4011_v28  ;;  %v3039_v3 = vrot.slane %v2710_v2, %v4975_v32 }
 0x1da   : > { %v4012_v26 = vpack.c.bf16 %v3257_v40, %v3257_v40  ;;  %v3032_v7 = vcombine.high %v2710_v2, %v2710_v2 }
 0x1db   : > { %v3457_v52 = vcombine.low %v3030_v21, %v3029_v18  ;;  %v3031_v16 = vcombine.high %v3029_v18, %v3029_v18  ;;  %v3047_v47 = vcombine.high %v3039_v3, %v3039_v3  ;;  %v3464_v17 = vrot.slane %v3456_v57, %v4975_v32 }
 0x1dc   : > { %3768 = vst.msk [vmem:[%s4990_s24 + $0x14] sm:$0x7] %vm3763_vm8, %v4012_v26  ;;  %v3046_v22 = vrot.slane %v3032_v7, %v4975_v32 }
 0x1dd   : > { %v3471_v19 = vrot.slane %v3457_v52, %v4975_v32  ;;  %v3473_v50 = vcombine.low %v3031_v16, %v3039_v3  ;;  %v3487_v0 = vrot.slane %v3047_v47, %v4975_v32 }
 0x1de   : > { %v3048_v3 = vcombine.high %v3046_v22, %v3046_v22 }
 0x1df   : > { %v3472_v38 = vcombine.low %v3464_v17, %v3471_v19  ;;  %v3480_v36 = vrot.slane %v3473_v50, %v4975_v32 }
 0x1e0   : > { %v2590_v60 = vpop.f32.mrb[12].mxu0  ;;  %v3489_v50 = vcombine.low %v3046_v22, %v3048_v3 }
 0x1e1   : > { %v2591_v63 = vadd.f32 %v4971_v1, %v2590_v60  ;;  %v2592_v23 = vpop.f32.mrb[13].mxu0  ;;  %v4025_v14 = vpack.c.bf16 %v3472_v38, %v3472_v38  ;;  %v3488_v27 = vcombine.low %v3480_v36, %v3487_v0 }
 0x1e2   : > { %v2593_v35 = vpop.f32.mrb[14].mxu0  ;;  %v3497_v23 = vrot.slane %v3489_v50, %v4975_v32 }
 0x1e3   : > { %v2674_v24 = vmul.f32 0.1, %v2591_v63  ;;  %v2594_v58 = vadd.f32 %v4971_v1, %v2593_v35  ;;  %v2595_v37 = vpop.f32.mrb[15].mxu0  ;;  %3781 = vst.msk [vmem:[%s4990_s24 + $0x48] sm:$0xf] %vm3761_vm7, %v4025_v14  ;;  %v4026_v29 = vpack.c.bf16 %v3488_v27, %v3488_v27 }
 0x1e5   : > { %v2699_v11 = vmax.f32 %v2591_v63, %v2674_v24  ;;  %v2675_v20 = vmul.f32 0.1, %v2594_v58  ;;  %3782 = vst.msk [vmem:[%s4990_s24 + $0x4c] sm:$0x7] %vm3763_vm8, %v4026_v29 }
 0x1e7   : > { %v2845_v30 = vcombine.high %v2699_v11, %v2699_v11  ;;  %v2852_v49 = vrot.slane %v2699_v11, %v4975_v32  ;;  %v2700_v43 = vmax.f32 %v2594_v58, %v2675_v20 }
 0x1e9   : > { %v2859_v5 = vrot.slane %v2845_v30, %v4975_v32  ;;  %v2860_v9 = vcombine.high %v2852_v49, %v2852_v49  ;;  %v3259_v44 = vcombine.low %v2844_v10, %v2852_v49  ;;  %v2862_v56 = vcombine.high %v2700_v43, %v2700_v43 }
 0x1ea   : > { %v2869_v53 = vrot.slane %v2700_v43, %v4975_v32 }
 0x1eb   : > { %v2861_v54 = vcombine.high %v2859_v5, %v2859_v5  ;;  %v3273_v6 = vrot.slane %v3259_v44, %v4975_v32  ;;  %v3275_v59 = vcombine.low %v2860_v9, %v2859_v5  ;;  %v2876_v4 = vrot.slane %v2862_v56, %v4975_v32 }
 0x1ec   : > { %v2877_v62 = vcombine.high %v2869_v53, %v2869_v53 }
 0x1ed   : > { %v3274_v8 = vcombine.low %v3266_v15, %v3273_v6  ;;  %v3282_v45 = vrot.slane %v3275_v59, %v4975_v32  ;;  %v3289_v25 = vrot.slane %v2861_v54, %v4975_v32  ;;  %v2878_v46 = vcombine.high %v2876_v4, %v2876_v4 }
 0x1ee   : > { %v3291_v42 = vcombine.low %v2869_v53, %v2877_v62 }
 0x1ef   : > { %v3290_v55 = vcombine.low %v3282_v45, %v3289_v25  ;;  %v4013_v34 = vpack.c.bf16 %v3274_v8, %v3274_v8  ;;  %v3292_v51 = vcombine.low %v2876_v4, %v2878_v46 }
 0x1f0   : > { %v2638_v41 = vpop.f32.mrb[8].mxu1  ;;  %v3299_v33 = vrot.slane %v3291_v42, %v4975_v32 }
 0x1f1   : > { %v4014_v39 = vpack.c.bf16 %v3290_v55, %v3290_v55  ;;  %3769 = vst.msk [vmem:[%s4990_s24 + $0x18] sm:$0xf] %vm3761_vm7, %v4013_v34  ;;  %v3306_v61 = vrot.slane %v3292_v51, %v4975_v32  ;;  %v2639_v2 = vadd.f32 %v4971_v1, %v2638_v41  ;;  %v2640_v28 = vpop.f32.mrb[9].mxu1 }
 0x1f2   : > { %v2641_v40 = vpop.f32.mrb[10].mxu1 }
 0x1f3   : > { %3770 = vst.msk [vmem:[%s4990_s24 + $0x1c] sm:$0x7] %vm3763_vm8, %v4014_v39  ;;  %v3307_v18 = vcombine.low %v3299_v33, %v3306_v61  ;;  %v2686_v21 = vmul.f32 0.1, %v2639_v2  ;;  %v2642_v57 = vadd.f32 %v4971_v1, %v2641_v40  ;;  %v2643_v26 = vpop.f32.mrb[11].mxu1 }
 0x1f5   : > { %v4015_v52 = vpack.c.bf16 %v3307_v18, %v3307_v18  ;;  %v2711_v16 = vmax.f32 %v2639_v2, %v2686_v21  ;;  %v2687_v47 = vmul.f32 0.1, %v2642_v57 }
 0x1f7   : > { %3771 = vst.msk [vmem:[%s4990_s24 + $0x20] sm:$0xf] %vm3761_vm7, %v4015_v52  ;;  %v3049_v13 = vcombine.high %v2711_v16, %v2711_v16  ;;  %v3056_v17 = vrot.slane %v2711_v16, %v4975_v32  ;;  %v2712_v19 = vmax.f32 %v2642_v57, %v2687_v47 }
 0x1f9   : > { %v3063_v38 = vrot.slane %v3049_v13, %v4975_v32  ;;  %v3064_v36 = vcombine.high %v3056_v17, %v3056_v17  ;;  %v3073_v63 = vrot.slane %v2712_v19, %v4975_v32  ;;  %v3066_v34 = vcombine.high %v2712_v19, %v2712_v19 }
 0x1fb   : > { %v3065_v0 = vcombine.high %v3063_v38, %v3063_v38  ;;  %v3490_v60 = vcombine.low %v3056_v17, %v3064_v36  ;;  %v3520_v37 = vrot.slane %v3073_v63, %v4975_v32  ;;  %v3080_v2 = vrot.slane %v3066_v34, %v4975_v32 }
 0x1fc   : > { %v2598_v14 = vpop.f32.mrb[16].mxu0  ;;  %v3081_v28 = vcombine.high %v3073_v63, %v3073_v63 }
 0x1fd   : > { %v3504_v12 = vrot.slane %v3490_v60, %v4975_v32  ;;  %v3506_v48 = vcombine.low %v3063_v38, %v3065_v0  ;;  %v2599_v27 = vadd.f32 %v4971_v1, %v2598_v14  ;;  %v2600_v35 = vpop.f32.mrb[17].mxu0  ;;  %v3082_v47 = vcombine.high %v3080_v2, %v3080_v2 }
 0x1fe   : > { %v2601_v29 = vpop.f32.mrb[18].mxu0  ;;  %v3522_v16 = vcombine.low %v3081_v28, %v3080_v2 }
 0x1ff   : > { %v3505_v24 = vcombine.low %v3497_v23, %v3504_v12  ;;  %v3513_v58 = vrot.slane %v3506_v48, %v4975_v32  ;;  %v2676_v11 = vmul.f32 0.1, %v2599_v27  ;;  %v2602_v20 = vadd.f32 %v4971_v1, %v2601_v29  ;;  %v2603_v31 = vpop.f32.mrb[19].mxu0 }
 0x200   : > { %v3530_v60 = vrot.slane %v3522_v16, %v4975_v32 }
 0x201   : > { %v4027_v10 = vpack.c.bf16 %v3505_v24, %v3505_v24  ;;  %v3521_v30 = vcombine.low %v3513_v58, %v3520_v37  ;;  %v2701_v49 = vmax.f32 %v2599_v27, %v2676_v11  ;;  %v2677_v43 = vmul.f32 0.1, %v2602_v20 }
 0x203   : > { %3783 = vst.msk [vmem:[%s4990_s24 + $0x50] sm:$0xf] %vm3761_vm7, %v4027_v10  ;;  %v4028_v5 = vpack.c.bf16 %v3521_v30, %v3521_v30  ;;  %v2879_v9 = vcombine.high %v2701_v49, %v2701_v49  ;;  %v2886_v44 = vrot.slane %v2701_v49, %v4975_v32  ;;  %v2702_v56 = vmax.f32 %v2602_v20, %v2677_v43 }
 0x205   : > { %3784 = vst.msk [vmem:[%s4990_s24 + $0x54] sm:$0x7] %vm3763_vm8, %v4028_v5  ;;  %v2893_v15 = vrot.slane %v2879_v9, %v4975_v32  ;;  %v2894_v53 = vcombine.high %v2886_v44, %v2886_v44  ;;  %v2896_v54 = vcombine.high %v2702_v56, %v2702_v56  ;;  %v2903_v6 = vrot.slane %v2702_v56, %v4975_v32 }
 0x207   : > { %v3308_v59 = vcombine.low %v2886_v44, %v2894_v53  ;;  %v2895_v4 = vcombine.high %v2893_v15, %v2893_v15  ;;  %v5089_v7 = vrot.slane %v2896_v54, %v4975_v32  ;;  %v2911_v62 = vcombine.high %v2903_v6, %v2903_v6 }
 0x208   : > { %v3322_v45 = vrot.slane %v2893_v15, %v4975_v32 }
 0x209   : > { %v3315_v8 = vrot.slane %v3308_v59, %v4975_v32  ;;  %v3324_v25 = vcombine.low %v2895_v4, %v2903_v6  ;;  %v3325_v46 = vcombine.low %v2911_v62, %v5089_v7  ;;  %v2912_v62 = vcombine.high %v5089_v7, %v5089_v7 }
 0x20b   : > { %v3323_v42 = vcombine.low %v3315_v8, %v3322_v45  ;;  %v3332_v55 = vrot.slane %v3324_v25, %v4975_v32  ;;  %v3339_v51 = vrot.slane %v3325_v46, %v4975_v32 }
 0x20d   : > { %v4016_v22 = vpack.c.bf16 %v3323_v42, %v3323_v42  ;;  %v3340_v41 = vcombine.low %v3332_v55, %v3339_v51 }
 0x20e   : > { %v2646_v39 = vpop.f32.mrb[12].mxu1 }
 0x20f   : > { %3772 = vst.msk [vmem:[%s4990_s24 + $0x24] sm:$0x7] %vm3763_vm8, %v4016_v22  ;;  %v2647_v33 = vadd.f32 %v4971_v1, %v2646_v39  ;;  %v2648_v61 = vpop.f32.mrb[13].mxu1  ;;  %v4017_v40 = vpack.c.bf16 %v3340_v41, %v3340_v41 }
 0x210   : > { %v2649_v18 = vpop.f32.mrb[14].mxu1 }
 0x211   : > { %v2688_v21 = vmul.f32 0.1, %v2647_v33  ;;  %v2650_v57 = vadd.f32 %v4971_v1, %v2649_v18  ;;  %v2651_v26 = vpop.f32.mrb[15].mxu1  ;;  %3773 = vst.msk [vmem:[%s4990_s24 + $0x28] sm:$0xf] %vm3761_vm7, %v4017_v40 }
 0x213   : > { %v2713_v3 = vmax.f32 %v2647_v33, %v2688_v21  ;;  %v2689_v52 = vmul.f32 0.1, %v2650_v57 }
 0x215   : > { %v3083_v13 = vcombine.high %v2713_v3, %v2713_v3  ;;  %v3090_v17 = vrot.slane %v2713_v3, %v4975_v32  ;;  %v2714_v19 = vmax.f32 %v2650_v57, %v2689_v52 }
 0x217   : > { %v3097_v50 = vrot.slane %v3083_v13, %v4975_v32  ;;  %v3098_v38 = vcombine.high %v3090_v17, %v3090_v17  ;;  %v3523_v36 = vcombine.low %v3082_v47, %v3090_v17  ;;  %v3100_v0 = vcombine.high %v2714_v19, %v2714_v19 }
 0x218   : > { %v3107_v63 = vrot.slane %v2714_v19, %v4975_v32 }
 0x219   : > { %v3099_v23 = vcombine.high %v3097_v50, %v3097_v50  ;;  %v3537_v12 = vrot.slane %v3523_v36, %v4975_v32  ;;  %v3539_v48 = vcombine.low %v3098_v38, %v3097_v50  ;;  %v3114_v14 = vrot.slane %v3100_v0, %v4975_v32 }
 0x21a   : > { %v3115_v27 = vcombine.high %v3107_v63, %v3107_v63 }
 0x21b   : > { %v3538_v35 = vcombine.low %v3530_v60, %v3537_v12  ;;  %v3546_v24 = vrot.slane %v3539_v48, %v4975_v32  ;;  %v3553_v58 = vrot.slane %v3099_v23, %v4975_v32  ;;  %v3116_v37 = vcombine.high %v3114_v14, %v3114_v14 }
 0x21c   : > { %v3555_v29 = vcombine.low %v3107_v63, %v3115_v27 }
 0x21d   : > { %v3554_v11 = vcombine.low %v3546_v24, %v3553_v58  ;;  %v4029_v20 = vpack.c.bf16 %v3538_v35, %v3538_v35  ;;  %v3556_v31 = vcombine.low %v3114_v14, %v3116_v37 }
 0x21e   : > { %v2606_v10 = vpop.f32.mrb[20].mxu0  ;;  %v3563_v5 = vrot.slane %v3555_v29, %v4975_v32 }
 0x21f   : > { %v2607_v30 = vadd.f32 %v4971_v1, %v2606_v10  ;;  %v2608_v49 = vpop.f32.mrb[21].mxu0  ;;  %v4030_v43 = vpack.c.bf16 %v3554_v11, %v3554_v11  ;;  %3785 = vst.msk [vmem:[%s4990_s24 + $0x58] sm:$0xf] %vm3761_vm7, %v4029_v20  ;;  %v3570_v9 = vrot.slane %v3556_v31, %v4975_v32 }
 0x220   : > { %v2609_v44 = vpop.f32.mrb[22].mxu0 }
 0x221   : > { %v2678_v56 = vmul.f32 0.1, %v2607_v30  ;;  %v2610_v15 = vadd.f32 %v4971_v1, %v2609_v44  ;;  %v2611_v53 = vpop.f32.mrb[23].mxu0  ;;  %3786 = vst.msk [vmem:[%s4990_s24 + $0x5c] sm:$0x7] %vm3763_vm8, %v4030_v43  ;;  %v3571_v54 = vcombine.low %v3563_v5, %v3570_v9 }
 0x223   : > { %v2703_v6 = vmax.f32 %v2607_v30, %v2678_v56  ;;  %v2679_v59 = vmul.f32 0.1, %v2610_v15  ;;  %v4031_v4 = vpack.c.bf16 %v3571_v54, %v3571_v54 }
 0x225   : > { %v2913_v8 = vcombine.high %v2703_v6, %v2703_v6  ;;  %v2920_v45 = vrot.slane %v2703_v6, %v4975_v32  ;;  %v2704_v25 = vmax.f32 %v2610_v15, %v2679_v59  ;;  %3787 = vst.msk [vmem:[%s4990_s24 + $0x60] sm:$0xf] %vm3761_vm7, %v4031_v4 }
 0x226   : > { %v2654_v34 = vpop.f32.mrb[16].mxu1 }
 0x227   : > { %v2927_v46 = vrot.slane %v2913_v8, %v4975_v32  ;;  %v2928_v42 = vcombine.high %v2920_v45, %v2920_v45  ;;  %v3341_v55 = vcombine.low %v2912_v62, %v2920_v45  ;;  %v2937_v51 = vrot.slane %v2704_v25, %v4975_v32  ;;  %v2656_v41 = vpop.f32.mrb[17].mxu1 }
 0x228   : > { %v2655_v22 = vadd.f32 %v4971_v1, %v2654_v34  ;;  %v2930_v61 = vcombine.high %v2704_v25, %v2704_v25  ;;  %v2657_v2 = vpop.f32.mrb[18].mxu1 }
 0x229   : > { %v2929_v39 = vcombine.high %v2927_v46, %v2927_v46  ;;  %v3348_v33 = vrot.slane %v3341_v55, %v4975_v32  ;;  %v3355_v7 = vrot.slane %v2928_v42, %v4975_v32  ;;  %v2945_v28 = vcombine.high %v2937_v51, %v2937_v51  ;;  %v2659_v21 = vpop.f32.mrb[19].mxu1 }
 0x22a   : > { %v2690_v40 = vmul.f32 0.1, %v2655_v22  ;;  %v2658_v18 = vadd.f32 %v4971_v1, %v2657_v2  ;;  %v2944_v17 = vrot.slane %v2930_v61, %v4975_v32 }
 0x22b   : > { %v3356_v57 = vcombine.low %v3348_v33, %v3355_v7  ;;  %v3357_v26 = vcombine.low %v2927_v46, %v2929_v39  ;;  %v3358_v3 = vcombine.low %v2937_v51, %v2945_v28 }
 0x22c   : > { %v2715_v52 = vmax.f32 %v2655_v22, %v2690_v40  ;;  %v2691_v16 = vmul.f32 0.1, %v2658_v18  ;;  %v2946_v24 = vcombine.high %v2944_v17, %v2944_v17 }
 0x22d   : > { %v3365_v47 = vrot.slane %v3357_v26, %v4975_v32  ;;  %v4018_v13 = vpack.c.bf16 %v3356_v57, %v3356_v57  ;;  %v3372_v19 = vrot.slane %v3358_v3, %v4975_v32 }
 0x22e   : > { %v3117_v50 = vcombine.high %v2715_v52, %v2715_v52  ;;  %v3124_v38 = vrot.slane %v2715_v52, %v4975_v32  ;;  %v2716_v36 = vmax.f32 %v2658_v18, %v2691_v16  ;;  %v2662_v0 = vpop.f32.mrb[20].mxu1  ;;  %v3374_v59 = vcombine.low %v2944_v17, %v2946_v24 }
 0x22f   : > { %3774 = vst.msk [vmem:[%s4990_s24 + $0x2c] sm:$0x7] %vm3763_vm8, %v4018_v13  ;;  %v3373_v60 = vcombine.low %v3365_v47, %v3372_v19  ;;  %v2664_v48 = vpop.f32.mrb[21].mxu1  ;;  %v2663_v27 = vadd.f32 %v4971_v1, %v2662_v0 }
 0x230   : > { %v3131_v63 = vrot.slane %v3117_v50, %v4975_v32  ;;  %v3132_v23 = vcombine.high %v3124_v38, %v3124_v38  ;;  %v3134_v12 = vcombine.high %v2716_v36, %v2716_v36  ;;  %v3141_v14 = vrot.slane %v2716_v36, %v4975_v32  ;;  %v2665_v35 = vpop.f32.mrb[22].mxu1 }
 0x231   : > { %v4019_v58 = vpack.c.bf16 %v3373_v60, %v3373_v60  ;;  %v2614_v11 = vpop.f32.mrb[24].mxu0  ;;  %v2666_v20 = vpop.f32.mrb[23].mxu1  ;;  %v2692_v30 = vmul.f32 0.1, %v2663_v27  ;;  %v3381_v7 = vrot.slane %v3374_v59, %v4975_v32 }
 0x232   : > { %v3572_v37 = vcombine.low %v3124_v38, %v3132_v23  ;;  %v3133_v29 = vcombine.high %v3131_v63, %v3131_v63  ;;  %v3148_v31 = vrot.slane %v3134_v12, %v4975_v32  ;;  %v3149_v10 = vcombine.high %v3141_v14, %v3141_v14  ;;  %v2616_v43 = vpop.f32.mrb[25].mxu0 }
 0x233   : > { %v2615_v49 = vadd.f32 %v4971_v1, %v2614_v11  ;;  %3775 = vst.msk [vmem:[%s4990_s24 + $0x30] sm:$0xf] %vm3761_vm7, %v4019_v58  ;;  %v3586_v9 = vrot.slane %v3131_v63, %v4975_v32  ;;  %v2617_v56 = vpop.f32.mrb[26].mxu0  ;;  %v2717_v53 = vmax.f32 %v2663_v27, %v2692_v30 }
 0x234   : > { %v3579_v5 = vrot.slane %v3572_v37, %v4975_v32  ;;  %v3588_v44 = vcombine.low %v3133_v29, %v3141_v14  ;;  %v3589_v15 = vcombine.low %v3149_v10, %v3148_v31  ;;  %v2619_v6 = vpop.f32.mrb[27].mxu0  ;;  %v2618_v8 = vadd.f32 %v4971_v1, %v2617_v56 }
 0x235   : > { %v2680_v54 = vmul.f32 0.1, %v2615_v49  ;;  %v3150_v25 = vcombine.high %v3148_v31, %v3148_v31  ;;  %v3157_v46 = vrot.slane %v2717_v53, %v4975_v32 }
 0x236   : > { %v3587_v4 = vcombine.low %v3579_v5, %v3586_v9  ;;  %v3596_v62 = vrot.slane %v3588_v44, %v4975_v32  ;;  %v3603_v45 = vrot.slane %v3589_v15, %v4975_v32  ;;  %v2681_v34 = vmul.f32 0.1, %v2618_v8 }
 0x237   : > { %v2705_v42 = vmax.f32 %v2615_v49, %v2680_v54  ;;  %v3158_v22 = vcombine.high %v3157_v46, %v3157_v46  ;;  %v3605_v41 = vcombine.low %v3150_v25, %v3157_v46 }
 0x238   : > { %v4032_v55 = vpack.c.bf16 %v3587_v4, %v3587_v4  ;;  %v3604_v51 = vcombine.low %v3596_v62, %v3603_v45  ;;  %v2706_v1 = vmax.f32 %v2618_v8, %v2681_v34 }
 0x239   : > { %v2947_v39 = vcombine.high %v2705_v42, %v2705_v42  ;;  %v2954_v33 = vrot.slane %v2705_v42, %v4975_v32  ;;  %v3612_v2 = vrot.slane %v3605_v41, %v4975_v32  ;;  %v3619_v28 = vrot.slane %v3158_v22, %v4975_v32 }
 0x23a   : > { %3788 = vst.msk [vmem:[%s4990_s24 + $0x64] sm:$0x7] %vm3763_vm8, %v4032_v55  ;;  %v4033_v61 = vpack.c.bf16 %v3604_v51, %v3604_v51  ;;  %v2964_v57 = vcombine.high %v2706_v1, %v2706_v1  ;;  %v2971_v26 = vrot.slane %v2706_v1, %v4975_v32 }
 0x23b   : > { %v2961_v40 = vrot.slane %v2947_v39, %v4975_v32  ;;  %v2962_v18 = vcombine.high %v2954_v33, %v2954_v33  ;;  %v3388_v21 = vrot.slane %v2954_v33, %v4975_v32  ;;  %v3620_v3 = vcombine.low %v3612_v2, %v3619_v28 }
 0x23c   : > { %3789 = vst.msk [vmem:[%s4990_s24 + $0x68] sm:$0xf] %vm3761_vm7, %v4033_v61  ;;  %v2978_v13 = vrot.slane %v2964_v57, %v4975_v32  ;;  %v2979_v17 = vcombine.high %v2971_v26, %v2971_v26 }
 0x23d   : > { %v2963_v52 = vcombine.high %v2961_v40, %v2961_v40  ;;  %v3389_v16 = vcombine.low %v3381_v7, %v3388_v21  ;;  %v3390_v47 = vcombine.low %v2962_v18, %v2961_v40  ;;  %v4034_v19 = vpack.c.bf16 %v3620_v3, %v3620_v3 }
 0x23e   : > { %v2980_v36 = vcombine.high %v2978_v13, %v2978_v13  ;;  %v3407_v0 = vcombine.low %v2979_v17, %v2978_v13 }
 0x23f   : > { %v3391_v50 = vcombine.low %v2963_v52, %v2971_v26  ;;  %v4020_v38 = vpack.c.bf16 %v3389_v16, %v3389_v16  ;;  %3790 = vst.msk [vmem:[%s4990_s24 + $0x6c] sm:$0x7] %vm3763_vm8, %v4034_v19  ;;  %v3398_v60 = vrot.slane %v3390_v47, %v4975_v32 }
 0x240   : > { %v3414_v23 = vrot.slane %v3407_v0, %v4975_v32  ;;  %v3421_v12 = vrot.slane %v2980_v36, %v4975_v32 }
 0x241   : > { %v3405_v63 = vrot.slane %v3391_v50, %v4975_v32  ;;  %3776 = vst.msk [vmem:[%s4990_s24 + $0x34] sm:$0x7] %vm3763_vm8, %v4020_v38 }
 0x242   : > { %v3422_v14 = vcombine.low %v3414_v23, %v3421_v12 }
 0x243   : > { %v3406_v48 = vcombine.low %v3398_v60, %v3405_v63 }
 0x244   : > { %v4022_v35 = vpack.c.bf16 %v3422_v14, %v3422_v14 }
 0x245   : > { %v4021_v27 = vpack.c.bf16 %v3406_v48, %v3406_v48 }
 0x246   : > { %3778 = vst.msk [vmem:[%s4990_s24 + $0x3c] sm:$0x7] %vm3763_vm8, %v4022_v35 }
 0x247   : > { %3777 = vst.msk [vmem:[%s4990_s24 + $0x38] sm:$0xf] %vm3761_vm7, %v4021_v27 }
 0x248 PF: > { %s13_s14 = sadd.s32 1, %s4138_s14   ;;  %s5186_s12 = smov %s4134_s13 }
 0x249   : > { %p10_p5 = scmp.ge.s32.totalorder %s13_s14, 4   ;;  %s5187_s13 = smov %s5189_s15 }
 0x24b   :  { %12 = sbr.rel (!%p10_p5) target bundleno = 2 (0x2), region = 69 }

// kernel: residual_block_forward.3
= control target key start
LH: loop header
LB: loop body
LE: loop exit
PB: predicated region body
PF: predicated region fallthrough
CT: control target
= control target key end

     0   :  { %s4221_s12 = smov 0   ;;  %s4223_s13 = smov 0   ;;  %s5351_s0 = inlined_call_operand.vmem [shape: bf16[2,14,14,8], index: 0, kind: input, shape index: {}]   ;;  %s5352_s1 = inlined_call_operand.vmem [shape: bf16[72,16], index: 1, kind: input, shape index: {}]   ;;  %s5353_s2 = inlined_call_operand.vmem [shape: f32[1,16], index: 2, kind: input, shape index: {}]   ;;  %s5354_s3 = inlined_call_operand.vmem [shape: bf16[2,14,14,16], index: 3, kind: output, shape index: {}]  }
   0x1   :  { %s4225_s14 = smov 0  }
   0x2 LB: > { %s32_s15 = sadd.s32 1, %s4182_s13  ;;  %p3909_p0 = scmp.ge.s32.totalorder %s4186_s14, 1  ;;  %s4186_s14 = sphi %s4225_s14, %s13_s14   ;;  %s4182_s13 = sphi %s4223_s13, %s5358_s13   ;;  %s4178_s12 = sphi %s4221_s12, %s5357_s12  }
   0x3   : > { %p34_p1 = scmp.ge.s32.totalorder %s32_s15, 2  ;;  %p177_p2 = scmp.lt.s32.totalorder %s4186_s14, 3 }
   0x5   : > { %s5360_s15 = smov (%p34_p1, %s32_s15), 0  ;;  %p178_p3 = pnand %p3909_p0, %p177_p2 }
   0x6   : > { %vm257_vm0 = vcmask (!%p178_p3), 64512   ;;  %v4188_v0 = vmov (!%p178_p3), 0   ;;  %p216_p4 = scmp.lt.s32.totalorder (!%p178_p3), %s4178_s12, 1  ;;  %vm486_vm1 = vsmask.f32 (!%p178_p3), 7426  ;;  %s4189_s20 = smov (!%p178_p3), 16  }
   0x7   : > { %181 = sbr.rel (%p178_p3) target bundleno = 616 (0x268), region = 32  ;;  %258 = vst.msk [vmem:[#allocation2] sm:$0xff] (!%p178_p3), %vm257_vm0, %v4188_v0  ;;  %259 = vst.msk [vmem:[#allocation2 + $0x8] sm:$0xff] (!%p178_p3), %vm257_vm0, %v4188_v0  ;;  %s4190_s21 = smov (!%p178_p3), 8   ;;  %vm4198_vm3 = vmmov (!%p178_p3), 0   ;;  %vm2511_vm4 = vcmask (!%p178_p3), 1043456  }
   0x8   : > { %260 = vst.msk [vmem:[#allocation2 + $0x10] sm:$0xff] (!%p178_p3), %vm257_vm0, %v4188_v0  ;;  %261 = vst.msk [vmem:[#allocation2 + $0x18] sm:$0xff] (!%p178_p3), %vm257_vm0, %v4188_v0  ;;  %s4191_s22 = smov (!%p178_p3), 24   ;;  %s4192_s23 = smov (!%p178_p3), 48   ;;  %vm945_vm5 = vcmask (!%p178_p3), 130048   ;;  %vm974_vm6 = vcmask (!%p178_p3), 195584  }
   0x9   : > { %262 = vst.msk [vmem:[#allocation2 + $0x20] sm:$0xff] (!%p178_p3), %vm257_vm0, %v4188_v0  ;;  %263 = vst.msk [vmem:[#allocation2 + $0x28] sm:$0xff] (!%p178_p3), %vm257_vm0, %v4188_v0  ;;  %s4193_s24 = smov (!%p178_p3), 40   ;;  %s4194_s25 = smov (!%p178_p3), 64   ;;  %vm1003_vm7 = vcmask (!%p178_p3), 261120   ;;  %vm1032_vm8 = vcmask (!%p178_p3), 326656  }
   0xa   : > { %264 = vst.msk [vmem:[#allocation2 + $0x30] sm:$0xff] (!%p178_p3), %vm257_vm0, %v4188_v0  ;;  %265 = vst.msk [vmem:[#allocation2 + $0x38] sm:$0xff] (!%p178_p3), %vm257_vm0, %v4188_v0  ;;  %s4195_s26 = smov (!%p178_p3), 32   ;;  %s4196_s29 = smov (!%p178_p3), 56   ;;  %vm1061_vm9 = vcmask (!%p178_p3), 392192   ;;  %vm1090_vm10 = vcmask (!%p178_p3), 457728  }
   0xb   : > { %266 = vst.msk [vmem:[#allocation2 + $0x40] sm:$0xff] (!%p178_p3), %vm257_vm0, %v4188_v0  ;;  %267 = vst.msk [vmem:[#allocation2 + $0x48] sm:$0xff] (!%p178_p3), %vm257_vm0, %v4188_v0  ;;  %vm1119_vm11 = vcmask (!%p178_p3), 523264   ;;  %vm2471_vm12 = vcmask (!%p178_p3), 588800   ;;  %vm3744_vm13 = vcmask (!%p178_p3), 125952   ;;  %vm3746_vm14 = vcmask (!%p178_p3), 124928  }
   0xc   : > { %268 = vst.msk [vmem:[#allocation2 + $0x50] sm:$0xff] (!%p178_p3), %vm257_vm0, %v4188_v0  ;;  %269 = vst.msk [vmem:[#allocation2 + $0x58] sm:$0xff] (!%p178_p3), %vm257_vm0, %v4188_v0 }
   0xd   : > { %270 = vst.msk [vmem:[#allocation2 + $0x60] sm:$0xff] (!%p178_p3), %vm257_vm0, %v4188_v0  ;;  %271 = vst.msk [vmem:[#allocation2 + $0x68] sm:$0xff] (!%p178_p3), %vm257_vm0, %v4188_v0 }
   0xe   : > { %272 = vst.msk [vmem:[#allocation2 + $0x70] sm:$0xff] %vm257_vm0, %v4188_v0  ;;  %273 = vst.msk [vmem:[#allocation2 + $0x78] sm:$0xff] %vm257_vm0, %v4188_v0  ;;  %s5362_s12 = smov (!%p216_p4, %s4178_s12), 1  ;;  %v4265_v1 = vld [vmem:[#allocation2] sm:$0xff]  ;;  %v488_v18 = vld [vmem:[#allocation2 + $0x8] sm:$0xff] }
   0xf   : > { %s4100_s16 = smul.u32 112, %s5362_s12  ;;  %v688_v2 = vrot.slane %v4265_v1, 1  ;;  %v549_v3 = vshrl.u32 %v4265_v1, 16  ;;  %v551_v4 = vshll.u32 %v4265_v1, 16  ;;  %v491_v15 = vld [vmem:[#allocation2 + $0x10] sm:$0xff]  ;;  %vm4276_vm2 = vmand %vm257_vm0, %vm486_vm1  ;;  %v494_v28 = vld [vmem:[#allocation2 + $0x18] sm:$0xff] }
  0x10   : > { %v497_v58 = vld [vmem:[#allocation2 + $0x20] sm:$0xff] }
  0x11   : > { %s4263_s19 = scalar_lea.vmem %s5351_s0, %s4100_s16  ;;  %702 = vrot.lane.b32.xlu0 %v688_v2, %s4189_s20  ;;  %v553_v7 = vrot.slane %v551_v4, 1 }
  0x12   : > { %v4138_v5 = vld [vmem:[%s4263_s19 + $0x8] sm:$0x7f]   ;;  %v4139_v6 = vld [vmem:[%s4263_s19] sm:$0x7f]   ;;  %v4140_v12 = vld [vmem:[%s4263_s19 + $0x10] sm:$0x7f]  }
  0x13   : > { %v380_v8 = vshrl.u32 %v4138_v5, 16  ;;  %v383_v9 = vshll.u32 %v4138_v5, 16  ;;  %v373_v10 = vshrl.u32 %v4139_v6, 16  ;;  %v376_v11 = vshll.u32 %v4139_v6, 16  ;;  %v4141_v21 = vld [vmem:[%s4263_s19 + $0x38] sm:$0x7f]  }
  0x14   : > { %v554_v13 = vor.u32 %v553_v7, %v549_v3  ;;  %v387_v19 = vshrl.u32 %v4140_v12, 16  ;;  %v390_v20 = vshll.u32 %v4140_v12, 16  ;;  %v4142_v23 = vld [vmem:[%s4263_s19 + $0x40] sm:$0x7f]   ;;  %v422_v26 = vshrl.u32 %v4141_v21, 16  ;;  %v512_v45 = vld [vmem:[#allocation2 + $0x48] sm:$0xff] }
  0x15   : > { %v382_v14 = vrot.slane %v380_v8, 7  ;;  %v375_v17 = vrot.slane %v373_v10, 7  ;;  %v429_v29 = vshrl.u32 %v4142_v23, 16  ;;  %v4143_v30 = vld [vmem:[%s4263_s19 + $0x18] sm:$0x7f]   ;;  %v425_v33 = vshll.u32 %v4141_v21, 16 }
  0x16   : > { %646 = vrot.lane.b32.xlu0 %v554_v13, %s4190_s21  ;;  %v389_v25 = vrot.slane %v387_v19, 7  ;;  %v432_v34 = vshll.u32 %v4142_v23, 16  ;;  %v424_v38 = vrot.slane %v422_v26, 7  ;;  %v394_v40 = vshrl.u32 %v4143_v30, 16  ;;  %v4144_v41 = vld [vmem:[%s4263_s19 + $0x48] sm:$0x7f]  }
  0x17   : > { %v385_v22 = vor.u32 %v383_v9, %v382_v14  ;;  %v378_v24 = vor.u32 %v376_v11, %v375_v17  ;;  %v431_v39 = vrot.slane %v429_v29, 7  ;;  %v509_v44 = vld [vmem:[#allocation2 + $0x40] sm:$0xff]  ;;  %v4145_v50 = vld [vmem:[%s4263_s19 + $0x50] sm:$0x7f]   ;;  %v397_v52 = vshll.u32 %v4143_v30, 16  ;;  %v518_v13 = vld [vmem:[#allocation2 + $0x58] sm:$0xff] }
  0x18   : > { %v392_v32 = vor.u32 %v390_v20, %v389_v25  ;;  %v427_v47 = vor.u32 %v425_v33, %v424_v38  ;;  %v396_v49 = vrot.slane %v394_v40, 7  ;;  %v436_v55 = vshrl.u32 %v4144_v41, 16  ;;  %v4146_v57 = vld [vmem:[%s4263_s19 + $0x20] sm:$0x7f]   ;;  %v515_v0 = vld [vmem:[#allocation2 + $0x50] sm:$0xff]  ;;  %v500_v19 = vld [vmem:[#allocation2 + $0x28] sm:$0xff] }
  0x19   : > { %v4285_v27 = vsel %vm4276_vm2, %v385_v22, %v491_v15  ;;  %v4291_v31 = vsel %vm4276_vm2, %v378_v24, %v488_v18  ;;  %v434_v48 = vor.u32 %v432_v34, %v431_v39  ;;  %v439_v56 = vshll.u32 %v4144_v41, 16  ;;  %v4147_v3 = vld [vmem:[%s4263_s19 + $0x58] sm:$0x7f]   ;;  %v4148_v8 = vld [vmem:[%s4263_s19 + $0x28] sm:$0x7f]   ;;  %v503_v33 = vld [vmem:[#allocation2 + $0x30] sm:$0xff] }
  0x1a   : > { %493 = vst [vmem:[#allocation2 + $0x10] sm:$0xff] %v4285_v27  ;;  %733 = vrot.lane.b32.xlu0 %v4285_v27, %s4191_s22  ;;  %490 = vst [vmem:[#allocation2 + $0x8] sm:$0xff] %v4291_v31  ;;  %731 = vrot.lane.b32.xlu1 %v4291_v31, %s4191_s22  ;;  %v689_v35 = vrot.slane %v4291_v31, 1  ;;  %v558_v36 = vshll.u32 %v4291_v31, 16  ;;  %v4302_v37 = vsel %vm4276_vm2, %v392_v32, %v494_v28  ;;  %v4307_v42 = vrot.slane %v4285_v27, 1  ;;  %v521_v28 = vld [vmem:[#allocation2 + $0x60] sm:$0xff] }
  0x1b   : > { %496 = vst [vmem:[#allocation2 + $0x18] sm:$0xff] %v4302_v37  ;;  %v556_v43 = vshrl.u32 %v4291_v31, 16  ;;  %v565_v46 = vshll.u32 %v4285_v27, 16  ;;  %v4317_v53 = vsel %vm4276_vm2, %v427_v47, %v509_v44  ;;  %v4321_v54 = vsel %vm4276_vm2, %v434_v48, %v512_v45  ;;  %v4150_v41 = vld [vmem:[%s4263_s19 + $0x30] sm:$0x7f]   ;;  %v4149_v45 = vld [vmem:[%s5352_s1] sm:$0xff]  }
  0x1c   : > { %v560_v51 = vrot.slane %v558_v36, 1  ;;  %511 = vst [vmem:[#allocation2 + $0x40] sm:$0xff] %v4317_v53  ;;  %514 = vst [vmem:[#allocation2 + $0x48] sm:$0xff] %v4321_v54  ;;  %v399_v59 = vor.u32 %v397_v52, %v396_v49  ;;  %v438_v60 = vrot.slane %v436_v55, 7  ;;  %v563_v62 = vshrl.u32 %v4285_v27, 16 }
  0x1d   : > { %v567_v63 = vrot.slane %v565_v46, 1  ;;  %v443_v2 = vshrl.u32 %v4145_v50, 16  ;;  %v446_v6 = vshll.u32 %v4145_v50, 16  ;;  %v401_v7 = vshrl.u32 %v4146_v57, 16  ;;  %v4151_v44 = vld [vmem:[%s4263_s19 + $0x60] sm:$0x7f]  }
  0x1e   : > { %824 = vrot.lane.b32.xlu1 %v4285_v27, %s4192_s23  ;;  %704 = vrot.lane.b32.xlu0 %v689_v35, %s4189_s20  ;;  %v561_v61 = vor.u32 %v560_v51, %v556_v43  ;;  %v4334_v4 = vsel %vm4276_vm2, %v399_v59, %v497_v58  ;;  %v441_v5 = vor.u32 %v439_v56, %v438_v60  ;;  %v404_v15 = vshll.u32 %v4146_v57, 16  ;;  %v506_v56 = vld [vmem:[#allocation2 + $0x38] sm:$0xff] }
  0x1f   : > { %499 = vst [vmem:[#allocation2 + $0x20] sm:$0xff] %v4334_v4  ;;  %v445_v10 = vrot.slane %v443_v2, 7  ;;  %v403_v11 = vrot.slane %v401_v7, 7  ;;  %v568_v12 = vor.u32 %v567_v63, %v563_v62  ;;  %v450_v17 = vshrl.u32 %v4147_v3, 16  ;;  %v524_v62 = vld [vmem:[#allocation2 + $0x68] sm:$0xff]  ;;  %v4153_v2 = vld [vmem:[%s5352_s1 + $0x10] sm:$0xff]  }
  0x20   : > { %v4340_v9 = vsel %vm4276_vm2, %v441_v5, %v515_v0  ;;  %v453_v18 = vshll.u32 %v4147_v3, 16  ;;  %v408_v20 = vshrl.u32 %v4148_v8, 16  ;;  %v411_v24 = vshll.u32 %v4148_v8, 16  ;;  %v4154_v7 = vld [vmem:[%s5352_s1 + $0x18] sm:$0xff]   ;;  %v4155_v8 = vld [vmem:[%s5352_s1 + $0x20] ss:$0 sps:$4 sm:$0xff]  }
  0x21   : > { %517 = vst [vmem:[#allocation2 + $0x50] sm:$0xff] %v4340_v9  ;;  %v448_v14 = vor.u32 %v446_v6, %v445_v10  ;;  %v406_v22 = vor.u32 %v404_v15, %v403_v11  ;;  %v452_v23 = vrot.slane %v450_v17, 7  ;;  %v607_v25 = vshll.u32 %v4317_v53, 16 }
  0x22   : > { %826 = vrot.lane.b32.xlu1 %v4302_v37, %s4192_s23  ;;  %797 = vrot.lane.b32.xlu0 %v4307_v42, %s4193_s24  ;;  %v572_v26 = vshll.u32 %v4302_v37, 16  ;;  %v410_v32 = vrot.slane %v408_v20, 7  ;;  %v605_v36 = vshrl.u32 %v4317_v53, 16  ;;  %v570_v39 = vshrl.u32 %v4302_v37, 16 }
  0x23   : > { %v4347_v21 = vsel %vm4276_vm2, %v448_v14, %v518_v13  ;;  %v4357_v29 = vsel %vm4276_vm2, %v406_v22, %v500_v19  ;;  %v455_v30 = vor.u32 %v453_v18, %v452_v23  ;;  %v609_v38 = vrot.slane %v607_v25, 1  ;;  %v527_v23 = vld [vmem:[#allocation2 + $0x70] sm:$0xff] }
  0x24   : > { %520 = vst [vmem:[#allocation2 + $0x58] sm:$0xff] %v4347_v21  ;;  %502 = vst [vmem:[#allocation2 + $0x28] sm:$0xff] %v4357_v29  ;;  %v574_v40 = vrot.slane %v572_v26, 1  ;;  %v415_v48 = vshrl.u32 %v4150_v41, 16  ;;  %v418_v49 = vshll.u32 %v4150_v41, 16  ;;  %v4197_v50 = vmov 0.0  }
  0x25   : > { %v4362_v34 = vsel %vm4276_vm2, %v455_v30, %v521_v28  ;;  %v4382_v46 = vor.u32 %v609_v38, %v605_v36  ;;  %4028 = vmatprep.subr.bf16.mxu0 %v4197_v50  ;;  %v457_v51 = vshrl.u32 %v4151_v44, 16  ;;  %v460_v52 = vshll.u32 %v4151_v44, 16  ;;  %4090 = vmatprep.subr.bf16.mxu1 %v4197_v50 }
  0x26   : > { %795 = vrot.lane.b32.xlu1 %v689_v35, %s4193_s24  ;;  %648 = vrot.lane.b32.xlu0 %v561_v61, %s4190_s21  ;;  %v413_v35 = vor.u32 %v411_v24, %v410_v32  ;;  %523 = vst [vmem:[#allocation2 + $0x60] sm:$0xff] %v4362_v34  ;;  %v4384_v47 = vor.u32 %v574_v40, %v570_v39  ;;  %v417_v55 = vrot.slane %v415_v48, 7  ;;  %v4398_v58 = vrot.slane %v4317_v53, 1 }
  0x27   : > { %4029 = vmatpush3.bf16.msra.mxu0 %v4149_v45  ;;  %4095 = vmatpush3.bf16.msra.mxu1 %v4149_v45  ;;  %v459_v57 = vrot.slane %v457_v51, 7  ;;  %v4401_v59 = vrot.slane %v4302_v37, 1  ;;  %v614_v60 = vshll.u32 %v4321_v54, 16  ;;  %v612_v5 = vshrl.u32 %v4321_v54, 16 }
  0x28   : > { %v4372_v43 = vsel %vm4276_vm2, %v413_v35, %v503_v33  ;;  %4030 = vmatprep.subr.bf16.mxu0 %v4197_v50  ;;  %4091 = vmatprep.subr.bf16.mxu1 %v4197_v50  ;;  %v579_v11 = vshll.u32 %v4334_v4, 16  ;;  %v2513_v13 = vsel %vm2511_vm4, %v4155_v8, 0  ;;  %v577_v14 = vshrl.u32 %v4334_v4, 16 }
  0x29   : > { %505 = vst [vmem:[#allocation2 + $0x30] sm:$0xff] %v4372_v43  ;;  %v462_v63 = vor.u32 %v460_v52, %v459_v57  ;;  %v616_v6 = vrot.slane %v614_v60, 1  ;;  %4038 = vmatprep.mubr.msk.bf16.mxu0 %vm4198_vm3, %v4197_v50  ;;  %4066 = vmatprep.mubr.msk.bf16.mxu1 %vm4198_vm3, %v4197_v50  ;;  %v4464_v25 = vrot.slane %v4321_v54, 1  ;;  %v621_v26 = vshll.u32 %v4340_v9, 16 }
  0x2a   : > { %888 = vrot.lane.b32.xlu1 %v4307_v42, %s4194_s25  ;;  %768 = vrot.lane.b32.xlu0 %v568_v12, %s4195_s26  ;;  %v581_v15 = vrot.slane %v579_v11, 1  ;;  %v619_v16 = vshrl.u32 %v4340_v9, 16  ;;  %v692_v32 = vrot.slane %v4334_v4, 1  ;;  %v698_v33 = vrot.slane %v4340_v9, 1 }
  0x2b   : > { %v4414_v3 = vsel %vm4276_vm2, %v462_v63, %v524_v62  ;;  %v4437_v10 = vor.u32 %v616_v6, %v612_v5  ;;  %v623_v28 = vrot.slane %v621_v26, 1  ;;  %v628_v35 = vshll.u32 %v4347_v21, 16 }
  0x2c   : > { %526 = vst [vmem:[#allocation2 + $0x68] sm:$0xff] %v4414_v3  ;;  %v582_v20 = vor.u32 %v581_v15, %v577_v14  ;;  %v626_v36 = vshrl.u32 %v4347_v21, 16  ;;  %v699_v40 = vrot.slane %v4347_v21, 1  ;;  %v584_v41 = vshrl.u32 %v4357_v29, 16 }
  0x2d   : > { %v624_v30 = vor.u32 %v623_v28, %v619_v16  ;;  %v630_v38 = vrot.slane %v628_v35, 1  ;;  %v633_v48 = vshrl.u32 %v4362_v34, 16  ;;  %v4199_v11 = vmov 1966171168  }
  0x2e   : > { %650 = vrot.lane.b32.xlu0 %v568_v12, %s4190_s21  ;;  %766 = vrot.lane.b32.xlu1 %v561_v61, %s4195_s26  ;;  %v420_v61 = vor.u32 %v418_v49, %v417_v55 }
  0x2f   : > { %v631_v39 = vor.u32 %v630_v38, %v626_v36 }
  0x30   : > { %v4406_v0 = vsel %vm4276_vm2, %v420_v61, %v506_v56 }
  0x31   : > { %508 = vst [vmem:[#allocation2 + $0x38] sm:$0xff] %v4406_v0 }
  0x32   : > { %706 = vrot.lane.b32.xlu0 %v4307_v42, %s4189_s20  ;;  %859 = vrot.lane.b32.xlu1 %v568_v12, %s4196_s29  ;;  %v4152_v42 = vld [vmem:[%s5352_s1 + $0x8] sm:$0xff]  }
  0x33   : > { %4031 = vmatpush3.bf16.msra.mxu0 %v4152_v42  ;;  %4096 = vmatpush3.bf16.msra.mxu1 %v4152_v42  ;;  %v4156_v12 = vld [vmem:[%s4263_s19 + $0x68] sm:$0x7f]   ;;  %v593_v42 = vshll.u32 %v4372_v43, 16 }
  0x34   : > { %4032 = vmatprep.subr.bf16.mxu0 %v4197_v50  ;;  %4092 = vmatprep.subr.bf16.mxu1 %v4197_v50  ;;  %v464_v17 = vshrl.u32 %v4156_v12, 16  ;;  %v467_v19 = vshll.u32 %v4156_v12, 16  ;;  %v1164_v12 = vunpack.c.l.s4 %v4199_v11 }
  0x35   : > { %v595_v60 = vrot.slane %v593_v42, 1 }
  0x36   : > { %662 = vrot.lane.b32.xlu0 %v4382_v46, %s4190_s21  ;;  %861 = vrot.lane.b32.xlu1 %v4384_v47, %s4196_s29  ;;  %v466_v18 = vrot.slane %v464_v17, 7 }
  0x37   : > { %4033 = vmatpush3.bf16.msra.mxu0 %v4153_v2  ;;  %4097 = vmatpush3.bf16.msra.mxu1 %v4153_v2 }
  0x38   : > { %4034 = vmatprep.subr.bf16.mxu0 %v4197_v50  ;;  %4093 = vmatprep.subr.bf16.mxu1 %v4197_v50  ;;  %v469_v22 = vor.u32 %v467_v19, %v466_v18 }
  0x3a   : > { %718 = vrot.lane.b32.xlu0 %v4398_v58, %s4189_s20  ;;  %890 = vrot.lane.b32.xlu1 %v4401_v59, %s4194_s25  ;;  %v4457_v24 = vsel %vm4276_vm2, %v469_v22, %v527_v23 }
  0x3b   : > { %4035 = vmatpush3.bf16.msra.mxu0 %v4154_v7  ;;  %4098 = vmatpush3.bf16.msra.mxu1 %v4154_v7  ;;  %529 = vst [vmem:[#allocation2 + $0x70] sm:$0xff] %v4457_v24 }
  0x3c   : > { %4036 = vmatprep.subr.bf16.mxu0 %v4197_v50  ;;  %4094 = vmatprep.subr.bf16.mxu1 %v4197_v50 }
  0x3e   : > { %747 = vrot.lane.b32.xlu0 %v4321_v54, %s4191_s22  ;;  %735 = vrot.lane.b32.xlu1 %v4302_v37, %s4191_s22 }
  0x3f   : > { %4037 = vmatpush3.bf16.msra.mxu0 %v2513_v13  ;;  %4099 = vmatpush3.bf16.msra.mxu1 %v2513_v13  ;;  %v1166_v13 = vlaneseq }
  0x41   : > { %v4558_v19 = vshrl.u32 %v1166_v13, 7 }
  0x42   : > { %782 = vrot.lane.b32.xlu0 %v4437_v10, %s4195_s26  ;;  %770 = vrot.lane.b32.xlu1 %v4384_v47, %s4195_s26 }
  0x46   : > { %664 = vrot.lane.b32.xlu0 %v4437_v10, %s4190_s21  ;;  %799 = vrot.lane.b32.xlu1 %v4401_v59, %s4193_s24 }
  0x4a   : > { %863 = vrot.lane.b32.xlu0 %v582_v20, %s4196_s29  ;;  %828 = vrot.lane.b32.xlu1 %v4334_v4, %s4192_s23 }
  0x4e   : > { %840 = vrot.lane.b32.xlu0 %v4340_v9, %s4192_s23  ;;  %811 = vrot.lane.b32.xlu1 %v4464_v25, %s4193_s24 }
  0x52   : > { %652 = vrot.lane.b32.xlu0 %v4384_v47, %s4190_s21  ;;  %720 = vrot.lane.b32.xlu1 %v4464_v25, %s4189_s20  ;;  %v693_v47 = vrot.slane %v4357_v29, 1 }
  0x56   : > { %875 = vrot.lane.b32.xlu0 %v624_v30, %s4196_s29  ;;  %892 = vrot.lane.b32.xlu1 %v692_v32, %s4194_s25 }
  0x5a   : > { %784 = vrot.lane.b32.xlu0 %v624_v30, %s4195_s26  ;;  %749 = vrot.lane.b32.xlu1 %v4340_v9, %s4191_s22 }
  0x5e   : > { %737 = vrot.lane.b32.xlu0 %v4334_v4, %s4191_s22  ;;  %708 = vrot.lane.b32.xlu1 %v4401_v59, %s4189_s20  ;;  %v586_v4 = vshll.u32 %v4357_v29, 16  ;;  %v591_v59 = vshrl.u32 %v4372_v43, 16 }
  0x60   : > { %v588_v44 = vrot.slane %v586_v4, 1  ;;  %v4535_v63 = vor.u32 %v595_v60, %v591_v59  ;;  %v640_v4 = vshrl.u32 %v4414_v3, 16 }
  0x62   : > { %772 = vrot.lane.b32.xlu0 %v582_v20, %s4195_s26  ;;  %904 = vrot.lane.b32.xlu1 %v698_v33, %s4194_s25  ;;  %v589_v45 = vor.u32 %v588_v44, %v584_v41 }
  0x66   : > { %666 = vrot.lane.b32.xlu0 %v624_v30, %s4190_s21  ;;  %813 = vrot.lane.b32.xlu1 %v698_v33, %s4193_s24 }
  0x6a   : > { %877 = vrot.lane.b32.xlu0 %v631_v39, %s4196_s29  ;;  %842 = vrot.lane.b32.xlu1 %v4347_v21, %s4192_s23 }
  0x6e   : > { %830 = vrot.lane.b32.xlu0 %v4357_v29, %s4192_s23  ;;  %801 = vrot.lane.b32.xlu1 %v692_v32, %s4193_s24 }
  0x72   : > { %751 = vrot.lane.b32.xlu0 %v4347_v21, %s4191_s22  ;;  %722 = vrot.lane.b32.xlu1 %v698_v33, %s4189_s20  ;;  %v635_v21 = vshll.u32 %v4362_v34, 16 }
  0x74   : > { %v637_v49 = vrot.slane %v635_v21, 1 }
  0x76   : > { %786 = vrot.lane.b32.xlu0 %v631_v39, %s4195_s26  ;;  %906 = vrot.lane.b32.xlu1 %v699_v40, %s4194_s25  ;;  %v4520_v52 = vor.u32 %v637_v49, %v633_v48 }
  0x7a   : > { %654 = vrot.lane.b32.xlu0 %v582_v20, %s4190_s21  ;;  %865 = vrot.lane.b32.xlu1 %v589_v45, %s4196_s29 }
  0x7e   : > { %710 = vrot.lane.b32.xlu0 %v692_v32, %s4189_s20  ;;  %894 = vrot.lane.b32.xlu1 %v693_v47, %s4194_s25 }
  0x82   : > { %739 = vrot.lane.b32.xlu0 %v4357_v29, %s4191_s22  ;;  %815 = vrot.lane.b32.xlu1 %v699_v40, %s4193_s24  ;;  %v4526_v29 = vrot.slane %v4362_v34, 1 }
  0x83   : > { %v703_v51 = vpop.permute.xlu0 %702 }
  0x86   : > { %774 = vrot.lane.b32.xlu0 %v589_v45, %s4195_s26  ;;  %844 = vrot.lane.b32.xlu1 %v4362_v34, %s4192_s23 }
  0x88   : > { %v647_v55 = vpop.permute.xlu0 %646 }
  0x89   : > { %v918_v8 = vsel %vm257_vm0, %v4265_v1, %v647_v55  ;;  %v4556_v1 = vrot.slane %v4372_v43, 1 }
  0x8a   : > { %668 = vrot.lane.b32.xlu0 %v631_v39, %s4190_s21  ;;  %879 = vrot.lane.b32.xlu1 %v4520_v52, %s4196_s29  ;;  %v947_v17 = vsel %vm945_vm5, %v918_v8, %v703_v51  ;;  %v600_v51 = vshll.u32 %v4406_v0, 16 }
  0x8c   : > { %v734_v56 = vpop.permute.xlu0 %733  ;;  %v732_v57 = vpop.permute.xlu1 %731  ;;  %v602_v8 = vrot.slane %v600_v51, 1 }
  0x8d   : > { %v976_v20 = vsel %vm974_vm6, %v947_v17, %v732_v57 }
  0x8e   : > { %724 = vrot.lane.b32.xlu0 %v699_v40, %s4189_s20  ;;  %908 = vrot.lane.b32.xlu1 %v4526_v29, %s4194_s25 }
  0x90   : > { %v825_v61 = vpop.permute.xlu1 %824  ;;  %v705_v62 = vpop.permute.xlu0 %704 }
  0x92   : > { %656 = vrot.lane.b32.xlu0 %v589_v45, %s4190_s21  ;;  %803 = vrot.lane.b32.xlu1 %v693_v47, %s4193_s24 }
  0x94   : > { %v4537_v2 = vpop.permute.xlu1 %826  ;;  %v798_v5 = vpop.permute.xlu0 %797 }
  0x96   : > { %867 = vrot.lane.b32.xlu0 %v4535_v63, %s4196_s29  ;;  %832 = vrot.lane.b32.xlu1 %v4372_v43, %s4192_s23 }
  0x98   : > { %v796_v6 = vpop.permute.xlu1 %795  ;;  %v649_v7 = vpop.permute.xlu0 %648 }
  0x99   : > { %v920_v18 = vsel %vm257_vm0, %v4291_v31, %v649_v7 }
  0x9a   : > { %788 = vrot.lane.b32.xlu0 %v4520_v52, %s4195_s26  ;;  %753 = vrot.lane.b32.xlu1 %v4362_v34, %s4191_s22  ;;  %v1165_v34 = vunpack.c.0.s8 %v1164_v12  ;;  %v949_v22 = vsel %vm945_vm5, %v920_v18, %v705_v62  ;;  %v598_v62 = vshrl.u32 %v4406_v0, 16 }
  0x9b   : > { %v978_v28 = vsel %vm974_vm6, %v949_v22, %v734_v56 }
  0x9c   : > { %v889_v14 = vpop.permute.xlu1 %888  ;;  %v769_v15 = vpop.permute.xlu0 %768  ;;  %v4574_v32 = vsub.s32 %v1165_v34, %v4558_v19 }
  0x9d   : > { %v1007_v38 = vsel %vm1003_vm7, %v978_v28, %v769_v15 }
  0x9e   : > { %741 = vrot.lane.b32.xlu0 %v4372_v43, %s4191_s22  ;;  %712 = vrot.lane.b32.xlu1 %v693_v47, %s4189_s20  ;;  %v642_v43 = vshll.u32 %v4414_v3, 16  ;;  %v1036_v21 = vsel %vm1032_vm8, %v1007_v38, %v798_v5 }
  0x9f   : > { %v1065_v59 = vsel %vm1061_vm9, %v1036_v21, %v4537_v2  ;;  %v4614_v2 = vrot.slane %v4414_v3, 1 }
  0xa0   : > { %v4562_v23 = vpop.permute.xlu0 %650  ;;  %v767_v31 = vpop.permute.xlu1 %766  ;;  %v644_v40 = vrot.slane %v642_v43, 1 }
  0xa1   : > { %v1005_v26 = vsel %vm1003_vm7, %v976_v20, %v767_v31  ;;  %v4619_v20 = vor.u32 %v602_v8, %v598_v62 }
  0xa2   : > { %v1034_v16 = vsel %vm1032_vm8, %v1005_v26, %v796_v6  ;;  %776 = vrot.lane.b32.xlu0 %v4535_v63, %s4195_s26  ;;  %896 = vrot.lane.b32.xlu1 %v4556_v1, %s4194_s25  ;;  %v4596_v55 = vor.u32 %v644_v40, %v640_v4 }
  0xa3   : > { %v1063_v30 = vsel %vm1061_vm9, %v1034_v16, %v825_v61 }
  0xa4   : > { %v4576_v33 = vpop.permute.xlu0 %706  ;;  %v860_v35 = vpop.permute.xlu1 %859 }
  0xa5   : > { %v1092_v36 = vsel %vm1090_vm10, %v1063_v30, %v860_v35 }
  0xa6   : > { %v1121_v39 = vsel %vm1119_vm11, %v1092_v36, %v889_v14  ;;  %805 = vrot.lane.b32.xlu0 %v4556_v1, %s4193_s24  ;;  %817 = vrot.lane.b32.xlu1 %v4526_v29, %s4193_s24 }
  0xa7   : > { %v1162_v41 = vcombine.high %v1121_v39, %v1121_v39  ;;  %v1169_v44 = vrot.slane %v1121_v39, %v4574_v32 }
  0xa8   : > { %v4587_v45 = vpop.permute.xlu0 %662  ;;  %v862_v47 = vpop.permute.xlu1 %861 }
  0xa9   : > { %v1176_v48 = vrot.slane %v1162_v41, %v4574_v32  ;;  %v1177_v49 = vcombine.high %v1169_v44, %v1169_v44  ;;  %v1185_v57 = vrot.slane %v1169_v44, %v4574_v32  ;;  %v1094_v7 = vsel %vm1090_vm10, %v1065_v59, %v862_v47 }
  0xaa   : > { %834 = vrot.lane.b32.xlu0 %v4406_v0, %s4192_s23  ;;  %846 = vrot.lane.b32.xlu1 %v4414_v3, %s4192_s23  ;;  %v762_v47 = vshll.u32 %v4457_v24, 16 }
  0xab   : > { %v1178_v42 = vcombine.high %v1176_v48, %v1176_v48  ;;  %v1199_v56 = vrot.slane %v1177_v49, %v4574_v32  ;;  %v1192_v5 = vrot.slane %v1176_v48, %v4574_v32 }
  0xac   : > { %v4602_v60 = vpop.permute.xlu0 %718  ;;  %v891_v61 = vpop.permute.xlu1 %890 }
  0xad   : > { %v1206_v6 = vrot.slane %v1178_v42, %v4574_v32  ;;  %v1841_v11 = vcombine.low %v1185_v57, %v1199_v56  ;;  %v3927_v12 = vcombine.high %v1185_v57, %v1199_v56  ;;  %v1123_v13 = vsel %vm1119_vm11, %v1094_v7, %v891_v61 }
  0xae   : > { %670 = vrot.lane.b32.xlu0 %v4520_v52, %s4190_s21  ;;  %881 = vrot.lane.b32.xlu1 %v4596_v55, %s4196_s29  ;;  %v1217_v14 = vrot.slane %v1123_v13, %v4574_v32  ;;  %v1208_v34 = vcombine.high %v1192_v5, %v1192_v5  ;;  %v1210_v21 = vcombine.high %v1123_v13, %v1123_v13  ;;  %v760_v42 = vshrl.u32 %v4457_v24, 16 }
  0xaf   : > { %v1843_v18 = vcombine.low %v1192_v5, %v1206_v6  ;;  %v1851_v22 = vrot.slane %v1841_v11, %v4574_v32  ;;  %v1858_v31 = vrot.slane %v3927_v12, %v4574_v32  ;;  %v764_v56 = vrot.slane %v762_v47, 1 }
  0xb0   : > { %v4617_v15 = vpop.permute.xlu0 %747  ;;  %v736_v17 = vpop.permute.xlu1 %735  ;;  %v4624_v52 = vrot.slane %v1217_v14, %v4574_v32  ;;  %v1225_v48 = vcombine.high %v1217_v14, %v1217_v14  ;;  %v1224_v57 = vrot.slane %v1210_v21, %v4574_v32 }
  0xb1   : > { %v1865_v28 = vrot.slane %v1843_v18, %v4574_v32  ;;  %v1873_v35 = vcombine.low %v1851_v22, %v1858_v31  ;;  %v765_v62 = vor.u32 %v764_v56, %v760_v42 }
  0xb2   : > { %726 = vrot.lane.b32.xlu0 %v4526_v29, %s4189_s20  ;;  %910 = vrot.lane.b32.xlu1 %v4614_v2, %s4194_s25  ;;  %v1844_v26 = vcombine.low %v1208_v34, %v4624_v52  ;;  %v4640_v29 = vrot.slane %v4406_v0, 1  ;;  %v1226_v5 = vcombine.high %v1224_v57, %v1224_v57  ;;  %v1240_v6 = vrot.slane %v1224_v57, %v4574_v32 }
  0xb3   : > { %v1881_v4 = vrot.slane %v1873_v35, %v4574_v32  ;;  %v1255_v11 = vcombine.high %v4624_v52, %v4624_v52 }
  0xb4   : > { %v4631_v16 = vpop.permute.xlu0 %782  ;;  %v771_v43 = vpop.permute.xlu1 %770  ;;  %v1872_v30 = vrot.slane %v1844_v26, %v4574_v32  ;;  %v1254_v18 = vrot.slane %v1226_v5, %v4574_v32  ;;  %v1256_v34 = vcombine.high %v1240_v6, %v1240_v6 }
  0xb6   : > { %658 = vrot.lane.b32.xlu0 %v4535_v63, %s4190_s21  ;;  %869 = vrot.lane.b32.xlu1 %v4619_v20, %s4196_s29  ;;  %v1874_v36 = vcombine.low %v1865_v28, %v1872_v30  ;;  %v1892_v28 = vcombine.low %v1254_v18, %v1256_v34 }
  0xb8   : > { %v4642_v38 = vpop.permute.xlu0 %664  ;;  %v800_v39 = vpop.permute.xlu1 %799  ;;  %v1888_v63 = vrot.slane %v1874_v36, %v4574_v32 }
  0xba   : > { %714 = vrot.lane.b32.xlu0 %v4556_v1, %s4189_s20  ;;  %898 = vrot.lane.b32.xlu1 %v4640_v29, %s4194_s25  ;;  %v1889_v41 = vcombine.low %v1881_v4, %v1888_v63  ;;  %v922_v1 = vsel %vm257_vm0, %v4285_v27, %v4562_v23 }
  0xbc   : > { %v864_v40 = vpop.permute.xlu0 %863  ;;  %v829_v44 = vpop.permute.xlu1 %828  ;;  %4039 = vmatmul.mubr.msk.bf16.vlgmr.msra.gmra.mrb[0].mxu0 %vm2471_vm12, %v1889_v41  ;;  %v934_v41 = vsel %vm257_vm0, %v4317_v53, %v4587_v45 }
  0xbd   : > { %4042 = vmatprep.mubr.msk.bf16.mxu0 %vm4198_vm3, %v4197_v50 }
  0xbe   : > { %743 = vrot.lane.b32.xlu0 %v4406_v0, %s4191_s22  ;;  %755 = vrot.lane.b32.xlu1 %v4414_v3, %s4191_s22  ;;  %v1247_v0 = vrot.slane %v1225_v48, %v4574_v32  ;;  %v951_v3 = vsel %vm945_vm5, %v922_v1, %v4576_v33  ;;  %v794_v48 = vrot.slane %v4457_v24, 1  ;;  %v963_v1 = vsel %vm945_vm5, %v934_v41, %v4602_v60 }
  0xbf   : > { %v980_v27 = vsel %vm974_vm6, %v951_v3, %v736_v17  ;;  %v992_v57 = vsel %vm974_vm6, %v963_v1, %v4617_v15 }
  0xc0   : > { %v4661_v49 = vpop.permute.xlu0 %840  ;;  %v812_v51 = vpop.permute.xlu1 %811  ;;  %v1009_v61 = vsel %vm1003_vm7, %v980_v27, %v771_v43  ;;  %v1257_v7 = vcombine.high %v1247_v0, %v1247_v0  ;;  %v1890_v31 = vcombine.low %v1247_v0, %v1255_v11  ;;  %v1021_v0 = vsel %vm1003_vm7, %v992_v57, %v4631_v16 }
  0xc1   : > { %v1038_v8 = vsel %vm1032_vm8, %v1009_v61, %v800_v39 }
  0xc2   : > { %778 = vrot.lane.b32.xlu0 %v4619_v20, %s4195_s26  ;;  %790 = vrot.lane.b32.xlu1 %v4596_v55, %s4195_s26  ;;  %v1067_v33 = vsel %vm1061_vm9, %v1038_v8, %v829_v44  ;;  %v1891_v22 = vcombine.low %v1257_v7, %v1240_v6  ;;  %v1900_v39 = vrot.slane %v1890_v31, %v4574_v32 }
  0xc3   : > { %v1096_v13 = vsel %vm1090_vm10, %v1067_v33, %v864_v40  ;;  %v1914_v44 = vrot.slane %v1892_v28, %v4574_v32 }
  0xc4   : > { %v4673_v23 = vpop.permute.xlu0 %652  ;;  %v4675_v59 = vpop.permute.xlu1 %720  ;;  %v1907_v30 = vrot.slane %v1891_v22, %v4574_v32 }
  0xc6   : > { %672 = vrot.lane.b32.xlu0 %v4596_v55, %s4190_s21  ;;  %819 = vrot.lane.b32.xlu1 %v4614_v2, %s4193_s24  ;;  %v1922_v21 = vcombine.low %v1900_v39, %v1907_v30 }
  0xc8   : > { %v876_v12 = vpop.permute.xlu0 %875  ;;  %v893_v14 = vpop.permute.xlu1 %892  ;;  %v1930_v3 = vrot.slane %v1922_v21, %v4574_v32 }
  0xc9   : > { %v4689_v17 = vsel %vm1119_vm11, %v1096_v13, %v893_v14 }
  0xca   : > { %v1265_v55 = vrot.slane %v4689_v17, %v4574_v32  ;;  %883 = vrot.lane.b32.xlu0 %v765_v62, %s4196_s29  ;;  %848 = vrot.lane.b32.xlu1 %v4457_v24, %s4192_s23 }
  0xcc   : > { %v1273_v52 = vcombine.high %v1265_v55, %v1265_v55  ;;  %v4697_v26 = vpop.permute.xlu0 %784  ;;  %v750_v43 = vpop.permute.xlu1 %749  ;;  %v4701_v35 = vrot.slane %v1265_v55, %v4574_v32 }
  0xce   : > { %v4704_v36 = vrot.slane %v1273_v52, %v4574_v32  ;;  %836 = vrot.lane.b32.xlu0 %v4317_v53, %s4192_s23  ;;  %807 = vrot.lane.b32.xlu1 %v4640_v29, %s4193_s24 }
  0xd0   : > { %v1893_v4 = vcombine.low %v4701_v35, %v4704_v36  ;;  %v4713_v63 = vpop.permute.xlu0 %737  ;;  %v4715_v40 = vpop.permute.xlu1 %708 }
  0xd2   : > { %v1921_v47 = vrot.slane %v1893_v4, %v4574_v32  ;;  %757 = vrot.lane.b32.xlu0 %v4457_v24, %s4191_s22  ;;  %728 = vrot.lane.b32.xlu1 %v4614_v2, %s4189_s20  ;;  %v1050_v24 = vsel %vm1032_vm8, %v1021_v0, %v812_v51 }
  0xd3   : > { %v1079_v60 = vsel %vm1061_vm9, %v1050_v24, %v4661_v49 }
  0xd4   : > { %v1923_v42 = vcombine.low %v1914_v44, %v1921_v47  ;;  %v4729_v56 = vpop.permute.xlu0 %772  ;;  %v905_v45 = vpop.permute.xlu1 %904  ;;  %v1108_v5 = vsel %vm1090_vm10, %v1079_v60, %v876_v12  ;;  %v936_v12 = vsel %vm257_vm0, %v4321_v54, %v4642_v38  ;;  %v924_v47 = vsel %vm257_vm0, %v4302_v37, %v4673_v23 }
  0xd5   : > { %v1137_v16 = vsel %vm1119_vm11, %v1108_v5, %v905_v45  ;;  %v965_v14 = vsel %vm945_vm5, %v936_v12, %v4675_v59  ;;  %v953_v45 = vsel %vm945_vm5, %v924_v47, %v4715_v40 }
  0xd6   : > { %792 = vrot.lane.b32.xlu0 %v765_v62, %s4195_s26  ;;  %v1937_v2 = vrot.slane %v1923_v42, %v4574_v32  ;;  %912 = vrot.lane.b32.xlu1 %v794_v48, %s4194_s25  ;;  %v547_v62 = vld [vmem:[#allocation2 + $0x78] sm:$0xff]  ;;  %v1546_v6 = vcombine.high %v1137_v16, %v1137_v16  ;;  %v1553_v7 = vrot.slane %v1137_v16, %v4574_v32 }
  0xd7   : > { %v853_v18 = vshrl.u32 %v547_v62, 16  ;;  %v994_v22 = vsel %vm974_vm6, %v965_v14, %v750_v43  ;;  %v887_v57 = vrot.slane %v547_v62, 1  ;;  %v982_v0 = vsel %vm974_vm6, %v953_v45, %v4713_v63 }
  0xd8   : > { %v4742_v27 = vpop.permute.xlu0 %666  ;;  %v814_v61 = vpop.permute.xlu1 %813  ;;  %v1938_v15 = vcombine.low %v1930_v3, %v1937_v2  ;;  %v1560_v11 = vrot.slane %v1546_v6, %v4574_v32  ;;  %v1561_v13 = vcombine.high %v1553_v7, %v1553_v7  ;;  %v1569_v30 = vrot.slane %v1553_v7, %v4574_v32 }
  0xd9   : > { %v1011_v2 = vsel %vm1003_vm7, %v982_v0, %v4729_v56 }
  0xda   : > { %660 = vrot.lane.b32.xlu0 %v4619_v20, %s4190_s21  ;;  %4043 = vmatmul.mubr.msk.bf16.gmra.mrb[4].mxu0 %vm2471_vm12, %v1938_v15  ;;  %v855_v20 = vshll.u32 %v547_v62, 16  ;;  %v1562_v38 = vcombine.high %v1560_v11, %v1560_v11  ;;  %v1583_v52 = vrot.slane %v1561_v13, %v4574_v32  ;;  %v1576_v41 = vrot.slane %v1560_v11, %v4574_v32 }
  0xdb   : > { %871 = vrot.lane.b32.xlu1 %v4382_v46, %s4196_s29  ;;  %4046 = vmatprep.mubr.msk.bf16.mxu0 %vm4198_vm3, %v4197_v50  ;;  %v3928_v13 = vcombine.high %v4701_v35, %v4704_v36 }
  0xdc   : > { %v878_v49 = vpop.permute.xlu0 %877  ;;  %v843_v51 = vpop.permute.xlu1 %842  ;;  %v857_v34 = vrot.slane %v855_v20, 1  ;;  %v1590_v44 = vrot.slane %v1562_v38, %v4574_v32  ;;  %v2184_v21 = vcombine.low %v1569_v30, %v1583_v52  ;;  %v1592_v24 = vcombine.high %v1576_v41, %v1576_v41 }
  0xde   : > { %716 = vrot.lane.b32.xlu0 %v4640_v29, %s4189_s20  ;;  %v1258_v29 = vcombine.high %v4689_v17, %v4689_v17  ;;  %v858_v43 = vor.u32 %v857_v34, %v853_v18  ;;  %v2194_v60 = vrot.slane %v2184_v21, %v4574_v32  ;;  %s5159_s20 = scalar_lea.vmem %s5354_s3, %s4100_s16 }
  0xdf   : > { %900 = vrot.lane.b32.xlu1 %v4398_v58, %s4194_s25 }
  0xe0   : > { %v831_v8 = vpop.permute.xlu0 %830  ;;  %v802_v33 = vpop.permute.xlu1 %801  ;;  %v1272_v17 = vrot.slane %v1258_v29, %v4574_v32 }
  0xe2   : > { %745 = vrot.lane.b32.xlu0 %v4317_v53, %s4191_s22  ;;  %v1023_v53 = vsel %vm1003_vm7, %v994_v22, %v4697_v26  ;;  %v1274_v42 = vcombine.high %v1272_v17, %v1272_v17 }
  0xe3   : > { %821 = vrot.lane.b32.xlu1 %v794_v48, %s4193_s24  ;;  %v1052_v59 = vsel %vm1032_vm8, %v1023_v53, %v814_v61  ;;  %v3931_v48 = vcombine.high %v1569_v30, %v1583_v52  ;;  %v1040_v61 = vsel %vm1032_vm8, %v1011_v2, %v802_v33 }
  0xe4   : > { %v4770_v55 = vpop.permute.xlu0 %751  ;;  %v4772_v31 = vpop.permute.xlu1 %722  ;;  %v1081_v28 = vsel %vm1061_vm9, %v1052_v59, %v843_v51  ;;  %v1302_v63 = vrot.slane %v1274_v42, %v4574_v32  ;;  %v1069_v5 = vsel %vm1061_vm9, %v1040_v61, %v831_v8  ;;  %v1288_v51 = vrot.slane %v1272_v17, %v4574_v32 }
  0xe5   : > { %v1110_v26 = vsel %vm1090_vm10, %v1081_v28, %v878_v49  ;;  %v2201_v40 = vrot.slane %v3931_v48, %v4574_v32 }
  0xe6   : > { %780 = vrot.lane.b32.xlu0 %v4382_v46, %s4195_s26  ;;  %v1940_v20 = vcombine.low %v1288_v51, %v1302_v63  ;;  %v1304_v14 = vcombine.high %v1288_v51, %v1288_v51 }
  0xe7   : > { %850 = vrot.lane.b32.xlu1 %v547_v62, %s4192_s23  ;;  %v2216_v7 = vcombine.low %v2194_v60, %v2201_v40 }
  0xe8   : > { %v4784_v39 = vpop.permute.xlu0 %786  ;;  %v907_v4 = vpop.permute.xlu1 %906  ;;  %v1956_v52 = vrot.slane %v1940_v20, %v4574_v32 }
  0xe9   : > { %v1139_v46 = vsel %vm1119_vm11, %v1110_v26, %v907_v4  ;;  %v2224_v38 = vrot.slane %v2216_v7, %v4574_v32  ;;  %v938_v26 = vsel %vm257_vm0, %v4340_v9, %v4742_v27 }
  0xea   : > { %v1601_v1 = vrot.slane %v1139_v46, %v4574_v32  ;;  %809 = vrot.lane.b32.xlu0 %v4398_v58, %s4193_s24  ;;  %v2186_v58 = vcombine.low %v1576_v41, %v1590_v44  ;;  %v1594_v34 = vcombine.high %v1139_v46, %v1139_v46 }
  0xeb   : > { %885 = vrot.lane.b32.xlu1 %v858_v43, %s4196_s29  ;;  %v1949_v43 = vrot.slane %v3928_v13, %v4574_v32 }
  0xec   : > { %v4802_v3 = vrot.slane %v1601_v1, %v4574_v32  ;;  %v4804_v37 = vpop.permute.xlu0 %654  ;;  %v866_v23 = vpop.permute.xlu1 %865  ;;  %v2208_v62 = vrot.slane %v2186_v58, %v4574_v32  ;;  %v1609_v22 = vcombine.high %v1601_v1, %v1601_v1  ;;  %v1608_v4 = vrot.slane %v1594_v34, %v4574_v32 }
  0xed   : > { %v1098_v56 = vsel %vm1090_vm10, %v1069_v5, %v866_v23  ;;  %v1971_v44 = vcombine.low %v1949_v43, %v1956_v52 }
  0xee   : > { %873 = vrot.lane.b32.xlu0 %v4437_v10, %s4196_s29  ;;  %v2187_v15 = vcombine.low %v1592_v24, %v4802_v3  ;;  %v1631_v41 = vrot.slane %v1609_v22, %v4574_v32  ;;  %v1610_v42 = vcombine.high %v1608_v4, %v1608_v4  ;;  %v4157_v22 = vld [vmem:[#allocation2 + $0x20] sm:$0xff] }
  0xef   : > { %914 = vrot.lane.b32.xlu1 %v887_v57, %s4194_s25  ;;  %v1979_v23 = vrot.slane %v1971_v44, %v4574_v32 }
  0xf0   : > { %v4818_v16 = vpop.permute.xlu0 %710  ;;  %v895_v49 = vpop.permute.xlu1 %894  ;;  %v2215_v6 = vrot.slane %v2187_v15, %v4574_v32  ;;  %v1641_v45 = vcombine.high %v1631_v41, %v1631_v41  ;;  %v1638_v61 = vrot.slane %v1610_v42, %v4574_v32 }
  0xf1   : > { %v4824_v10 = vsel %vm1119_vm11, %v1098_v56, %v895_v49 }
  0xf2   : > { %v2217_v33 = vcombine.low %v2208_v62, %v2215_v6  ;;  %v1313_v8 = vrot.slane %v4824_v10, %v4574_v32  ;;  %v1306_v62 = vcombine.high %v4824_v10, %v4824_v10 }
  0xf3   : > { %838 = vrot.lane.b32.xlu1 %v4321_v54, %s4192_s23 }
  0xf4   : > { %v4830_v11 = vpop.permute.xlu0 %739  ;;  %v816_v12 = vpop.permute.xlu1 %815  ;;  %v1321_v29 = vcombine.high %v1313_v8, %v1313_v8  ;;  %v1329_v18 = vrot.slane %v1313_v8, %v4574_v32  ;;  %v2231_v53 = vrot.slane %v2217_v33, %v4574_v32 }
  0xf6   : > { %v4839_v54 = vrot.slane %v1321_v29, %v4574_v32  ;;  %v1351_v59 = vcombine.high %v1329_v18, %v1329_v18  ;;  %v1941_v17 = vcombine.low %v1304_v14, %v1329_v18  ;;  %v2232_v36 = vcombine.low %v2224_v38, %v2231_v53 }
  0xf7   : > { %902 = vrot.lane.b32.xlu1 %v4464_v25, %s4194_s25  ;;  %v967_v25 = vsel %vm945_vm5, %v938_v26, %v4772_v31  ;;  %v1624_v31 = vrot.slane %v1608_v4, %v4574_v32  ;;  %v1320_v29 = vrot.slane %v1306_v62, %v4574_v32  ;;  %v926_v38 = vsel %vm257_vm0, %v4157_v22, %v4804_v37 }
  0xf8   : > { %v4843_v35 = vpop.permute.xlu0 %774  ;;  %v845_v28 = vpop.permute.xlu1 %844  ;;  %v1942_v30 = vcombine.low %v4839_v54, %v1351_v59  ;;  %4067 = vmatmul.mubr.msk.bf16.vlgmr.msra.gmra.mrb[0].mxu1 %vm2471_vm12, %v2232_v36  ;;  %v1963_v46 = vrot.slane %v1941_v17, %v4574_v32  ;;  %v996_v9 = vsel %vm974_vm6, %v967_v25, %v4770_v55  ;;  %v1639_v55 = vcombine.high %v4802_v3, %v4802_v3 }
  0xf9   : > { %4070 = vmatprep.mubr.msk.bf16.mxu1 %vm4198_vm3, %v4197_v50  ;;  %v1025_v48 = vsel %vm1003_vm7, %v996_v9, %v4784_v39  ;;  %v1640_v63 = vcombine.high %v1624_v31, %v1624_v31  ;;  %v2234_v15 = vcombine.low %v1641_v45, %v1624_v31  ;;  %v1322_v17 = vcombine.high %v1320_v29, %v1320_v29 }
  0xfa   : > { %v1970_v47 = vrot.slane %v1942_v30, %v4574_v32  ;;  %v1054_v57 = vsel %vm1032_vm8, %v1025_v48, %v816_v12  ;;  %v2233_v56 = vcombine.low %v1631_v41, %v1639_v55  ;;  %v1336_v36 = vrot.slane %v1320_v29, %v4574_v32 }
  0xfb   : > { %v1083_v0 = vsel %vm1061_vm9, %v1054_v57, %v845_v28  ;;  %v2235_v6 = vcombine.low %v1638_v61, %v1640_v63  ;;  %v2250_v7 = vrot.slane %v2234_v15, %v4574_v32  ;;  %v955_v30 = vsel %vm945_vm5, %v926_v38, %v4818_v16 }
  0xfc   : > { %v4861_v27 = vpop.permute.xlu0 %668  ;;  %v880_v21 = vpop.permute.xlu1 %879  ;;  %v1972_v1 = vcombine.low %v1963_v46, %v1970_v47  ;;  %v2243_v8 = vrot.slane %v2233_v56, %v4574_v32  ;;  %v984_v26 = vsel %vm974_vm6, %v955_v30, %v4830_v11  ;;  %v1350_v44 = vrot.slane %v1322_v17, %v4574_v32 }
  0xfd   : > { %v1112_v58 = vsel %vm1090_vm10, %v1083_v0, %v880_v21  ;;  %v2257_v10 = vrot.slane %v2235_v6, %v4574_v32  ;;  %v1352_v25 = vcombine.high %v1336_v36, %v1336_v36  ;;  %v1013_v46 = vsel %vm1003_vm7, %v984_v26, %v4843_v35 }
  0xfe   : > { %v1986_v2 = vrot.slane %v1972_v1, %v4574_v32  ;;  %v2265_v34 = vcombine.low %v2243_v8, %v2250_v7  ;;  %v1353_v47 = vcombine.high %v4839_v54, %v4839_v54 }
  0xff   : > { %v1989_v1 = vcombine.low %v1350_v44, %v1352_v25 }
 0x100   : > { %v4873_v24 = vpop.permute.xlu0 %724  ;;  %v909_v39 = vpop.permute.xlu1 %908  ;;  %v1987_v40 = vcombine.low %v1979_v23, %v1986_v2  ;;  %v2273_v28 = vrot.slane %v2265_v34, %v4574_v32  ;;  %v1988_v35 = vcombine.low %v1353_v47, %v1336_v36 }
 0x101   : > { %v1141_v60 = vsel %vm1119_vm11, %v1112_v58, %v909_v39  ;;  %v2005_v23 = vrot.slane %v1989_v1, %v4574_v32 }
 0x102   : > { %v1649_v5 = vrot.slane %v1141_v60, %v4574_v32  ;;  %4047 = vmatmul.mubr.msk.bf16.gmra.mrb[8].mxu0 %vm2471_vm12, %v1987_v40  ;;  %v1642_v31 = vcombine.high %v1141_v60, %v1141_v60  ;;  %v1998_v2 = vrot.slane %v1988_v35, %v4574_v32  ;;  %v4158_v40 = vld [vmem:[#allocation2 + $0x58] sm:$0xff] }
 0x103   : > { %4050 = vmatprep.mubr.msk.bf16.mxu0 %vm4198_vm3, %v4197_v50  ;;  %v940_v61 = vsel %vm257_vm0, %v4158_v40, %v4861_v27 }
 0x104   : > { %v1657_v49 = vcombine.high %v1649_v5, %v1649_v5  ;;  %v4879_v51 = vpop.permute.xlu0 %656  ;;  %v804_v3 = vpop.permute.xlu1 %803  ;;  %v4887_v20 = vrot.slane %v1649_v5, %v4574_v32  ;;  %v1656_v55 = vrot.slane %v1642_v31, %v4574_v32  ;;  %v2020_v62 = vcombine.low %v1998_v2, %v2005_v23 }
 0x105   : > { %v1042_v9 = vsel %vm1032_vm8, %v1013_v46, %v804_v3  ;;  %v969_v6 = vsel %vm945_vm5, %v940_v61, %v4873_v24 }
 0x106   : > { %v4890_v33 = vrot.slane %v1657_v49, %v4574_v32  ;;  %v1658_v56 = vcombine.high %v1656_v55, %v1656_v55  ;;  %v1672_v24 = vrot.slane %v1656_v55, %v4574_v32 }
 0x108   : > { %v2236_v12 = vcombine.low %v4887_v20, %v4890_v33  ;;  %v868_v13 = vpop.permute.xlu0 %867  ;;  %v833_v14 = vpop.permute.xlu1 %832  ;;  %v3932_v44 = vcombine.high %v4887_v20, %v4890_v33 }
 0x109   : > { %v1071_v16 = vsel %vm1061_vm9, %v1042_v9, %v833_v14  ;;  %v1686_v14 = vrot.slane %v1658_v56, %v4574_v32 }
 0x10a   : > { %v2264_v18 = vrot.slane %v2236_v12, %v4574_v32  ;;  %v1100_v21 = vsel %vm1090_vm10, %v1071_v16, %v868_v13  ;;  %v2292_v35 = vrot.slane %v3932_v44, %v4574_v32 }
 0x10b   : > { %v2283_v36 = vcombine.low %v1672_v24, %v1686_v14 }
 0x10c   : > { %v2266_v53 = vcombine.low %v2257_v10, %v2264_v18  ;;  %v789_v52 = vpop.permute.xlu0 %788  ;;  %v754_v59 = vpop.permute.xlu1 %753  ;;  %v2028_v10 = vrot.slane %v2020_v62, %v4574_v32 }
 0x10d   : > { %v998_v7 = vsel %vm974_vm6, %v969_v6, %v754_v59 }
 0x10e   : > { %v2280_v43 = vrot.slane %v2266_v53, %v4574_v32  ;;  %v1027_v27 = vsel %vm1003_vm7, %v998_v7, %v789_v52 }
 0x110   : > { %v4907_v4 = vpop.permute.xlu0 %741  ;;  %v713_v41 = vpop.permute.xlu1 %712  ;;  %v2281_v37 = vcombine.low %v2273_v28, %v2280_v43  ;;  %v4159_v28 = vld [vmem:[#allocation2 + $0x28] sm:$0xff] }
 0x111   : > { %v928_v43 = vsel %vm257_vm0, %v4159_v28, %v4879_v51 }
 0x112   : > { %4071 = vmatmul.mubr.msk.bf16.gmra.mrb[4].mxu1 %vm2471_vm12, %v2281_v37  ;;  %v957_v26 = vsel %vm945_vm5, %v928_v43, %v713_v41  ;;  %v1688_v41 = vcombine.high %v1672_v24, %v1672_v24 }
 0x113   : > { %4074 = vmatprep.mubr.msk.bf16.mxu1 %vm4198_vm3, %v4197_v50  ;;  %v986_v25 = vsel %vm974_vm6, %v957_v26, %v4907_v4 }
 0x114   : > { %v777_v11 = vpop.permute.xlu0 %776  ;;  %v897_v48 = vpop.permute.xlu1 %896 }
 0x115   : > { %v1129_v42 = vsel %vm1119_vm11, %v1100_v21, %v897_v48  ;;  %v1015_v16 = vsel %vm1003_vm7, %v986_v25, %v777_v11  ;;  %v2299_v21 = vrot.slane %v2283_v36, %v4574_v32 }
 0x116   : > { %v1361_v54 = vrot.slane %v1129_v42, %v4574_v32  ;;  %v1354_v34 = vcombine.high %v1129_v42, %v1129_v42 }
 0x117   : > { %v2314_v23 = vcombine.low %v2292_v35, %v2299_v21 }
 0x118   : > { %v1369_v45 = vcombine.high %v1361_v54, %v1361_v54  ;;  %v806_v57 = vpop.permute.xlu0 %805  ;;  %v818_v0 = vpop.permute.xlu1 %817  ;;  %v1377_v58 = vrot.slane %v1361_v54, %v4574_v32  ;;  %v1368_v37 = vrot.slane %v1354_v34, %v4574_v32 }
 0x119   : > { %v1056_v29 = vsel %vm1032_vm8, %v1027_v27, %v818_v0  ;;  %v1044_v48 = vsel %vm1032_vm8, %v1015_v16, %v806_v57 }
 0x11a   : > { %v1391_v39 = vrot.slane %v1369_v45, %v4574_v32  ;;  %v1370_v33 = vcombine.high %v1368_v37, %v1368_v37  ;;  %v1384_v0 = vrot.slane %v1368_v37, %v4574_v32 }
 0x11c   : > { %v1990_v60 = vcombine.low %v1377_v58, %v1391_v39  ;;  %v3929_v63 = vcombine.high %v1377_v58, %v1391_v39  ;;  %v835_v15 = vpop.permute.xlu0 %834  ;;  %v847_v5 = vpop.permute.xlu1 %846  ;;  %v1398_v39 = vrot.slane %v1370_v33, %v4574_v32 }
 0x11d   : > { %v1085_v22 = vsel %vm1061_vm9, %v1056_v29, %v847_v5  ;;  %v1073_v4 = vsel %vm1061_vm9, %v1044_v48, %v835_v15 }
 0x11e   : > { %v2012_v49 = vrot.slane %v1990_v60, %v4574_v32  ;;  %v2019_v3 = vrot.slane %v3929_v63, %v4574_v32  ;;  %v1400_v63 = vcombine.high %v1384_v0, %v1384_v0  ;;  %v2037_v6 = vcombine.low %v1384_v0, %v1398_v39 }
 0x120   : > { %v2021_v8 = vcombine.low %v2012_v49, %v2019_v3  ;;  %v4934_v12 = vpop.permute.xlu0 %670  ;;  %v882_v13 = vpop.permute.xlu1 %881  ;;  %v2322_v3 = vrot.slane %v2314_v23, %v4574_v32  ;;  %v2047_v24 = vrot.slane %v2037_v6, %v4574_v32 }
 0x121   : > { %v1114_v38 = vsel %vm1090_vm10, %v1085_v22, %v882_v13 }
 0x122   : > { %v2035_v18 = vrot.slane %v2021_v8, %v4574_v32 }
 0x124   : > { %v4944_v53 = vpop.permute.xlu0 %726  ;;  %v911_v59 = vpop.permute.xlu1 %910  ;;  %v2036_v17 = vcombine.low %v2028_v10, %v2035_v18 }
 0x125   : > { %v4947_v52 = vsel %vm1119_vm11, %v1114_v38, %v911_v59 }
 0x126   : > { %v1697_v30 = vrot.slane %v4947_v52, %v4574_v32  ;;  %4051 = vmatmul.mubr.msk.bf16.gmra.mrb[12].mxu0 %vm2471_vm12, %v2036_v17 }
 0x127   : > { %4054 = vmatprep.mubr.msk.bf16.mxu0 %vm4198_vm3, %v4197_v50 }
 0x128   : > { %v1705_v46 = vcombine.high %v1697_v30, %v1697_v30  ;;  %v1713_v51 = vrot.slane %v1697_v30, %v4574_v32  ;;  %v4963_v47 = vpop.permute.xlu0 %658  ;;  %v870_v9 = vpop.permute.xlu1 %869  ;;  %v1690_v30 = vcombine.high %v4947_v52, %v4947_v52 }
 0x129   : > { %v1102_v54 = vsel %vm1090_vm10, %v1073_v4, %v870_v9 }
 0x12a   : > { %v4969_v1 = vrot.slane %v1705_v46, %v4574_v32  ;;  %v1735_v20 = vcombine.high %v1713_v51, %v1713_v51  ;;  %v2284_v42 = vcombine.low %v1688_v41, %v1713_v51  ;;  %v1704_v51 = vrot.slane %v1690_v30, %v4574_v32  ;;  %v4160_v41 = vld [vmem:[#allocation2 + $0x60] sm:$0xff] }
 0x12b   : > { %v942_v21 = vsel %vm257_vm0, %v4160_v41, %v4934_v12 }
 0x12c   : > { %v2285_v31 = vcombine.low %v4969_v1, %v1735_v20  ;;  %v4975_v11 = vpop.permute.xlu0 %714  ;;  %v899_v45 = vpop.permute.xlu1 %898  ;;  %v2306_v2 = vrot.slane %v2284_v42, %v4574_v32  ;;  %v1706_v52 = vcombine.high %v1704_v51, %v1704_v51  ;;  %v1720_v20 = vrot.slane %v1704_v51, %v4574_v32 }
 0x12d   : > { %v1131_v57 = vsel %vm1119_vm11, %v1102_v54, %v899_v45  ;;  %v971_v33 = vsel %vm945_vm5, %v942_v21, %v4944_v53  ;;  %v1737_v12 = vcombine.high %v4969_v1, %v4969_v1  ;;  %v4161_v53 = vld [vmem:[#allocation2 + $0x30] sm:$0xff] }
 0x12e   : > { %v2313_v55 = vrot.slane %v2285_v31, %v4574_v32  ;;  %v1402_v58 = vcombine.high %v1131_v57, %v1131_v57  ;;  %v1409_v40 = vrot.slane %v1131_v57, %v4574_v32  ;;  %v1734_v54 = vrot.slane %v1706_v52, %v4574_v32 }
 0x12f   : > { %v1736_v45 = vcombine.high %v1720_v20, %v1720_v20  ;;  %v2331_v39 = vcombine.low %v1737_v12, %v1720_v20 }
 0x130   : > { %v2315_v61 = vcombine.low %v2306_v2, %v2313_v55  ;;  %v4983_v60 = vpop.permute.xlu0 %743  ;;  %v4986_v15 = vrot.slane %v1402_v58, %v4574_v32  ;;  %v1417_v5 = vcombine.high %v1409_v40, %v1409_v40  ;;  %v1425_v56 = vrot.slane %v1409_v40, %v4574_v32  ;;  %v756_v49 = vpop.permute.xlu1 %755 }
 0x131   : > { %v1000_v42 = vsel %vm974_vm6, %v971_v33, %v756_v49  ;;  %v930_v2 = vsel %vm257_vm0, %v4161_v53, %v4963_v47  ;;  %v2332_v40 = vcombine.low %v1734_v54, %v1736_v45  ;;  %v2341_v47 = vrot.slane %v2331_v39, %v4574_v32  ;;  %v4162_v54 = vld [vmem:[#allocation2 + $0x68] sm:$0xff] }
 0x132   : > { %v2329_v62 = vrot.slane %v2315_v61, %v4574_v32  ;;  %v1439_v7 = vrot.slane %v1417_v5, %v4574_v32  ;;  %v1447_v8 = vcombine.high %v1425_v56, %v1425_v56  ;;  %v2038_v13 = vcombine.low %v1400_v63, %v1425_v56 }
 0x133   : > { %v4994_v29 = vrot.slane %v4986_v15, %v4574_v32  ;;  %v959_v63 = vsel %vm945_vm5, %v930_v2, %v4975_v11  ;;  %v2348_v6 = vrot.slane %v2332_v40, %v4574_v32  ;;  %v1418_v11 = vcombine.high %v4986_v15, %v4986_v15 }
 0x134   : > { %v779_v27 = vpop.permute.xlu0 %778  ;;  %v2330_v14 = vcombine.low %v2322_v3, %v2329_v62  ;;  %v1449_v10 = vcombine.high %v1439_v7, %v1439_v7  ;;  %v2039_v18 = vcombine.low %v1439_v7, %v1447_v8  ;;  %v2054_v34 = vrot.slane %v2038_v13, %v4574_v32  ;;  %v791_v22 = vpop.permute.xlu1 %790 }
 0x135   : > { %v1029_v31 = vsel %vm1003_vm7, %v1000_v42, %v791_v22  ;;  %v988_v56 = vsel %vm974_vm6, %v959_v63, %v4983_v60  ;;  %v1448_v15 = vcombine.high %v4994_v29, %v4994_v29  ;;  %v4163_v63 = vld [vmem:[#allocation2 + $0x38] sm:$0xff] }
 0x136   : > { %4075 = vmatmul.mubr.msk.bf16.gmra.mrb[8].mxu1 %vm2471_vm12, %v2330_v14  ;;  %v2040_v38 = vcombine.low %v1449_v10, %v4994_v29  ;;  %v2061_v17 = vrot.slane %v2039_v18, %v4574_v32  ;;  %v2069_v28 = vcombine.low %v2047_v24, %v2054_v34  ;;  %v1017_v62 = vsel %vm1003_vm7, %v988_v56, %v779_v27 }
 0x137   : > { %4078 = vmatprep.mubr.msk.bf16.mxu1 %vm4198_vm3, %v4197_v50 }
 0x138   : > { %v5002_v59 = vpop.permute.xlu0 %672  ;;  %v2068_v36 = vrot.slane %v2040_v38, %v4574_v32  ;;  %v820_v43 = vpop.permute.xlu1 %819  ;;  %v2077_v25 = vrot.slane %v2069_v28, %v4574_v32  ;;  %v1446_v28 = vrot.slane %v1418_v11, %v4574_v32 }
 0x139   : > { %v1058_v0 = vsel %vm1032_vm8, %v1029_v31, %v820_v43  ;;  %v944_v45 = vsel %vm257_vm0, %v4162_v54, %v5002_v59 }
 0x13a   : > { %v2070_v26 = vcombine.low %v2061_v17, %v2068_v36  ;;  %v2363_v36 = vcombine.low %v2341_v47, %v2348_v6  ;;  %v2086_v41 = vcombine.low %v1446_v28, %v1448_v15 }
 0x13c   : > { %v884_v37 = vpop.permute.xlu0 %883  ;;  %v849_v44 = vpop.permute.xlu1 %848  ;;  %v2084_v46 = vrot.slane %v2070_v26, %v4574_v32  ;;  %v2096_v53 = vrot.slane %v2086_v41, %v4574_v32 }
 0x13d   : > { %v1087_v57 = vsel %vm1061_vm9, %v1058_v0, %v849_v44 }
 0x13e   : > { %v2085_v9 = vcombine.low %v2077_v25, %v2084_v46  ;;  %v1116_v55 = vsel %vm1090_vm10, %v1087_v57, %v884_v37 }
 0x140   : > { %v837_v16 = vpop.permute.xlu0 %836  ;;  %4055 = vmatmul.mubr.msk.bf16.gmra.mrb[16].mxu0 %vm2471_vm12, %v2085_v9  ;;  %v808_v48 = vpop.permute.xlu1 %807  ;;  %v2371_v9 = vrot.slane %v2363_v36, %v4574_v32 }
 0x141   : > { %4058 = vmatprep.mubr.msk.bf16.mxu0 %vm4198_vm3, %v4197_v50  ;;  %v1046_v7 = vsel %vm1032_vm8, %v1017_v62, %v808_v48 }
 0x142   : > { %v1075_v14 = vsel %vm1061_vm9, %v1046_v7, %v837_v16 }
 0x144   : > { %v5019_v4 = vpop.permute.xlu0 %757  ;;  %v5022_v35 = vpop.permute.xlu1 %728 }
 0x145   : > { %v973_v57 = vsel %vm945_vm5, %v944_v45, %v5022_v35 }
 0x148   : > { %v5030_v23 = vpop.permute.xlu0 %792  ;;  %v913_v58 = vpop.permute.xlu1 %912 }
 0x149   : > { %v1145_v1 = vsel %vm1119_vm11, %v1116_v55, %v913_v58  ;;  %v1002_v58 = vsel %vm974_vm6, %v973_v57, %v5019_v4 }
 0x14a   : > { %v1745_v61 = vrot.slane %v1145_v1, %v4574_v32  ;;  %v1738_v44 = vcombine.high %v1145_v1, %v1145_v1  ;;  %v1031_v40 = vsel %vm1003_vm7, %v1002_v58, %v5030_v23 }
 0x14c   : > { %v661_v5 = vpop.permute.xlu0 %660  ;;  %v1753_v49 = vcombine.high %v1745_v61, %v1745_v61  ;;  %v1761_v8 = vrot.slane %v1745_v61, %v4574_v32  ;;  %v1752_v42 = vrot.slane %v1738_v44, %v4574_v32 }
 0x14d   : > { %v872_v3 = vpop.permute.xlu1 %871  ;;  %v932_v56 = vsel %vm257_vm0, %v4163_v63, %v661_v5 }
 0x14e   : > { %v1775_v13 = vrot.slane %v1753_v49, %v4574_v32  ;;  %v1104_v34 = vsel %vm1090_vm10, %v1075_v14, %v872_v3  ;;  %v1754_v35 = vcombine.high %v1752_v42, %v1752_v42 }
 0x150   : > { %v717_v60 = vpop.permute.xlu0 %716  ;;  %v2333_v10 = vcombine.low %v1761_v8, %v1775_v13  ;;  %v3933_v18 = vcombine.high %v1761_v8, %v1775_v13  ;;  %v1768_v8 = vrot.slane %v1752_v42, %v4574_v32  ;;  %v1782_v23 = vrot.slane %v1754_v35, %v4574_v32 }
 0x151   : > { %v901_v22 = vpop.permute.xlu1 %900  ;;  %v961_v13 = vsel %vm945_vm5, %v932_v56, %v717_v60 }
 0x152   : > { %v1133_v27 = vsel %vm1119_vm11, %v1104_v34, %v901_v22  ;;  %v2355_v24 = vrot.slane %v2333_v10, %v4574_v32  ;;  %v2362_v38 = vrot.slane %v3933_v18, %v4574_v32  ;;  %v1784_v36 = vcombine.high %v1768_v8, %v1768_v8 }
 0x153   : > { %v1450_v17 = vcombine.high %v1133_v27, %v1133_v27  ;;  %v1457_v43 = vrot.slane %v1133_v27, %v4574_v32 }
 0x154   : > { %v2364_v30 = vcombine.low %v2355_v24, %v2362_v38  ;;  %v746_v46 = vpop.permute.xlu0 %745 }
 0x155   : > { %v1464_v26 = vrot.slane %v1450_v17, %v4574_v32  ;;  %v822_v37 = vpop.permute.xlu1 %821  ;;  %v1465_v25 = vcombine.high %v1457_v43, %v1457_v43  ;;  %v1473_v21 = vrot.slane %v1457_v43, %v4574_v32  ;;  %v990_v14 = vsel %vm974_vm6, %v961_v13, %v746_v46 }
 0x156   : > { %v2378_v16 = vrot.slane %v2364_v30, %v4574_v32  ;;  %v1060_v3 = vsel %vm1032_vm8, %v1031_v40, %v822_v37  ;;  %v2380_v43 = vcombine.low %v1768_v8, %v1782_v23 }
 0x157   : > { %v1466_v51 = vcombine.high %v1464_v26, %v1464_v26  ;;  %v1487_v48 = vrot.slane %v1465_v25, %v4574_v32  ;;  %v5064_v29 = vrot.slane %v1464_v26, %v4574_v32 }
 0x158   : > { %v2379_v33 = vcombine.low %v2371_v9, %v2378_v16  ;;  %v781_v55 = vpop.permute.xlu0 %780 }
 0x159   : > { %v1494_v52 = vrot.slane %v1466_v51, %v4574_v32  ;;  %v851_v20 = vpop.permute.xlu1 %850  ;;  %v2087_v12 = vcombine.low %v1473_v21, %v1487_v48  ;;  %v3930_v31 = vcombine.high %v1473_v21, %v1487_v48  ;;  %v1019_v22 = vsel %vm1003_vm7, %v990_v14, %v781_v55 }
 0x15a   : > { %4079 = vmatmul.mubr.msk.bf16.gmra.mrb[12].mxu1 %vm2471_vm12, %v2379_v33  ;;  %v1089_v47 = vsel %vm1061_vm9, %v1060_v3, %v851_v20  ;;  %v2390_v48 = vrot.slane %v2380_v43, %v4574_v32 }
 0x15b   : > { %v2089_v0 = vcombine.low %v5064_v29, %v1494_v52  ;;  %v2103_v2 = vrot.slane %v2087_v12, %v4574_v32  ;;  %4082 = vmatprep.mubr.msk.bf16.mxu1 %vm4198_vm3, %v4197_v50  ;;  %v2110_v59 = vrot.slane %v3930_v31, %v4574_v32 }
 0x15c   : > { %v810_v11 = vpop.permute.xlu0 %809 }
 0x15d   : > { %v2117_v39 = vrot.slane %v2089_v0, %v4574_v32  ;;  %v886_v1 = vpop.permute.xlu1 %885  ;;  %v2118_v61 = vcombine.low %v2096_v53, %v2103_v2  ;;  %v1048_v27 = vsel %vm1032_vm8, %v1019_v22, %v810_v11  ;;  %v1496_v0 = vcombine.high %v5064_v29, %v5064_v29 }
 0x15e   : > { %v1118_v4 = vsel %vm1090_vm10, %v1089_v47, %v886_v1  ;;  %v4200_v22 = vmov 1983009808  }
 0x15f   : > { %v2119_v49 = vcombine.low %v2110_v59, %v2117_v39  ;;  %v2126_v6 = vrot.slane %v2118_v61, %v4574_v32 }
 0x160   : > { %v874_v15 = vpop.permute.xlu0 %873 }
 0x161   : > { %v915_v62 = vpop.permute.xlu1 %914  ;;  %v2133_v7 = vrot.slane %v2119_v49, %v4574_v32 }
 0x162   : > { %v1147_v5 = vsel %vm1119_vm11, %v1118_v4, %v915_v62 }
 0x163   : > { %v1786_v10 = vcombine.high %v1147_v5, %v1147_v5  ;;  %v1793_v18 = vrot.slane %v1147_v5, %v4574_v32  ;;  %v2134_v34 = vcombine.low %v2126_v6, %v2133_v7 }
 0x165   : > { %v1800_v24 = vrot.slane %v1786_v10, %v4574_v32  ;;  %v1801_v38 = vcombine.high %v1793_v18, %v1793_v18  ;;  %v1809_v17 = vrot.slane %v1793_v18, %v4574_v32  ;;  %4059 = vmatmul.mubr.msk.bf16.gmra.mrb[20].mxu0 %vm2471_vm12, %v2134_v34  ;;  %v839_v60 = vpop.permute.xlu1 %838 }
 0x166   : > { %v1077_v28 = vsel %vm1061_vm9, %v1048_v27, %v839_v60  ;;  %4062 = vmatprep.mubr.msk.bf16.mxu0 %vm4198_vm3, %v4197_v50  ;;  %v2728_v27 = vunpack.c.l.s4 %v4200_v22 }
 0x167   : > { %v1823_v30 = vrot.slane %v1801_v38, %v4574_v32  ;;  %v1831_v26 = vcombine.high %v1809_v17, %v1809_v17  ;;  %v2381_v37 = vcombine.low %v1784_v36, %v1809_v17  ;;  %v1816_v44 = vrot.slane %v1800_v24, %v4574_v32 }
 0x168   : > { %v1106_v51 = vsel %vm1090_vm10, %v1077_v28, %v874_v15  ;;  %v1802_v16 = vcombine.high %v1800_v24, %v1800_v24  ;;  %v2729_v24 = vunpack.c.0.s8 %v2728_v27 }
 0x169   : > { %v1833_v25 = vcombine.high %v1823_v30, %v1823_v30  ;;  %v2382_v46 = vcombine.low %v1823_v30, %v1831_v26  ;;  %v903_v9 = vpop.permute.xlu1 %902  ;;  %v2397_v41 = vrot.slane %v2381_v37, %v4574_v32  ;;  %v1832_v2 = vcombine.high %v1816_v44, %v1816_v44 }
 0x16a   : > { %v1135_v21 = vsel %vm1119_vm11, %v1106_v51, %v903_v9  ;;  %v1830_v45 = vrot.slane %v1802_v16, %v4574_v32 }
 0x16b   : > { %v2383_v52 = vcombine.low %v1833_v25, %v1816_v44  ;;  %v1498_v20 = vcombine.high %v1135_v21, %v1135_v21  ;;  %v1505_v33 = vrot.slane %v1135_v21, %v4574_v32  ;;  %v2404_v42 = vrot.slane %v2382_v46, %v4574_v32 }
 0x16c   : > { %v2412_v31 = vcombine.low %v2390_v48, %v2397_v41  ;;  %v2429_v3 = vcombine.low %v1830_v45, %v1832_v2 }
 0x16d   : > { %v2411_v12 = vrot.slane %v2383_v52, %v4574_v32  ;;  %v1512_v54 = vrot.slane %v1498_v20, %v4574_v32  ;;  %v1513_v57 = vcombine.high %v1505_v33, %v1505_v33  ;;  %v1521_v53 = vrot.slane %v1505_v33, %v4574_v32 }
 0x16e   : > { %v2420_v63 = vrot.slane %v2412_v31, %v4574_v32  ;;  %v2436_v11 = vrot.slane %v2429_v3, %v4574_v32 }
 0x16f   : > { %v1514_v55 = vcombine.high %v1512_v54, %v1512_v54  ;;  %v1528_v58 = vrot.slane %v1512_v54, %v4574_v32  ;;  %v2413_v59 = vcombine.low %v2404_v42, %v2411_v12  ;;  %v1535_v39 = vrot.slane %v1513_v57, %v4574_v32 }
 0x170   : > { %v1543_v1 = vcombine.high %v1521_v53, %v1521_v53  ;;  %v2135_v40 = vcombine.low %v1496_v0, %v1521_v53  ;;  %v2443_v18 = vrot.slane %v2436_v11, %v4574_v32 }
 0x171   : > { %v1542_v35 = vrot.slane %v1514_v55, %v4574_v32  ;;  %v1544_v61 = vcombine.high %v1528_v58, %v1528_v58  ;;  %v2427_v56 = vrot.slane %v2413_v59, %v4574_v32  ;;  %v1545_v29 = vcombine.high %v1535_v39, %v1535_v39 }
 0x172   : > { %v2136_v49 = vcombine.low %v1535_v39, %v1543_v1  ;;  %v2145_v6 = vrot.slane %v2135_v40, %v4574_v32 }
 0x173   : > { %v2138_v47 = vcombine.low %v1542_v35, %v1544_v61  ;;  %v2428_v4 = vcombine.low %v2420_v63, %v2427_v56  ;;  %v2137_v62 = vcombine.low %v1545_v29, %v1528_v58 }
 0x174   : > { %v2152_v7 = vrot.slane %v2136_v49, %v4574_v32 }
 0x175   : > { %v2166_v8 = vrot.slane %v2138_v47, %v4574_v32  ;;  %4083 = vmatmul.mubr.msk.bf16.gmra.mrb[16].mxu1 %vm2471_vm12, %v2428_v4  ;;  %v2159_v23 = vrot.slane %v2137_v62, %v4574_v32 }
 0x176   : > { %v2167_v13 = vcombine.low %v2145_v6, %v2152_v7  ;;  %4086 = vmatprep.mubr.msk.bf16.mxu1 %vm4198_vm3, %v4197_v50  ;;  %v5139_v50 = vld [vmem:[%s5353_s2] ss:$0 sm:$0xff] }
 0x177   : > { %v2168_v5 = vcombine.low %v2159_v23, %v2166_v8 }
 0x178   : > { %v2175_v14 = vrot.slane %v2167_v13, %v4574_v32 }
 0x179   : > { %v2182_v10 = vrot.slane %v2168_v5, %v4574_v32  ;;  %v5143_v32 = vsub.s32 %v2729_v24, %v4558_v19 }
 0x17b   : > { %v2183_v34 = vcombine.low %v2175_v14, %v2182_v10 }
 0x17d   : > { %4087 = vmatmul.mubr.msk.bf16.gmra.mrb[20].mxu1 %vm2471_vm12, %v2443_v18  ;;  %4063 = vmatmul.mubr.msk.bf16.gmra.mrb[24].mxu0 %vm2471_vm12, %v2183_v34 }
 0x18f   : > { %v2549_v38 = vpop.f32.mrb[0].mxu0 }
 0x190   : > { %v2550_v17 = vadd.f32 %v5139_v50, %v2549_v38  ;;  %v4040_v60 = vpop.f32.mrb[1].mxu0 }
 0x191   : > { %v2552_v36 = vpop.f32.mrb[2].mxu0 }
 0x192   : > { %v2651_v28 = vmul.f32 0.1, %v2550_v17  ;;  %v2553_v15 = vadd.f32 %v5139_v50, %v2552_v36  ;;  %v4041_v43 = vpop.f32.mrb[3].mxu0 }
 0x194   : > { %v2676_v30 = vmax.f32 %v2550_v17, %v2651_v28  ;;  %v2652_v26 = vmul.f32 0.1, %v2553_v15 }
 0x196   : > { %v2726_v37 = vcombine.high %v2676_v30, %v2676_v30  ;;  %v2733_v44 = vrot.slane %v2676_v30, %v5143_v32  ;;  %v2677_v25 = vmax.f32 %v2553_v15, %v2652_v26 }
 0x198   : > { %v2740_v46 = vrot.slane %v2726_v37, %v5143_v32  ;;  %v2741_v51 = vcombine.high %v2733_v44, %v2733_v44  ;;  %v2743_v9 = vcombine.high %v2677_v25, %v2677_v25  ;;  %v2750_v16 = vrot.slane %v2677_v25, %v5143_v32 }
 0x19a   : > { %v2742_v41 = vcombine.high %v2740_v46, %v2740_v46  ;;  %v3142_v21 = vcombine.low %v2733_v44, %v2741_v51  ;;  %v2757_v19 = vrot.slane %v2743_v9, %v5143_v32  ;;  %v2758_v48 = vcombine.high %v2750_v16, %v2750_v16 }
 0x19c   : > { %v3143_v52 = vcombine.low %v2740_v46, %v2742_v41  ;;  %v3159_v20 = vcombine.low %v2750_v16, %v2758_v48  ;;  %v3150_v33 = vrot.slane %v3142_v21, %v5143_v32  ;;  %v3173_v31 = vrot.slane %v2757_v19, %v5143_v32 }
 0x19d   : > { %v2759_v61 = vcombine.high %v2757_v19, %v2757_v19 }
 0x19e   : > { %v3157_v42 = vrot.slane %v3143_v52, %v5143_v32  ;;  %v3166_v12 = vrot.slane %v3159_v20, %v5143_v32 }
 0x1a0   : > { %v3158_v54 = vcombine.low %v3150_v33, %v3157_v42  ;;  %v3174_v45 = vcombine.low %v3166_v12, %v3173_v31 }
 0x1a2   : > { %v3982_v0 = vpack.c.bf16 %v3158_v54, %v3158_v54  ;;  %v3983_v57 = vpack.c.bf16 %v3174_v45, %v3174_v45 }
 0x1a4   : > { %3745 = vst.msk [vmem:[%s5159_s20] sm:$0xf] %vm3744_vm13, %v3982_v0 }
 0x1a5   : > { %3747 = vst.msk [vmem:[%s5159_s20 + $0x4] sm:$0x7] %vm3746_vm14, %v3983_v57 }
 0x1ad   : > { %v2557_v53 = vpop.f32.mrb[4].mxu0 }
 0x1ae   : > { %v2558_v2 = vadd.f32 %v5139_v50, %v2557_v53  ;;  %v4044_v55 = vpop.f32.mrb[5].mxu0 }
 0x1af   : > { %v2560_v58 = vpop.f32.mrb[6].mxu0 }
 0x1b0   : > { %v2653_v59 = vmul.f32 0.1, %v2558_v2  ;;  %v2561_v39 = vadd.f32 %v5139_v50, %v2560_v58  ;;  %v4045_v1 = vpop.f32.mrb[7].mxu0 }
 0x1b2   : > { %v2678_v40 = vmax.f32 %v2558_v2, %v2653_v59  ;;  %v2654_v35 = vmul.f32 0.1, %v2561_v39 }
 0x1b4   : > { %v2760_v63 = vcombine.high %v2678_v40, %v2678_v40  ;;  %v2767_v56 = vrot.slane %v2678_v40, %v5143_v32  ;;  %v2679_v29 = vmax.f32 %v2561_v39, %v2654_v35 }
 0x1b6   : > { %v2774_v49 = vrot.slane %v2760_v63, %v5143_v32  ;;  %v2775_v3 = vcombine.high %v2767_v56, %v2767_v56  ;;  %v3175_v47 = vcombine.low %v2759_v61, %v2767_v56  ;;  %v2784_v4 = vrot.slane %v2679_v29, %v5143_v32 }
 0x1b7   : > { %v2777_v43 = vcombine.high %v2679_v29, %v2679_v29 }
 0x1b8   : > { %v3176_v62 = vcombine.low %v2775_v3, %v2774_v49  ;;  %v2776_v6 = vcombine.high %v2774_v49, %v2774_v49  ;;  %v2792_v7 = vcombine.high %v2784_v4, %v2784_v4  ;;  %v3183_v8 = vrot.slane %v3175_v47, %v5143_v32 }
 0x1b9   : > { %v2791_v16 = vrot.slane %v2777_v43, %v5143_v32 }
 0x1ba   : > { %v3190_v23 = vrot.slane %v3176_v62, %v5143_v32  ;;  %v3192_v13 = vcombine.low %v2776_v6, %v2784_v4  ;;  %v3206_v14 = vrot.slane %v2792_v7, %v5143_v32 }
 0x1bb   : > { %v2793_v0 = vcombine.high %v2791_v16, %v2791_v16 }
 0x1bc   : > { %v3191_v11 = vcombine.low %v3183_v8, %v3190_v23  ;;  %v3199_v5 = vrot.slane %v3192_v13, %v5143_v32 }
 0x1bd   : > { %v3208_v63 = vcombine.low %v2791_v16, %v2793_v0 }
 0x1be   : > { %v3984_v10 = vpack.c.bf16 %v3191_v11, %v3191_v11  ;;  %v3207_v18 = vcombine.low %v3199_v5, %v3206_v14 }
 0x1bf   : > { %v3216_v6 = vrot.slane %v3208_v63, %v5143_v32 }
 0x1c0   : > { %3748 = vst.msk [vmem:[%s5159_s20 + $0x8] sm:$0xf] %vm3744_vm13, %v3984_v10  ;;  %v3985_v34 = vpack.c.bf16 %v3207_v18, %v3207_v18 }
 0x1c2   : > { %3749 = vst.msk [vmem:[%s5159_s20 + $0xc] sm:$0x7] %vm3746_vm14, %v3985_v34 }
 0x1cb   : > { %v2605_v22 = vpop.f32.mrb[0].mxu1 }
 0x1cc   : > { %v2606_v27 = vadd.f32 %v5139_v50, %v2605_v22  ;;  %v4068_v24 = vpop.f32.mrb[1].mxu1 }
 0x1cd   : > { %v2608_v38 = vpop.f32.mrb[2].mxu1 }
 0x1ce   : > { %v2665_v17 = vmul.f32 0.1, %v2606_v27  ;;  %v2609_v60 = vadd.f32 %v5139_v50, %v2608_v38  ;;  %v4069_v36 = vpop.f32.mrb[3].mxu1 }
 0x1d0   : > { %v2690_v28 = vmax.f32 %v2606_v27, %v2665_v17  ;;  %v2666_v15 = vmul.f32 0.1, %v2609_v60 }
 0x1d2   : > { %v2964_v30 = vcombine.high %v2690_v28, %v2690_v28  ;;  %v2971_v26 = vrot.slane %v2690_v28, %v5143_v32  ;;  %v2691_v37 = vmax.f32 %v2609_v60, %v2666_v15 }
 0x1d4   : > { %v2978_v44 = vrot.slane %v2964_v30, %v5143_v32  ;;  %v2979_v25 = vcombine.high %v2971_v26, %v2971_v26  ;;  %v2981_v46 = vcombine.high %v2691_v37, %v2691_v37  ;;  %v2988_v51 = vrot.slane %v2691_v37, %v5143_v32 }
 0x1d5   : > { %v2565_v9 = vpop.f32.mrb[8].mxu0 }
 0x1d6   : > { %v2566_v41 = vadd.f32 %v5139_v50, %v2565_v9  ;;  %v4048_v21 = vpop.f32.mrb[9].mxu0  ;;  %v2980_v19 = vcombine.high %v2978_v44, %v2978_v44  ;;  %v3406_v48 = vcombine.low %v2971_v26, %v2979_v25  ;;  %v2995_v52 = vrot.slane %v2981_v46, %v5143_v32 }
 0x1d7   : > { %v2996_v20 = vcombine.high %v2988_v51, %v2988_v51  ;;  %v2568_v33 = vpop.f32.mrb[10].mxu0 }
 0x1d8   : > { %v2655_v42 = vmul.f32 0.1, %v2566_v41  ;;  %v2569_v12 = vadd.f32 %v5139_v50, %v2568_v33  ;;  %v4049_v31 = vpop.f32.mrb[11].mxu0  ;;  %v3407_v54 = vcombine.low %v2978_v44, %v2980_v19  ;;  %v3414_v2 = vrot.slane %v3406_v48, %v5143_v32 }
 0x1d9   : > { %v3423_v45 = vcombine.low %v2988_v51, %v2996_v20  ;;  %v3437_v59 = vrot.slane %v2995_v52, %v5143_v32  ;;  %v2997_v28 = vcombine.high %v2995_v52, %v2995_v52 }
 0x1da   : > { %v2680_v57 = vmax.f32 %v2566_v41, %v2655_v42  ;;  %v2656_v53 = vmul.f32 0.1, %v2569_v12  ;;  %v3421_v55 = vrot.slane %v3407_v54, %v5143_v32 }
 0x1db   : > { %v3430_v58 = vrot.slane %v3423_v45, %v5143_v32 }
 0x1dc   : > { %v2794_v39 = vcombine.high %v2680_v57, %v2680_v57  ;;  %v2801_v1 = vrot.slane %v2680_v57, %v5143_v32  ;;  %v2681_v40 = vmax.f32 %v2569_v12, %v2656_v53  ;;  %v3422_v35 = vcombine.low %v3414_v2, %v3421_v55 }
 0x1dd   : > { %v3438_v61 = vcombine.low %v3430_v58, %v3437_v59 }
 0x1de   : > { %v2808_v56 = vrot.slane %v2794_v39, %v5143_v32  ;;  %v2809_v29 = vcombine.high %v2801_v1, %v2801_v1  ;;  %v3998_v49 = vpack.c.bf16 %v3422_v35, %v3422_v35  ;;  %v2818_v62 = vrot.slane %v2681_v40, %v5143_v32 }
 0x1df   : > { %v3999_v3 = vpack.c.bf16 %v3438_v61, %v3438_v61  ;;  %v2811_v42 = vcombine.high %v2681_v40, %v2681_v40 }
 0x1e0   : > { %v2810_v47 = vcombine.high %v2808_v56, %v2808_v56  ;;  %v3209_v4 = vcombine.low %v2801_v1, %v2809_v29  ;;  %3762 = vst.msk [vmem:[%s5159_s20 + $0x40] sm:$0xf] %vm3744_vm13, %v3998_v49  ;;  %v3239_v11 = vrot.slane %v2818_v62, %v5143_v32  ;;  %v2826_v57 = vcombine.high %v2818_v62, %v2818_v62 }
 0x1e1   : > { %3763 = vst.msk [vmem:[%s5159_s20 + $0x44] sm:$0x7] %vm3746_vm14, %v3999_v3  ;;  %v2825_v0 = vrot.slane %v2811_v42, %v5143_v32 }
 0x1e2   : > { %v3223_v7 = vrot.slane %v3209_v4, %v5143_v32  ;;  %v3225_v8 = vcombine.low %v2808_v56, %v2810_v47 }
 0x1e3   : > { %v3241_v1 = vcombine.low %v2826_v57, %v2825_v0  ;;  %v2827_v40 = vcombine.high %v2825_v0, %v2825_v0 }
 0x1e4   : > { %v3224_v23 = vcombine.low %v3216_v6, %v3223_v7  ;;  %v3232_v13 = vrot.slane %v3225_v8, %v5143_v32 }
 0x1e5   : > { %v2613_v5 = vpop.f32.mrb[4].mxu1  ;;  %v3249_v47 = vrot.slane %v3241_v1, %v5143_v32 }
 0x1e6   : > { %v2614_v14 = vadd.f32 %v5139_v50, %v2613_v5  ;;  %v4072_v10 = vpop.f32.mrb[5].mxu1  ;;  %v3986_v18 = vpack.c.bf16 %v3224_v23, %v3224_v23  ;;  %v3240_v34 = vcombine.low %v3232_v13, %v3239_v11 }
 0x1e7   : > { %v2616_v22 = vpop.f32.mrb[6].mxu1 }
 0x1e8   : > { %v2667_v27 = vmul.f32 0.1, %v2614_v14  ;;  %v2617_v24 = vadd.f32 %v5139_v50, %v2616_v22  ;;  %v4073_v38 = vpop.f32.mrb[7].mxu1  ;;  %3750 = vst.msk [vmem:[%s5159_s20 + $0x10] sm:$0xf] %vm3744_vm13, %v3986_v18  ;;  %v3987_v17 = vpack.c.bf16 %v3240_v34, %v3240_v34 }
 0x1ea   : > { %v2692_v60 = vmax.f32 %v2614_v14, %v2667_v27  ;;  %v2668_v36 = vmul.f32 0.1, %v2617_v24  ;;  %3751 = vst.msk [vmem:[%s5159_s20 + $0x14] sm:$0x7] %vm3746_vm14, %v3987_v17 }
 0x1ec   : > { %v2998_v15 = vcombine.high %v2692_v60, %v2692_v60  ;;  %v3005_v43 = vrot.slane %v2692_v60, %v5143_v32  ;;  %v2693_v30 = vmax.f32 %v2617_v24, %v2668_v36 }
 0x1ee   : > { %v3012_v26 = vrot.slane %v2998_v15, %v5143_v32  ;;  %v3013_v37 = vcombine.high %v3005_v43, %v3005_v43  ;;  %v3439_v44 = vcombine.low %v2997_v28, %v3005_v43  ;;  %v3022_v25 = vrot.slane %v2693_v30, %v5143_v32 }
 0x1ef   : > { %v3015_v23 = vcombine.high %v2693_v30, %v2693_v30 }
 0x1f0   : > { %v3440_v46 = vcombine.low %v3013_v37, %v3012_v26  ;;  %v3014_v51 = vcombine.high %v3012_v26, %v3012_v26  ;;  %v3030_v9 = vcombine.high %v3022_v25, %v3022_v25  ;;  %v3447_v16 = vrot.slane %v3439_v44, %v5143_v32 }
 0x1f1   : > { %v3029_v24 = vrot.slane %v3015_v23, %v5143_v32 }
 0x1f2   : > { %v3454_v41 = vrot.slane %v3440_v46, %v5143_v32  ;;  %v3456_v21 = vcombine.low %v3014_v51, %v3022_v25  ;;  %v3470_v52 = vrot.slane %v3030_v9, %v5143_v32 }
 0x1f3   : > { %v3031_v25 = vcombine.high %v3029_v24, %v3029_v24 }
 0x1f4   : > { %v3455_v19 = vcombine.low %v3447_v16, %v3454_v41  ;;  %v3463_v48 = vrot.slane %v3456_v21, %v5143_v32 }
 0x1f6   : > { %v4000_v20 = vpack.c.bf16 %v3455_v19, %v3455_v19  ;;  %v3471_v33 = vcombine.low %v3463_v48, %v3470_v52  ;;  %v3472_v19 = vcombine.low %v3029_v24, %v3031_v25 }
 0x1f8   : > { %3764 = vst.msk [vmem:[%s5159_s20 + $0x48] sm:$0xf] %vm3744_vm13, %v4000_v20  ;;  %v4001_v12 = vpack.c.bf16 %v3471_v33, %v3471_v33 }
 0x1f9   : > { %v2573_v31 = vpop.f32.mrb[12].mxu0 }
 0x1fa   : > { %3765 = vst.msk [vmem:[%s5159_s20 + $0x4c] sm:$0x7] %vm3746_vm14, %v4001_v12  ;;  %v2574_v54 = vadd.f32 %v5139_v50, %v2573_v31  ;;  %v4052_v45 = vpop.f32.mrb[13].mxu0 }
 0x1fb   : > { %v2576_v53 = vpop.f32.mrb[14].mxu0  ;;  %v3480_v45 = vrot.slane %v3472_v19, %v5143_v32 }
 0x1fc   : > { %v2657_v2 = vmul.f32 0.1, %v2574_v54  ;;  %v2577_v55 = vadd.f32 %v5139_v50, %v2576_v53  ;;  %v4053_v58 = vpop.f32.mrb[15].mxu0 }
 0x1fe   : > { %v2682_v59 = vmax.f32 %v2574_v54, %v2657_v2  ;;  %v2658_v39 = vmul.f32 0.1, %v2577_v55 }
 0x200   : > { %v2828_v35 = vcombine.high %v2682_v59, %v2682_v59  ;;  %v2835_v61 = vrot.slane %v2682_v59, %v5143_v32  ;;  %v2683_v63 = vmax.f32 %v2577_v55, %v2658_v39 }
 0x202   : > { %v2842_v56 = vrot.slane %v2828_v35, %v5143_v32  ;;  %v2843_v29 = vcombine.high %v2835_v61, %v2835_v61  ;;  %v3242_v49 = vcombine.low %v2827_v40, %v2835_v61  ;;  %v2845_v3 = vcombine.high %v2683_v63, %v2683_v63 }
 0x203   : > { %v2852_v4 = vrot.slane %v2683_v63, %v5143_v32 }
 0x204   : > { %v2844_v62 = vcombine.high %v2842_v56, %v2842_v56  ;;  %v3256_v6 = vrot.slane %v3242_v49, %v5143_v32  ;;  %v3258_v7 = vcombine.low %v2843_v29, %v2842_v56  ;;  %v2859_v8 = vrot.slane %v2845_v3, %v5143_v32 }
 0x205   : > { %v2860_v13 = vcombine.high %v2852_v4, %v2852_v4 }
 0x206   : > { %v3257_v11 = vcombine.low %v3249_v47, %v3256_v6  ;;  %v3265_v5 = vrot.slane %v3258_v7, %v5143_v32  ;;  %v3272_v14 = vrot.slane %v2844_v62, %v5143_v32  ;;  %v2861_v10 = vcombine.high %v2859_v8, %v2859_v8 }
 0x207   : > { %v3274_v18 = vcombine.low %v2852_v4, %v2860_v13 }
 0x208   : > { %v3273_v34 = vcombine.low %v3265_v5, %v3272_v14  ;;  %v3988_v22 = vpack.c.bf16 %v3257_v11, %v3257_v11  ;;  %v3275_v27 = vcombine.low %v2859_v8, %v2861_v10 }
 0x209   : > { %v2621_v38 = vpop.f32.mrb[8].mxu1  ;;  %v3282_v60 = vrot.slane %v3274_v18, %v5143_v32 }
 0x20a   : > { %v3989_v17 = vpack.c.bf16 %v3273_v34, %v3273_v34  ;;  %3752 = vst.msk [vmem:[%s5159_s20 + $0x18] sm:$0xf] %vm3744_vm13, %v3988_v22  ;;  %v3289_v36 = vrot.slane %v3275_v27, %v5143_v32  ;;  %v2622_v28 = vadd.f32 %v5139_v50, %v2621_v38  ;;  %v4076_v15 = vpop.f32.mrb[9].mxu1 }
 0x20b   : > { %v2624_v43 = vpop.f32.mrb[10].mxu1 }
 0x20c   : > { %3753 = vst.msk [vmem:[%s5159_s20 + $0x1c] sm:$0x7] %vm3746_vm14, %v3989_v17  ;;  %v3290_v30 = vcombine.low %v3282_v60, %v3289_v36  ;;  %v2669_v26 = vmul.f32 0.1, %v2622_v28  ;;  %v2625_v37 = vadd.f32 %v5139_v50, %v2624_v43  ;;  %v4077_v44 = vpop.f32.mrb[11].mxu1 }
 0x20e   : > { %v3990_v46 = vpack.c.bf16 %v3290_v30, %v3290_v30  ;;  %v2694_v51 = vmax.f32 %v2622_v28, %v2669_v26  ;;  %v2670_v9 = vmul.f32 0.1, %v2625_v37 }
 0x210   : > { %3754 = vst.msk [vmem:[%s5159_s20 + $0x20] sm:$0xf] %vm3744_vm13, %v3990_v46  ;;  %v3032_v16 = vcombine.high %v2694_v51, %v2694_v51  ;;  %v3039_v41 = vrot.slane %v2694_v51, %v5143_v32  ;;  %v2695_v21 = vmax.f32 %v2625_v37, %v2670_v9 }
 0x212   : > { %v3046_v48 = vrot.slane %v3032_v16, %v5143_v32  ;;  %v3047_v52 = vcombine.high %v3039_v41, %v3039_v41  ;;  %v3056_v42 = vrot.slane %v2695_v21, %v5143_v32  ;;  %v3049_v17 = vcombine.high %v2695_v21, %v2695_v21 }
 0x213   : > { %v2581_v12 = vpop.f32.mrb[16].mxu0 }
 0x214   : > { %v3048_v20 = vcombine.high %v3046_v48, %v3046_v48  ;;  %v3473_v33 = vcombine.low %v3039_v41, %v3047_v52  ;;  %v2582_v31 = vadd.f32 %v5139_v50, %v2581_v12  ;;  %v4056_v54 = vpop.f32.mrb[17].mxu0  ;;  %v3503_v1 = vrot.slane %v3056_v42, %v5143_v32 }
 0x215   : > { %v2584_v53 = vpop.f32.mrb[18].mxu0  ;;  %v3063_v15 = vrot.slane %v3049_v17, %v5143_v32  ;;  %v3064_v43 = vcombine.high %v3056_v42, %v3056_v42 }
 0x216   : > { %v3487_v0 = vrot.slane %v3473_v33, %v5143_v32  ;;  %v3489_v57 = vcombine.low %v3046_v48, %v3048_v20  ;;  %v2659_v2 = vmul.f32 0.1, %v2582_v31  ;;  %v2585_v55 = vadd.f32 %v5139_v50, %v2584_v53  ;;  %v4057_v58 = vpop.f32.mrb[19].mxu0 }
 0x217   : > { %v3505_v51 = vcombine.low %v3064_v43, %v3063_v15  ;;  %v3065_v9 = vcombine.high %v3063_v15, %v3063_v15 }
 0x218   : > { %v3488_v59 = vcombine.low %v3480_v45, %v3487_v0  ;;  %v3496_v39 = vrot.slane %v3489_v57, %v5143_v32  ;;  %v2684_v40 = vmax.f32 %v2582_v31, %v2659_v2  ;;  %v2660_v35 = vmul.f32 0.1, %v2585_v55 }
 0x219   : > { %v3513_v33 = vrot.slane %v3505_v51, %v5143_v32 }
 0x21a   : > { %v4002_v61 = vpack.c.bf16 %v3488_v59, %v3488_v59  ;;  %v3504_v63 = vcombine.low %v3496_v39, %v3503_v1  ;;  %v2862_v56 = vcombine.high %v2684_v40, %v2684_v40  ;;  %v2869_v29 = vrot.slane %v2684_v40, %v5143_v32 }
 0x21b   : > { %v2685_v49 = vmax.f32 %v2585_v55, %v2660_v35 }
 0x21c   : > { %3766 = vst.msk [vmem:[%s5159_s20 + $0x50] sm:$0xf] %vm3744_vm13, %v4002_v61  ;;  %v4003_v3 = vpack.c.bf16 %v3504_v63, %v3504_v63  ;;  %v2876_v47 = vrot.slane %v2862_v56, %v5143_v32  ;;  %v2877_v4 = vcombine.high %v2869_v29, %v2869_v29 }
 0x21d   : > { %v2879_v62 = vcombine.high %v2685_v49, %v2685_v49  ;;  %v2886_v6 = vrot.slane %v2685_v49, %v5143_v32 }
 0x21e   : > { %3767 = vst.msk [vmem:[%s5159_s20 + $0x54] sm:$0x7] %vm3746_vm14, %v4003_v3  ;;  %v3291_v7 = vcombine.low %v2869_v29, %v2877_v4  ;;  %v2878_v8 = vcombine.high %v2876_v47, %v2876_v47  ;;  %v3305_v5 = vrot.slane %v2876_v47, %v5143_v32 }
 0x21f   : > { %v5258_v23 = vrot.slane %v2879_v62, %v5143_v32  ;;  %v2894_v13 = vcombine.high %v2886_v6, %v2886_v6 }
 0x220   : > { %v3298_v11 = vrot.slane %v3291_v7, %v5143_v32  ;;  %v3307_v14 = vcombine.low %v2878_v8, %v2886_v6 }
 0x221   : > { %v3308_v10 = vcombine.low %v2894_v13, %v5258_v23  ;;  %v2895_v7 = vcombine.high %v5258_v23, %v5258_v23 }
 0x222   : > { %v3306_v18 = vcombine.low %v3298_v11, %v3305_v5  ;;  %v3315_v34 = vrot.slane %v3307_v14, %v5143_v32 }
 0x223   : > { %v3322_v22 = vrot.slane %v3308_v10, %v5143_v32 }
 0x224   : > { %v3991_v27 = vpack.c.bf16 %v3306_v18, %v3306_v18 }
 0x225   : > { %v3323_v24 = vcombine.low %v3315_v34, %v3322_v22 }
 0x226   : > { %3755 = vst.msk [vmem:[%s5159_s20 + $0x24] sm:$0x7] %vm3746_vm14, %v3991_v27 }
 0x227   : > { %v3992_v38 = vpack.c.bf16 %v3323_v24, %v3323_v24 }
 0x229   : > { %3756 = vst.msk [vmem:[%s5159_s20 + $0x28] sm:$0xf] %vm3744_vm13, %v3992_v38 }
 0x22d   : > { %v2629_v60 = vpop.f32.mrb[12].mxu1 }
 0x22e   : > { %v2630_v36 = vadd.f32 %v5139_v50, %v2629_v60  ;;  %v4080_v28 = vpop.f32.mrb[13].mxu1 }
 0x22f   : > { %v2632_v30 = vpop.f32.mrb[14].mxu1 }
 0x230   : > { %v2671_v26 = vmul.f32 0.1, %v2630_v36  ;;  %v2633_v37 = vadd.f32 %v5139_v50, %v2632_v30  ;;  %v4081_v44 = vpop.f32.mrb[15].mxu1 }
 0x232   : > { %v2696_v25 = vmax.f32 %v2630_v36, %v2671_v26  ;;  %v2672_v46 = vmul.f32 0.1, %v2633_v37 }
 0x234   : > { %v3066_v16 = vcombine.high %v2696_v25, %v2696_v25  ;;  %v3073_v41 = vrot.slane %v2696_v25, %v5143_v32  ;;  %v2697_v21 = vmax.f32 %v2633_v37, %v2672_v46 }
 0x236   : > { %v3080_v19 = vrot.slane %v3066_v16, %v5143_v32  ;;  %v3081_v48 = vcombine.high %v3073_v41, %v3073_v41  ;;  %v3506_v52 = vcombine.low %v3065_v9, %v3073_v41  ;;  %v3083_v20 = vcombine.high %v2697_v21, %v2697_v21 }
 0x237   : > { %v3090_v42 = vrot.slane %v2697_v21, %v5143_v32 }
 0x238   : > { %v2589_v12 = vpop.f32.mrb[20].mxu0  ;;  %v3082_v31 = vcombine.high %v3080_v19, %v3080_v19  ;;  %v3520_v54 = vrot.slane %v3506_v52, %v5143_v32  ;;  %v3522_v45 = vcombine.low %v3081_v48, %v3080_v19  ;;  %v3097_v0 = vrot.slane %v3083_v20, %v5143_v32 }
 0x239   : > { %v4060_v57 = vpop.f32.mrb[21].mxu0  ;;  %v3098_v53 = vcombine.high %v3090_v42, %v3090_v42  ;;  %v2590_v2 = vadd.f32 %v5139_v50, %v2589_v12 }
 0x23a   : > { %v2592_v55 = vpop.f32.mrb[22].mxu0  ;;  %v3521_v58 = vcombine.low %v3513_v33, %v3520_v54  ;;  %v3529_v59 = vrot.slane %v3522_v45, %v5143_v32  ;;  %v3536_v39 = vrot.slane %v3082_v31, %v5143_v32  ;;  %v3099_v1 = vcombine.high %v3097_v0, %v3097_v0 }
 0x23b   : > { %v4061_v40 = vpop.f32.mrb[23].mxu0  ;;  %v3538_v35 = vcombine.low %v3090_v42, %v3098_v53  ;;  %v2661_v61 = vmul.f32 0.1, %v2590_v2  ;;  %v2593_v63 = vadd.f32 %v5139_v50, %v2592_v55 }
 0x23c   : > { %v3537_v56 = vcombine.low %v3529_v59, %v3536_v39  ;;  %v4004_v29 = vpack.c.bf16 %v3521_v58, %v3521_v58  ;;  %v3539_v49 = vcombine.low %v3097_v0, %v3099_v1 }
 0x23d   : > { %v2686_v3 = vmax.f32 %v2590_v2, %v2661_v61  ;;  %v2662_v47 = vmul.f32 0.1, %v2593_v63  ;;  %v3546_v62 = vrot.slane %v3538_v35, %v5143_v32 }
 0x23e   : > { %v4005_v4 = vpack.c.bf16 %v3537_v56, %v3537_v56  ;;  %3768 = vst.msk [vmem:[%s5159_s20 + $0x58] sm:$0xf] %vm3744_vm13, %v4004_v29  ;;  %v3553_v6 = vrot.slane %v3539_v49, %v5143_v32 }
 0x23f   : > { %v2896_v8 = vcombine.high %v2686_v3, %v2686_v3  ;;  %v2903_v13 = vrot.slane %v2686_v3, %v5143_v32  ;;  %v2687_v11 = vmax.f32 %v2593_v63, %v2662_v47 }
 0x240   : > { %3769 = vst.msk [vmem:[%s5159_s20 + $0x5c] sm:$0x7] %vm3746_vm14, %v4005_v4  ;;  %v3554_v5 = vcombine.low %v3546_v62, %v3553_v6 }
 0x241   : > { %v2910_v14 = vrot.slane %v2896_v8, %v5143_v32  ;;  %v2911_v10 = vcombine.high %v2903_v13, %v2903_v13  ;;  %v3324_v18 = vcombine.low %v2895_v7, %v2903_v13  ;;  %v2920_v22 = vrot.slane %v2687_v11, %v5143_v32 }
 0x242   : > { %v4006_v34 = vpack.c.bf16 %v3554_v5, %v3554_v5  ;;  %v2913_v43 = vcombine.high %v2687_v11, %v2687_v11 }
 0x243   : > { %v2912_v27 = vcombine.high %v2910_v14, %v2910_v14  ;;  %v3331_v24 = vrot.slane %v3324_v18, %v5143_v32  ;;  %v3338_v23 = vrot.slane %v2911_v10, %v5143_v32  ;;  %v2928_v38 = vcombine.high %v2920_v22, %v2920_v22 }
 0x244   : > { %3770 = vst.msk [vmem:[%s5159_s20 + $0x60] sm:$0xf] %vm3744_vm13, %v4006_v34  ;;  %v2927_v41 = vrot.slane %v2913_v43, %v5143_v32 }
 0x245   : > { %v3339_v17 = vcombine.low %v3331_v24, %v3338_v23  ;;  %v3340_v60 = vcombine.low %v2910_v14, %v2912_v27  ;;  %v3341_v36 = vcombine.low %v2920_v22, %v2928_v38 }
 0x246   : > { %v2929_v42 = vcombine.high %v2927_v41, %v2927_v41 }
 0x247   : > { %v3348_v28 = vrot.slane %v3340_v60, %v5143_v32  ;;  %v3993_v15 = vpack.c.bf16 %v3339_v17, %v3339_v17  ;;  %v3355_v26 = vrot.slane %v3341_v36, %v5143_v32 }
 0x248   : > { %v2637_v30 = vpop.f32.mrb[16].mxu1  ;;  %v3357_v47 = vcombine.low %v2927_v41, %v2929_v42 }
 0x249   : > { %v2638_v37 = vadd.f32 %v5139_v50, %v2637_v30  ;;  %v4084_v44 = vpop.f32.mrb[17].mxu1  ;;  %3757 = vst.msk [vmem:[%s5159_s20 + $0x2c] sm:$0x7] %vm3746_vm14, %v3993_v15  ;;  %v3356_v46 = vcombine.low %v3348_v28, %v3355_v26 }
 0x24a   : > { %v2640_v25 = vpop.f32.mrb[18].mxu1  ;;  %v3364_v27 = vrot.slane %v3357_v47, %v5143_v32 }
 0x24b   : > { %v2673_v51 = vmul.f32 0.1, %v2638_v37  ;;  %v2641_v9 = vadd.f32 %v5139_v50, %v2640_v25  ;;  %v4085_v16 = vpop.f32.mrb[19].mxu1  ;;  %v3994_v21 = vpack.c.bf16 %v3356_v46, %v3356_v46 }
 0x24d   : > { %v2698_v19 = vmax.f32 %v2638_v37, %v2673_v51  ;;  %v2674_v48 = vmul.f32 0.1, %v2641_v9  ;;  %3758 = vst.msk [vmem:[%s5159_s20 + $0x30] sm:$0xf] %vm3744_vm13, %v3994_v21 }
 0x24f   : > { %v3100_v52 = vcombine.high %v2698_v19, %v2698_v19  ;;  %v3107_v20 = vrot.slane %v2698_v19, %v5143_v32  ;;  %v2699_v33 = vmax.f32 %v2641_v9, %v2674_v48 }
 0x250   : > { %v2645_v12 = vpop.f32.mrb[20].mxu1  ;;  %v2597_v57 = vpop.f32.mrb[24].mxu0 }
 0x251   : > { %v3114_v31 = vrot.slane %v3100_v52, %v5143_v32  ;;  %v3115_v54 = vcombine.high %v3107_v20, %v3107_v20  ;;  %v3117_v45 = vcombine.high %v2699_v33, %v2699_v33  ;;  %v3124_v0 = vrot.slane %v2699_v33, %v5143_v32  ;;  %v4088_v53 = vpop.f32.mrb[21].mxu1  ;;  %v4064_v58 = vpop.f32.mrb[25].mxu0 }
 0x252   : > { %v2598_v2 = vadd.f32 %v5139_v50, %v2597_v57  ;;  %v2646_v55 = vadd.f32 %v5139_v50, %v2645_v12  ;;  %v2648_v59 = vpop.f32.mrb[22].mxu1  ;;  %v2600_v35 = vpop.f32.mrb[26].mxu0 }
 0x253   : > { %v3555_v39 = vcombine.low %v3107_v20, %v3115_v54  ;;  %v3116_v1 = vcombine.high %v3114_v31, %v3114_v31  ;;  %v3131_v40 = vrot.slane %v3117_v45, %v5143_v32  ;;  %v4089_v61 = vpop.f32.mrb[23].mxu1  ;;  %v3132_v63 = vcombine.high %v3124_v0, %v3124_v0  ;;  %v4065_v3 = vpop.f32.mrb[27].mxu0 }
 0x254   : > { %v2663_v56 = vmul.f32 0.1, %v2598_v2  ;;  %v2675_v29 = vmul.f32 0.1, %v2646_v55  ;;  %v2601_v49 = vadd.f32 %v5139_v50, %v2600_v35  ;;  %v3569_v62 = vrot.slane %v3114_v31, %v5143_v32 }
 0x255   : > { %v3562_v4 = vrot.slane %v3555_v39, %v5143_v32  ;;  %v3571_v6 = vcombine.low %v3116_v1, %v3124_v0  ;;  %v3572_v7 = vcombine.low %v3132_v63, %v3131_v40  ;;  %v3133_v24 = vcombine.high %v3131_v40, %v3131_v40 }
 0x256   : > { %v2688_v8 = vmax.f32 %v2598_v2, %v2663_v56  ;;  %v2700_v13 = vmax.f32 %v2646_v55, %v2675_v29  ;;  %v2664_v11 = vmul.f32 0.1, %v2601_v49 }
 0x257   : > { %v3570_v5 = vcombine.low %v3562_v4, %v3569_v62  ;;  %v3579_v14 = vrot.slane %v3571_v6, %v5143_v32  ;;  %v3586_v10 = vrot.slane %v3572_v7, %v5143_v32 }
 0x258   : > { %v2930_v18 = vcombine.high %v2688_v8, %v2688_v8  ;;  %v2937_v50 = vrot.slane %v2688_v8, %v5143_v32  ;;  %v3140_v34 = vrot.slane %v2700_v13, %v5143_v32  ;;  %v2689_v23 = vmax.f32 %v2601_v49, %v2664_v11 }
 0x259   : > { %v4007_v22 = vpack.c.bf16 %v3570_v5, %v3570_v5  ;;  %v3587_v38 = vcombine.low %v3579_v14, %v3586_v10 }
 0x25a   : > { %v2944_v17 = vrot.slane %v2930_v18, %v5143_v32  ;;  %v2945_v60 = vcombine.high %v2937_v50, %v2937_v50  ;;  %v3371_v36 = vrot.slane %v2937_v50, %v5143_v32  ;;  %v3141_v28 = vcombine.high %v3140_v34, %v3140_v34 }
 0x25b   : > { %3771 = vst.msk [vmem:[%s5159_s20 + $0x64] sm:$0x7] %vm3746_vm14, %v4007_v22  ;;  %v3588_v15 = vcombine.low %v3133_v24, %v3140_v34  ;;  %v2947_v43 = vcombine.high %v2689_v23, %v2689_v23  ;;  %v2954_v30 = vrot.slane %v2689_v23, %v5143_v32  ;;  %v4008_v26 = vpack.c.bf16 %v3587_v38, %v3587_v38 }
 0x25c   : > { %v3372_v37 = vcombine.low %v3364_v27, %v3371_v36  ;;  %v3373_v44 = vcombine.low %v2945_v60, %v2944_v17  ;;  %v2946_v25 = vcombine.high %v2944_v17, %v2944_v17  ;;  %v3602_v51 = vrot.slane %v3141_v28, %v5143_v32 }
 0x25d   : > { %v3595_v46 = vrot.slane %v3588_v15, %v5143_v32  ;;  %v2961_v9 = vrot.slane %v2947_v43, %v5143_v32  ;;  %v2962_v16 = vcombine.high %v2954_v30, %v2954_v30  ;;  %3772 = vst.msk [vmem:[%s5159_s20 + $0x68] sm:$0xf] %vm3744_vm13, %v4008_v26 }
 0x25e   : > { %v3995_v41 = vpack.c.bf16 %v3372_v37, %v3372_v37  ;;  %v3374_v21 = vcombine.low %v2946_v25, %v2954_v30  ;;  %v3381_v20 = vrot.slane %v3373_v44, %v5143_v32 }
 0x25f   : > { %v3603_v19 = vcombine.low %v3595_v46, %v3602_v51  ;;  %v2963_v48 = vcombine.high %v2961_v9, %v2961_v9  ;;  %v3390_v52 = vcombine.low %v2962_v16, %v2961_v9 }
 0x260   : > { %3759 = vst.msk [vmem:[%s5159_s20 + $0x34] sm:$0x7] %vm3746_vm14, %v3995_v41  ;;  %v3388_v33 = vrot.slane %v3374_v21, %v5143_v32 }
 0x261   : > { %v4009_v42 = vpack.c.bf16 %v3603_v19, %v3603_v19  ;;  %v3397_v12 = vrot.slane %v3390_v52, %v5143_v32  ;;  %v3404_v31 = vrot.slane %v2963_v48, %v5143_v32 }
 0x262   : > { %v3389_v54 = vcombine.low %v3381_v20, %v3388_v33 }
 0x263   : > { %3773 = vst.msk [vmem:[%s5159_s20 + $0x6c] sm:$0x7] %vm3746_vm14, %v4009_v42  ;;  %v3405_v45 = vcombine.low %v3397_v12, %v3404_v31 }
 0x264   : > { %v3996_v0 = vpack.c.bf16 %v3389_v54, %v3389_v54 }
 0x265   : > { %v3997_v57 = vpack.c.bf16 %v3405_v45, %v3405_v45 }
 0x266   : > { %3760 = vst.msk [vmem:[%s5159_s20 + $0x38] sm:$0xf] %vm3744_vm13, %v3996_v0 }
 0x267   : > { %3761 = vst.msk [vmem:[%s5159_s20 + $0x3c] sm:$0x7] %vm3746_vm14, %v3997_v57 }
 0x268 PF: > { %s13_s14 = sadd.s32 1, %s4186_s14   ;;  %s5357_s12 = smov %s4182_s13 }
 0x269   : > { %p10_p5 = scmp.ge.s32.totalorder %s13_s14, 4   ;;  %s5358_s13 = smov %s5360_s15 }
 0x26b   :  { %12 = sbr.rel (!%p10_p5) target bundleno = 2 (0x2), region = 74 }

</bundles_post_ra>
